<compile_context>
chip_gen: v7x
topology: tpu7x:2x2x1
jax: 0.10.0
libtpu: 0.0.40
codegen_flags: <defaults>
</compile_context>

<pallas_src>
import functools
import math

import jax
import jax.numpy as jnp
import numpy as np
from jax import lax
from jax.experimental import pallas as pl
from jax.experimental.pallas import tpu as pltpu

_CHUNK = 8             # sublane rows per compute chunk: one full f32 vreg per live value
_MAX_BLOCK_ROWS = 512  # rows (of 128 lanes) per grid step -> ~1 MiB f32 per array per block


# ---------------------------------------------------------------------------
# GradientApproxInvCos constants (derived from beta exactly as the PyTorch
# __init__ does; the original assigns t1.grad to BOTH m1 and m2 -- reproduced).
# ---------------------------------------------------------------------------
def _inv_cos_constants(beta=0.1):
    t1 = 1.0 - beta
    t2 = -1.0 + beta
    grad_t1 = -2.0 / math.sqrt(1.0 - t1 * t1)   # d/dt [2*arccos(t)] evaluated at t1
    m1 = grad_t1
    m2 = grad_t1                                # (sic) same value, matching the PyTorch code
    b1 = 2.0 * math.acos(t1) - m1 * t1
    b2 = 2.0 * math.acos(t2) - m2 * t2
    return (np.float32(m1), np.float32(b1), np.float32(m2), np.float32(b2))


# ---------------------------------------------------------------------------
# Fused dist():  2*arccos(x) with the GradientApproxInvCos linear tails.
#   arccos: division-free A&S 4.4.46 polynomial (|err| <= 2e-8 on [0,1]),
#   reflected for x < 0.  NaN for |x| > 1 (matches torch.arccos).
#   Only mul/add/abs/select on the VALU + one sqrt (EUP slot).
# ---------------------------------------------------------------------------
def _dist(x, *, mode, beta, m1, b1, m2, b2):
    xa = jnp.abs(x)
    neg = x < 0.0
    p = jnp.float32(-0.0012624911)
    p = p * xa + jnp.float32(0.0066700901)
    p = p * xa + jnp.float32(-0.0170881256)
    p = p * xa + jnp.float32(0.0308918810)
    p = p * xa + jnp.float32(-0.0501743046)
    p = p * xa + jnp.float32(0.0889789874)
    p = p * xa + jnp.float32(-0.2145988016)
    p = p * xa + jnp.float32(1.5707963050)
    r = jnp.sqrt(1.0 - xa) * p                          # NaN when |x| > 1
    y_rot = 2.0 * jnp.where(neg, jnp.float32(math.pi) - r, r)
    if not mode:
        return y_rot
    # PyTorch mask-multiply blend collapses to:
    #   y_rot                 for x in [-1+beta, 1-beta]
    #   m*x+b1 / m*x+b2       for x in [-1, -1+beta) / (1-beta, 1]
    #   NaN                   for |x| > 1 or NaN  (NaN from 2*arccos leaks through y_rot*0)
    # m1 == m2 by construction in the original, so a single slope is used.
    use_lin = jnp.logical_and(xa > 1.0 - beta, xa <= 1.0)
    lin = m1 * x + jnp.where(neg, b1, b2)
    return jnp.where(use_lin, lin, y_rot)


# ---------------------------------------------------------------------------
# Pallas kernel: conj + Hamilton product + outer product with the symmetry
# table + component-wise max over symmetries + approx inv-cos, on (8,128) slabs.
# ---------------------------------------------------------------------------
def _mat_kernel(syms_ref, qsr_ref, qhr_ref, out_ref, *,
                n_syms, n_chunks, chunk, mode, beta, m1, b1, m2, b2):
    dist = functools.partial(_dist, mode=mode, beta=beta, m1=m1, b1=b1, m2=m2, b2=b2)

    def body(c, carry):
        r0 = pl.multiple_of(c * chunk, chunk)
        rows = pl.ds(r0, chunk)

        # qHR components; the conjugation is folded into the product signs below.
        hw = qhr_ref[0, rows, :]
        hx = qhr_ref[1, rows, :]
        hy = qhr_ref[2, rows, :]
        hz = qhr_ref[3, rows, :]
        bw = qsr_ref[0, rows, :]
        bx = qsr_ref[1, rows, :]
        by = qsr_ref[2, rows, :]
        bz = qsr_ref[3, rows, :]

        # T = conj(qHR) * qSR   (Hamilton product, scalar-first convention)
        tw = hw * bw + hx * bx + hy * by + hz * bz
        tx = hw * bx - hx * bw - hy * bz + hz * by
        ty = hw * by + hx * bz - hy * bw - hz * bx
        tz = hw * bz - hx * by + hy * bx - hz * bw

        # outer_prod(T, syms) followed by torch.max(dim=-2): two (even/odd)
        # running component-wise maxima so the max dependency chain is halved.
        # (T_syms[..., 0] is dead code in the original forward; skipped.)
        acc = [None, None]
        for s in range(n_syms):
            sw = syms_ref[4 * s + 0]
            sx = syms_ref[4 * s + 1]
            sy = syms_ref[4 * s + 2]
            sz = syms_ref[4 * s + 3]
            rw = tw * sw - tx * sx - ty * sy - tz * sz
            rx = tw * sx + tx * sw + ty * sz - tz * sy
            ry = tw * sy - tx * sz + ty * sw + tz * sx
            rz = tw * sz + tx * sy - ty * sx + tz * sw
            a = s & 1
            if acc[a] is None:
                acc[a] = (rw, rx, ry, rz)
            else:
                pw, px, py, pz = acc[a]
                acc[a] = (jnp.maximum(pw, rw), jnp.maximum(px, rx),
                          jnp.maximum(py, ry), jnp.maximum(pz, rz))

        if acc[1] is None:
            mw, mx, my, mz = acc[0]
        else:
            mw = jnp.maximum(acc[0][0], acc[1][0])
            mx = jnp.maximum(acc[0][1], acc[1][1])
            my = jnp.maximum(acc[0][2], acc[1][2])
            mz = jnp.maximum(acc[0][3], acc[1][3])

        out_ref[0, rows, :] = dist(mw)
        out_ref[1, rows, :] = dist(mx)
        out_ref[2, rows, :] = dist(my)
        out_ref[3, rows, :] = dist(mz)
        return carry

    lax.fori_loop(0, n_chunks, body, 0)


def _round_up(x, m):
    return (x + m - 1) // m * m


def minimum_angle_transformation(qSR, qHR, syms, *, mode=True, beta=0.1,
                                 max_block_rows=_MAX_BLOCK_ROWS):
    """qSR, qHR: (..., 4) float32 quaternions (w,x,y,z); syms: (S, 4). Returns (..., 4).

    Inputs are relayouted once to component-major (4, n_rows, 128) slabs (single fused
    pad+transpose+reshape). Callers that can hold quaternions component-major should do so
    to avoid this extra HBM pass entirely.
    """
    assert qSR.shape == qHR.shape and qSR.shape[-1] == 4
    assert syms.ndim == 2 and syms.shape[-1] == 4
    batch_shape = qSR.shape[:-1]
    N = 1
    for d in batch_shape:
        N *= int(d)
    S = syms.shape[0]

    qSR2 = qSR.reshape(N, 4)
    qHR2 = qHR.reshape(N, 4)

    rows_needed = -(-N // 128)
    block_rows = min(max_block_rows, _round_up(max(rows_needed, 1), _CHUNK))
    n_rows = _round_up(rows_needed, block_rows)
    n_pad = n_rows * 128
    pad = n_pad - N

    # One fused relayout: pad batch, go component-major, split the batch into (rows, 128 lanes).
    qsr_cm = jnp.pad(qSR2.astype(jnp.float32), ((0, pad), (0, 0))).T.reshape(4, n_rows, 128)
    qhr_cm = jnp.pad(qHR2.astype(jnp.float32), ((0, pad), (0, 0))).T.reshape(4, n_rows, 128)
    syms_flat = syms.astype(jnp.float32).reshape(-1)   # flat 1-D SMEM table (avoids 2-D SMEM padding)

    m1, b1, m2, b2 = _inv_cos_constants(beta)
    kernel = functools.partial(
        _mat_kernel, n_syms=S, n_chunks=block_rows // _CHUNK, chunk=_CHUNK,
        mode=mode, beta=np.float32(beta), m1=m1, b1=b1, m2=m2, b2=b2)

    out_cm = pl.pallas_call(
        kernel,
        out_shape=jax.ShapeDtypeStruct((4, n_rows, 128), jnp.float32),
        grid=(n_rows // block_rows,),
        in_specs=[
            pl.BlockSpec(memory_space=pltpu.MemorySpace.SMEM),          # syms, whole flat table
            pl.BlockSpec((4, block_rows, 128), lambda i: (0, i, 0)),    # qSR component-major block
            pl.BlockSpec((4, block_rows, 128), lambda i: (0, i, 0)),    # qHR component-major block
        ],
        out_specs=pl.BlockSpec((4, block_rows, 128), lambda i: (0, i, 0)),
        compiler_params=pltpu.CompilerParams(dimension_semantics=("parallel",)),
    )(syms_flat, qsr_cm, qhr_cm)

    out = out_cm.reshape(4, n_pad)[:, :N].T   # back to (N, 4)
    return out.reshape(*batch_shape, 4)


# ---------------------------------------------------------------------------
# Pure-JAX reference (mirrors the PyTorch forward, mask-multiply blend and all).
# ---------------------------------------------------------------------------
def _quat_mul(a, b):
    aw, ax, ay, az = a[..., 0], a[..., 1], a[..., 2], a[..., 3]
    bw, bx, by, bz = b[..., 0], b[..., 1], b[..., 2], b[..., 3]
    return jnp.stack([
        aw * bw - ax * bx - ay * by - az * bz,
        aw * bx + ax * bw + ay * bz - az * by,
        aw * by - ax * bz + ay * bw + az * bx,
        aw * bz + ax * by - ay * bx + az * bw], axis=-1)


def _reference(qSR, qHR, syms, *, mode=True, beta=0.1):
    conj = qHR * jnp.array([1.0, -1.0, -1.0, -1.0], dtype=qHR.dtype)
    T = _quat_mul(conj, qSR)                                 # (N, 4)
    T_syms = _quat_mul(T[:, None, :], syms[None, :, :])      # (N, S, 4)
    t_max = jnp.max(T_syms, axis=-2)                         # (N, 4)
    y_rot = 2.0 * jnp.arccos(t_max)
    if not mode:
        return y_rot
    m1, b1, m2, b2 = _inv_cos_constants(beta)
    lin1 = m1 * t_max + b1
    lin2 = m2 * t_max + b2
    mid = jnp.logical_and(t_max >= -1.0 + beta, t_max <= 1.0 - beta).astype(t_max.dtype)
    lo = (t_max < -1.0 + beta).astype(t_max.dtype)
    hi = (t_max > 1.0 - beta).astype(t_max.dtype)
    return y_rot * mid + lin1 * lo + lin2 * hi


if __name__ == "__main__":
    key = jax.random.PRNGKey(0)
    k1, k2, k3 = jax.random.split(key, 3)

    N, S = 200, 24  # small batch (not a multiple of 128: exercises padding); 24 = cubic symmetry group
    qSR = jax.random.normal(k1, (N, 4), dtype=jnp.float32)
    qSR = qSR / jnp.linalg.norm(qSR, axis=-1, keepdims=True)
    qHR = jax.random.normal(k2, (N, 4), dtype=jnp.float32)
    qHR = qHR / jnp.linalg.norm(qHR, axis=-1, keepdims=True)
    syms = jax.random.normal(k3, (S, 4), dtype=jnp.float32)
    syms = syms / jnp.linalg.norm(syms, axis=-1, keepdims=True)

    for mode in (True, False):
        out = jax.block_until_ready(minimum_angle_transformation(qSR, qHR, syms, mode=mode))
        ref = _reference(qSR, qHR, syms, mode=mode)
        if not np.allclose(np.asarray(out), np.asarray(ref),
                           atol=1e-4, rtol=1e-4, equal_nan=True):
            raise AssertionError(f"Pallas kernel does not match reference (mode={mode})")
    print("KERNEL_OK")
</pallas_src>

<mosaic_0001>
module attributes {stable_mosaic.version = 11 : i64} {
  func.func @_mat_kernel(%arg0: i32, %arg1: memref<96xf32, #tpu.memory_space<smem>>, %arg2: memref<4x8x128xf32, #tpu.memory_space<vmem>>, %arg3: memref<4x8x128xf32, #tpu.memory_space<vmem>>, %arg4: memref<4x8x128xf32, #tpu.memory_space<vmem>>) attributes {dimension_semantics = [#tpu.dimension_semantics<parallel>], iteration_bounds = array<i64: 1>, scalar_prefetch = 0 : i64, scratch_operands = 0 : i64, tpu.core_type = #tpu.core_type<tc>, window_params = [{transform_indices = @transform_0, window_bounds = array<i64: 96>}, {transform_indices = @transform_1, window_bounds = array<i64: 4, 8, 128>}, {transform_indices = @transform_2, window_bounds = array<i64: 4, 8, 128>}, {transform_indices = @transform_3, window_bounds = array<i64: 4, 8, 128>}]} {
    %c0_i32 = arith.constant 0 : i32
    %c8_i32 = arith.constant 8 : i32
    %0 = arith.muli %c0_i32, %c8_i32 : i32
    %1 = tpu.assume_multiple %0, 8 : i32
    %c0 = arith.constant 0 : index
    %2 = arith.index_cast %1 : i32 to index
    %c0_0 = arith.constant 0 : index
    %3 = vector.load %arg3[%c0, %2, %c0_0] : memref<4x8x128xf32, #tpu.memory_space<vmem>>, vector<1x8x128xf32>
    %4 = vector.shape_cast %3 : vector<1x8x128xf32> to vector<8x128xf32>
    %c1 = arith.constant 1 : index
    %5 = arith.index_cast %1 : i32 to index
    %c0_1 = arith.constant 0 : index
    %6 = vector.load %arg3[%c1, %5, %c0_1] : memref<4x8x128xf32, #tpu.memory_space<vmem>>, vector<1x8x128xf32>
    %7 = vector.shape_cast %6 : vector<1x8x128xf32> to vector<8x128xf32>
    %c2 = arith.constant 2 : index
    %8 = arith.index_cast %1 : i32 to index
    %c0_2 = arith.constant 0 : index
    %9 = vector.load %arg3[%c2, %8, %c0_2] : memref<4x8x128xf32, #tpu.memory_space<vmem>>, vector<1x8x128xf32>
    %10 = vector.shape_cast %9 : vector<1x8x128xf32> to vector<8x128xf32>
    %c3 = arith.constant 3 : index
    %11 = arith.index_cast %1 : i32 to index
    %c0_3 = arith.constant 0 : index
    %12 = vector.load %arg3[%c3, %11, %c0_3] : memref<4x8x128xf32, #tpu.memory_space<vmem>>, vector<1x8x128xf32>
    %13 = vector.shape_cast %12 : vector<1x8x128xf32> to vector<8x128xf32>
    %c0_4 = arith.constant 0 : index
    %14 = arith.index_cast %1 : i32 to index
    %c0_5 = arith.constant 0 : index
    %15 = vector.load %arg2[%c0_4, %14, %c0_5] : memref<4x8x128xf32, #tpu.memory_space<vmem>>, vector<1x8x128xf32>
    %16 = vector.shape_cast %15 : vector<1x8x128xf32> to vector<8x128xf32>
    %c1_6 = arith.constant 1 : index
    %17 = arith.index_cast %1 : i32 to index
    %c0_7 = arith.constant 0 : index
    %18 = vector.load %arg2[%c1_6, %17, %c0_7] : memref<4x8x128xf32, #tpu.memory_space<vmem>>, vector<1x8x128xf32>
    %19 = vector.shape_cast %18 : vector<1x8x128xf32> to vector<8x128xf32>
    %c2_8 = arith.constant 2 : index
    %20 = arith.index_cast %1 : i32 to index
    %c0_9 = arith.constant 0 : index
    %21 = vector.load %arg2[%c2_8, %20, %c0_9] : memref<4x8x128xf32, #tpu.memory_space<vmem>>, vector<1x8x128xf32>
    %22 = vector.shape_cast %21 : vector<1x8x128xf32> to vector<8x128xf32>
    %c3_10 = arith.constant 3 : index
    %23 = arith.index_cast %1 : i32 to index
    %c0_11 = arith.constant 0 : index
    %24 = vector.load %arg2[%c3_10, %23, %c0_11] : memref<4x8x128xf32, #tpu.memory_space<vmem>>, vector<1x8x128xf32>
    %25 = vector.shape_cast %24 : vector<1x8x128xf32> to vector<8x128xf32>
    %26 = arith.mulf %4, %16 : vector<8x128xf32>
    %27 = arith.mulf %7, %19 : vector<8x128xf32>
    %28 = arith.addf %26, %27 : vector<8x128xf32>
    %29 = arith.mulf %10, %22 : vector<8x128xf32>
    %30 = arith.addf %28, %29 : vector<8x128xf32>
    %31 = arith.mulf %13, %25 : vector<8x128xf32>
    %32 = arith.addf %30, %31 : vector<8x128xf32>
    %33 = arith.mulf %4, %19 : vector<8x128xf32>
    %34 = arith.mulf %7, %16 : vector<8x128xf32>
    %35 = arith.subf %33, %34 : vector<8x128xf32>
    %36 = arith.mulf %10, %25 : vector<8x128xf32>
    %37 = arith.subf %35, %36 : vector<8x128xf32>
    %38 = arith.mulf %13, %22 : vector<8x128xf32>
    %39 = arith.addf %37, %38 : vector<8x128xf32>
    %40 = arith.mulf %4, %22 : vector<8x128xf32>
    %41 = arith.mulf %7, %25 : vector<8x128xf32>
    %42 = arith.addf %40, %41 : vector<8x128xf32>
    %43 = arith.mulf %10, %16 : vector<8x128xf32>
    %44 = arith.subf %42, %43 : vector<8x128xf32>
    %45 = arith.mulf %13, %19 : vector<8x128xf32>
    %46 = arith.subf %44, %45 : vector<8x128xf32>
    %47 = arith.mulf %4, %25 : vector<8x128xf32>
    %48 = arith.mulf %7, %22 : vector<8x128xf32>
    %49 = arith.subf %47, %48 : vector<8x128xf32>
    %50 = arith.mulf %10, %19 : vector<8x128xf32>
    %51 = arith.addf %49, %50 : vector<8x128xf32>
    %52 = arith.mulf %13, %16 : vector<8x128xf32>
    %53 = arith.subf %51, %52 : vector<8x128xf32>
    %c0_12 = arith.constant 0 : index
    %54 = memref.load %arg1[%c0_12] : memref<96xf32, #tpu.memory_space<smem>>
    %c1_13 = arith.constant 1 : index
    %55 = memref.load %arg1[%c1_13] : memref<96xf32, #tpu.memory_space<smem>>
    %c2_14 = arith.constant 2 : index
    %56 = memref.load %arg1[%c2_14] : memref<96xf32, #tpu.memory_space<smem>>
    %c3_15 = arith.constant 3 : index
    %57 = memref.load %arg1[%c3_15] : memref<96xf32, #tpu.memory_space<smem>>
    %58 = vector.broadcast %54 : f32 to vector<8x128xf32>
    %59 = arith.mulf %32, %58 : vector<8x128xf32>
    %60 = vector.broadcast %55 : f32 to vector<8x128xf32>
    %61 = arith.mulf %39, %60 : vector<8x128xf32>
    %62 = arith.subf %59, %61 : vector<8x128xf32>
    %63 = vector.broadcast %56 : f32 to vector<8x128xf32>
    %64 = arith.mulf %46, %63 : vector<8x128xf32>
    %65 = arith.subf %62, %64 : vector<8x128xf32>
    %66 = vector.broadcast %57 : f32 to vector<8x128xf32>
    %67 = arith.mulf %53, %66 : vector<8x128xf32>
    %68 = arith.subf %65, %67 : vector<8x128xf32>
    %69 = vector.broadcast %55 : f32 to vector<8x128xf32>
    %70 = arith.mulf %32, %69 : vector<8x128xf32>
    %71 = vector.broadcast %54 : f32 to vector<8x128xf32>
    %72 = arith.mulf %39, %71 : vector<8x128xf32>
    %73 = arith.addf %70, %72 : vector<8x128xf32>
    %74 = vector.broadcast %57 : f32 to vector<8x128xf32>
    %75 = arith.mulf %46, %74 : vector<8x128xf32>
    %76 = arith.addf %73, %75 : vector<8x128xf32>
    %77 = vector.broadcast %56 : f32 to vector<8x128xf32>
    %78 = arith.mulf %53, %77 : vector<8x128xf32>
    %79 = arith.subf %76, %78 : vector<8x128xf32>
    %80 = vector.broadcast %56 : f32 to vector<8x128xf32>
    %81 = arith.mulf %32, %80 : vector<8x128xf32>
    %82 = vector.broadcast %57 : f32 to vector<8x128xf32>
    %83 = arith.mulf %39, %82 : vector<8x128xf32>
    %84 = arith.subf %81, %83 : vector<8x128xf32>
    %85 = vector.broadcast %54 : f32 to vector<8x128xf32>
    %86 = arith.mulf %46, %85 : vector<8x128xf32>
    %87 = arith.addf %84, %86 : vector<8x128xf32>
    %88 = vector.broadcast %55 : f32 to vector<8x128xf32>
    %89 = arith.mulf %53, %88 : vector<8x128xf32>
    %90 = arith.addf %87, %89 : vector<8x128xf32>
    %91 = vector.broadcast %57 : f32 to vector<8x128xf32>
    %92 = arith.mulf %32, %91 : vector<8x128xf32>
    %93 = vector.broadcast %56 : f32 to vector<8x128xf32>
    %94 = arith.mulf %39, %93 : vector<8x128xf32>
    %95 = arith.addf %92, %94 : vector<8x128xf32>
    %96 = vector.broadcast %55 : f32 to vector<8x128xf32>
    %97 = arith.mulf %46, %96 : vector<8x128xf32>
    %98 = arith.subf %95, %97 : vector<8x128xf32>
    %99 = vector.broadcast %54 : f32 to vector<8x128xf32>
    %100 = arith.mulf %53, %99 : vector<8x128xf32>
    %101 = arith.addf %98, %100 : vector<8x128xf32>
    %c4 = arith.constant 4 : index
    %102 = memref.load %arg1[%c4] : memref<96xf32, #tpu.memory_space<smem>>
    %c5 = arith.constant 5 : index
    %103 = memref.load %arg1[%c5] : memref<96xf32, #tpu.memory_space<smem>>
    %c6 = arith.constant 6 : index
    %104 = memref.load %arg1[%c6] : memref<96xf32, #tpu.memory_space<smem>>
    %c7 = arith.constant 7 : index
    %105 = memref.load %arg1[%c7] : memref<96xf32, #tpu.memory_space<smem>>
    %106 = vector.broadcast %102 : f32 to vector<8x128xf32>
    %107 = arith.mulf %32, %106 : vector<8x128xf32>
    %108 = vector.broadcast %103 : f32 to vector<8x128xf32>
    %109 = arith.mulf %39, %108 : vector<8x128xf32>
    %110 = arith.subf %107, %109 : vector<8x128xf32>
    %111 = vector.broadcast %104 : f32 to vector<8x128xf32>
    %112 = arith.mulf %46, %111 : vector<8x128xf32>
    %113 = arith.subf %110, %112 : vector<8x128xf32>
    %114 = vector.broadcast %105 : f32 to vector<8x128xf32>
    %115 = arith.mulf %53, %114 : vector<8x128xf32>
    %116 = arith.subf %113, %115 : vector<8x128xf32>
    %117 = vector.broadcast %103 : f32 to vector<8x128xf32>
    %118 = arith.mulf %32, %117 : vector<8x128xf32>
    %119 = vector.broadcast %102 : f32 to vector<8x128xf32>
    %120 = arith.mulf %39, %119 : vector<8x128xf32>
    %121 = arith.addf %118, %120 : vector<8x128xf32>
    %122 = vector.broadcast %105 : f32 to vector<8x128xf32>
    %123 = arith.mulf %46, %122 : vector<8x128xf32>
    %124 = arith.addf %121, %123 : vector<8x128xf32>
    %125 = vector.broadcast %104 : f32 to vector<8x128xf32>
    %126 = arith.mulf %53, %125 : vector<8x128xf32>
    %127 = arith.subf %124, %126 : vector<8x128xf32>
    %128 = vector.broadcast %104 : f32 to vector<8x128xf32>
    %129 = arith.mulf %32, %128 : vector<8x128xf32>
    %130 = vector.broadcast %105 : f32 to vector<8x128xf32>
    %131 = arith.mulf %39, %130 : vector<8x128xf32>
    %132 = arith.subf %129, %131 : vector<8x128xf32>
    %133 = vector.broadcast %102 : f32 to vector<8x128xf32>
    %134 = arith.mulf %46, %133 : vector<8x128xf32>
    %135 = arith.addf %132, %134 : vector<8x128xf32>
    %136 = vector.broadcast %103 : f32 to vector<8x128xf32>
    %137 = arith.mulf %53, %136 : vector<8x128xf32>
    %138 = arith.addf %135, %137 : vector<8x128xf32>
    %139 = vector.broadcast %105 : f32 to vector<8x128xf32>
    %140 = arith.mulf %32, %139 : vector<8x128xf32>
    %141 = vector.broadcast %104 : f32 to vector<8x128xf32>
    %142 = arith.mulf %39, %141 : vector<8x128xf32>
    %143 = arith.addf %140, %142 : vector<8x128xf32>
    %144 = vector.broadcast %103 : f32 to vector<8x128xf32>
    %145 = arith.mulf %46, %144 : vector<8x128xf32>
    %146 = arith.subf %143, %145 : vector<8x128xf32>
    %147 = vector.broadcast %102 : f32 to vector<8x128xf32>
    %148 = arith.mulf %53, %147 : vector<8x128xf32>
    %149 = arith.addf %146, %148 : vector<8x128xf32>
    %c8 = arith.constant 8 : index
    %150 = memref.load %arg1[%c8] : memref<96xf32, #tpu.memory_space<smem>>
    %c9 = arith.constant 9 : index
    %151 = memref.load %arg1[%c9] : memref<96xf32, #tpu.memory_space<smem>>
    %c10 = arith.constant 10 : index
    %152 = memref.load %arg1[%c10] : memref<96xf32, #tpu.memory_space<smem>>
    %c11 = arith.constant 11 : index
    %153 = memref.load %arg1[%c11] : memref<96xf32, #tpu.memory_space<smem>>
    %154 = vector.broadcast %150 : f32 to vector<8x128xf32>
    %155 = arith.mulf %32, %154 : vector<8x128xf32>
    %156 = vector.broadcast %151 : f32 to vector<8x128xf32>
    %157 = arith.mulf %39, %156 : vector<8x128xf32>
    %158 = arith.subf %155, %157 : vector<8x128xf32>
    %159 = vector.broadcast %152 : f32 to vector<8x128xf32>
    %160 = arith.mulf %46, %159 : vector<8x128xf32>
    %161 = arith.subf %158, %160 : vector<8x128xf32>
    %162 = vector.broadcast %153 : f32 to vector<8x128xf32>
    %163 = arith.mulf %53, %162 : vector<8x128xf32>
    %164 = arith.subf %161, %163 : vector<8x128xf32>
    %165 = vector.broadcast %151 : f32 to vector<8x128xf32>
    %166 = arith.mulf %32, %165 : vector<8x128xf32>
    %167 = vector.broadcast %150 : f32 to vector<8x128xf32>
    %168 = arith.mulf %39, %167 : vector<8x128xf32>
    %169 = arith.addf %166, %168 : vector<8x128xf32>
    %170 = vector.broadcast %153 : f32 to vector<8x128xf32>
    %171 = arith.mulf %46, %170 : vector<8x128xf32>
    %172 = arith.addf %169, %171 : vector<8x128xf32>
    %173 = vector.broadcast %152 : f32 to vector<8x128xf32>
    %174 = arith.mulf %53, %173 : vector<8x128xf32>
    %175 = arith.subf %172, %174 : vector<8x128xf32>
    %176 = vector.broadcast %152 : f32 to vector<8x128xf32>
    %177 = arith.mulf %32, %176 : vector<8x128xf32>
    %178 = vector.broadcast %153 : f32 to vector<8x128xf32>
    %179 = arith.mulf %39, %178 : vector<8x128xf32>
    %180 = arith.subf %177, %179 : vector<8x128xf32>
    %181 = vector.broadcast %150 : f32 to vector<8x128xf32>
    %182 = arith.mulf %46, %181 : vector<8x128xf32>
    %183 = arith.addf %180, %182 : vector<8x128xf32>
    %184 = vector.broadcast %151 : f32 to vector<8x128xf32>
    %185 = arith.mulf %53, %184 : vector<8x128xf32>
    %186 = arith.addf %183, %185 : vector<8x128xf32>
    %187 = vector.broadcast %153 : f32 to vector<8x128xf32>
    %188 = arith.mulf %32, %187 : vector<8x128xf32>
    %189 = vector.broadcast %152 : f32 to vector<8x128xf32>
    %190 = arith.mulf %39, %189 : vector<8x128xf32>
    %191 = arith.addf %188, %190 : vector<8x128xf32>
    %192 = vector.broadcast %151 : f32 to vector<8x128xf32>
    %193 = arith.mulf %46, %192 : vector<8x128xf32>
    %194 = arith.subf %191, %193 : vector<8x128xf32>
    %195 = vector.broadcast %150 : f32 to vector<8x128xf32>
    %196 = arith.mulf %53, %195 : vector<8x128xf32>
    %197 = arith.addf %194, %196 : vector<8x128xf32>
    %198 = arith.maximumf %68, %164 : vector<8x128xf32>
    %199 = arith.maximumf %79, %175 : vector<8x128xf32>
    %200 = arith.maximumf %90, %186 : vector<8x128xf32>
    %201 = arith.maximumf %101, %197 : vector<8x128xf32>
    %c12 = arith.constant 12 : index
    %202 = memref.load %arg1[%c12] : memref<96xf32, #tpu.memory_space<smem>>
    %c13 = arith.constant 13 : index
    %203 = memref.load %arg1[%c13] : memref<96xf32, #tpu.memory_space<smem>>
    %c14 = arith.constant 14 : index
    %204 = memref.load %arg1[%c14] : memref<96xf32, #tpu.memory_space<smem>>
    %c15 = arith.constant 15 : index
    %205 = memref.load %arg1[%c15] : memref<96xf32, #tpu.memory_space<smem>>
    %206 = vector.broadcast %202 : f32 to vector<8x128xf32>
    %207 = arith.mulf %32, %206 : vector<8x128xf32>
    %208 = vector.broadcast %203 : f32 to vector<8x128xf32>
    %209 = arith.mulf %39, %208 : vector<8x128xf32>
    %210 = arith.subf %207, %209 : vector<8x128xf32>
    %211 = vector.broadcast %204 : f32 to vector<8x128xf32>
    %212 = arith.mulf %46, %211 : vector<8x128xf32>
    %213 = arith.subf %210, %212 : vector<8x128xf32>
    %214 = vector.broadcast %205 : f32 to vector<8x128xf32>
    %215 = arith.mulf %53, %214 : vector<8x128xf32>
    %216 = arith.subf %213, %215 : vector<8x128xf32>
    %217 = vector.broadcast %203 : f32 to vector<8x128xf32>
    %218 = arith.mulf %32, %217 : vector<8x128xf32>
    %219 = vector.broadcast %202 : f32 to vector<8x128xf32>
    %220 = arith.mulf %39, %219 : vector<8x128xf32>
    %221 = arith.addf %218, %220 : vector<8x128xf32>
    %222 = vector.broadcast %205 : f32 to vector<8x128xf32>
    %223 = arith.mulf %46, %222 : vector<8x128xf32>
    %224 = arith.addf %221, %223 : vector<8x128xf32>
    %225 = vector.broadcast %204 : f32 to vector<8x128xf32>
    %226 = arith.mulf %53, %225 : vector<8x128xf32>
    %227 = arith.subf %224, %226 : vector<8x128xf32>
    %228 = vector.broadcast %204 : f32 to vector<8x128xf32>
    %229 = arith.mulf %32, %228 : vector<8x128xf32>
    %230 = vector.broadcast %205 : f32 to vector<8x128xf32>
    %231 = arith.mulf %39, %230 : vector<8x128xf32>
    %232 = arith.subf %229, %231 : vector<8x128xf32>
    %233 = vector.broadcast %202 : f32 to vector<8x128xf32>
    %234 = arith.mulf %46, %233 : vector<8x128xf32>
    %235 = arith.addf %232, %234 : vector<8x128xf32>
    %236 = vector.broadcast %203 : f32 to vector<8x128xf32>
    %237 = arith.mulf %53, %236 : vector<8x128xf32>
    %238 = arith.addf %235, %237 : vector<8x128xf32>
    %239 = vector.broadcast %205 : f32 to vector<8x128xf32>
    %240 = arith.mulf %32, %239 : vector<8x128xf32>
    %241 = vector.broadcast %204 : f32 to vector<8x128xf32>
    %242 = arith.mulf %39, %241 : vector<8x128xf32>
    %243 = arith.addf %240, %242 : vector<8x128xf32>
    %244 = vector.broadcast %203 : f32 to vector<8x128xf32>
    %245 = arith.mulf %46, %244 : vector<8x128xf32>
    %246 = arith.subf %243, %245 : vector<8x128xf32>
    %247 = vector.broadcast %202 : f32 to vector<8x128xf32>
    %248 = arith.mulf %53, %247 : vector<8x128xf32>
    %249 = arith.addf %246, %248 : vector<8x128xf32>
    %250 = arith.maximumf %116, %216 : vector<8x128xf32>
    %251 = arith.maximumf %127, %227 : vector<8x128xf32>
    %252 = arith.maximumf %138, %238 : vector<8x128xf32>
    %253 = arith.maximumf %149, %249 : vector<8x128xf32>
    %c16 = arith.constant 16 : index
    %254 = memref.load %arg1[%c16] : memref<96xf32, #tpu.memory_space<smem>>
    %c17 = arith.constant 17 : index
    %255 = memref.load %arg1[%c17] : memref<96xf32, #tpu.memory_space<smem>>
    %c18 = arith.constant 18 : index
    %256 = memref.load %arg1[%c18] : memref<96xf32, #tpu.memory_space<smem>>
    %c19 = arith.constant 19 : index
    %257 = memref.load %arg1[%c19] : memref<96xf32, #tpu.memory_space<smem>>
    %258 = vector.broadcast %254 : f32 to vector<8x128xf32>
    %259 = arith.mulf %32, %258 : vector<8x128xf32>
    %260 = vector.broadcast %255 : f32 to vector<8x128xf32>
    %261 = arith.mulf %39, %260 : vector<8x128xf32>
    %262 = arith.subf %259, %261 : vector<8x128xf32>
    %263 = vector.broadcast %256 : f32 to vector<8x128xf32>
    %264 = arith.mulf %46, %263 : vector<8x128xf32>
    %265 = arith.subf %262, %264 : vector<8x128xf32>
    %266 = vector.broadcast %257 : f32 to vector<8x128xf32>
    %267 = arith.mulf %53, %266 : vector<8x128xf32>
    %268 = arith.subf %265, %267 : vector<8x128xf32>
    %269 = vector.broadcast %255 : f32 to vector<8x128xf32>
    %270 = arith.mulf %32, %269 : vector<8x128xf32>
    %271 = vector.broadcast %254 : f32 to vector<8x128xf32>
    %272 = arith.mulf %39, %271 : vector<8x128xf32>
    %273 = arith.addf %270, %272 : vector<8x128xf32>
    %274 = vector.broadcast %257 : f32 to vector<8x128xf32>
    %275 = arith.mulf %46, %274 : vector<8x128xf32>
    %276 = arith.addf %273, %275 : vector<8x128xf32>
    %277 = vector.broadcast %256 : f32 to vector<8x128xf32>
    %278 = arith.mulf %53, %277 : vector<8x128xf32>
    %279 = arith.subf %276, %278 : vector<8x128xf32>
    %280 = vector.broadcast %256 : f32 to vector<8x128xf32>
    %281 = arith.mulf %32, %280 : vector<8x128xf32>
    %282 = vector.broadcast %257 : f32 to vector<8x128xf32>
    %283 = arith.mulf %39, %282 : vector<8x128xf32>
    %284 = arith.subf %281, %283 : vector<8x128xf32>
    %285 = vector.broadcast %254 : f32 to vector<8x128xf32>
    %286 = arith.mulf %46, %285 : vector<8x128xf32>
    %287 = arith.addf %284, %286 : vector<8x128xf32>
    %288 = vector.broadcast %255 : f32 to vector<8x128xf32>
    %289 = arith.mulf %53, %288 : vector<8x128xf32>
    %290 = arith.addf %287, %289 : vector<8x128xf32>
    %291 = vector.broadcast %257 : f32 to vector<8x128xf32>
    %292 = arith.mulf %32, %291 : vector<8x128xf32>
    %293 = vector.broadcast %256 : f32 to vector<8x128xf32>
    %294 = arith.mulf %39, %293 : vector<8x128xf32>
    %295 = arith.addf %292, %294 : vector<8x128xf32>
    %296 = vector.broadcast %255 : f32 to vector<8x128xf32>
    %297 = arith.mulf %46, %296 : vector<8x128xf32>
    %298 = arith.subf %295, %297 : vector<8x128xf32>
    %299 = vector.broadcast %254 : f32 to vector<8x128xf32>
    %300 = arith.mulf %53, %299 : vector<8x128xf32>
    %301 = arith.addf %298, %300 : vector<8x128xf32>
    %302 = arith.maximumf %198, %268 : vector<8x128xf32>
    %303 = arith.maximumf %199, %279 : vector<8x128xf32>
    %304 = arith.maximumf %200, %290 : vector<8x128xf32>
    %305 = arith.maximumf %201, %301 : vector<8x128xf32>
    %c20 = arith.constant 20 : index
    %306 = memref.load %arg1[%c20] : memref<96xf32, #tpu.memory_space<smem>>
    %c21 = arith.constant 21 : index
    %307 = memref.load %arg1[%c21] : memref<96xf32, #tpu.memory_space<smem>>
    %c22 = arith.constant 22 : index
    %308 = memref.load %arg1[%c22] : memref<96xf32, #tpu.memory_space<smem>>
    %c23 = arith.constant 23 : index
    %309 = memref.load %arg1[%c23] : memref<96xf32, #tpu.memory_space<smem>>
    %310 = vector.broadcast %306 : f32 to vector<8x128xf32>
    %311 = arith.mulf %32, %310 : vector<8x128xf32>
    %312 = vector.broadcast %307 : f32 to vector<8x128xf32>
    %313 = arith.mulf %39, %312 : vector<8x128xf32>
    %314 = arith.subf %311, %313 : vector<8x128xf32>
    %315 = vector.broadcast %308 : f32 to vector<8x128xf32>
    %316 = arith.mulf %46, %315 : vector<8x128xf32>
    %317 = arith.subf %314, %316 : vector<8x128xf32>
    %318 = vector.broadcast %309 : f32 to vector<8x128xf32>
    %319 = arith.mulf %53, %318 : vector<8x128xf32>
    %320 = arith.subf %317, %319 : vector<8x128xf32>
    %321 = vector.broadcast %307 : f32 to vector<8x128xf32>
    %322 = arith.mulf %32, %321 : vector<8x128xf32>
    %323 = vector.broadcast %306 : f32 to vector<8x128xf32>
    %324 = arith.mulf %39, %323 : vector<8x128xf32>
    %325 = arith.addf %322, %324 : vector<8x128xf32>
    %326 = vector.broadcast %309 : f32 to vector<8x128xf32>
    %327 = arith.mulf %46, %326 : vector<8x128xf32>
    %328 = arith.addf %325, %327 : vector<8x128xf32>
    %329 = vector.broadcast %308 : f32 to vector<8x128xf32>
    %330 = arith.mulf %53, %329 : vector<8x128xf32>
    %331 = arith.subf %328, %330 : vector<8x128xf32>
    %332 = vector.broadcast %308 : f32 to vector<8x128xf32>
    %333 = arith.mulf %32, %332 : vector<8x128xf32>
    %334 = vector.broadcast %309 : f32 to vector<8x128xf32>
    %335 = arith.mulf %39, %334 : vector<8x128xf32>
    %336 = arith.subf %333, %335 : vector<8x128xf32>
    %337 = vector.broadcast %306 : f32 to vector<8x128xf32>
    %338 = arith.mulf %46, %337 : vector<8x128xf32>
    %339 = arith.addf %336, %338 : vector<8x128xf32>
    %340 = vector.broadcast %307 : f32 to vector<8x128xf32>
    %341 = arith.mulf %53, %340 : vector<8x128xf32>
    %342 = arith.addf %339, %341 : vector<8x128xf32>
    %343 = vector.broadcast %309 : f32 to vector<8x128xf32>
    %344 = arith.mulf %32, %343 : vector<8x128xf32>
    %345 = vector.broadcast %308 : f32 to vector<8x128xf32>
    %346 = arith.mulf %39, %345 : vector<8x128xf32>
    %347 = arith.addf %344, %346 : vector<8x128xf32>
    %348 = vector.broadcast %307 : f32 to vector<8x128xf32>
    %349 = arith.mulf %46, %348 : vector<8x128xf32>
    %350 = arith.subf %347, %349 : vector<8x128xf32>
    %351 = vector.broadcast %306 : f32 to vector<8x128xf32>
    %352 = arith.mulf %53, %351 : vector<8x128xf32>
    %353 = arith.addf %350, %352 : vector<8x128xf32>
    %354 = arith.maximumf %250, %320 : vector<8x128xf32>
    %355 = arith.maximumf %251, %331 : vector<8x128xf32>
    %356 = arith.maximumf %252, %342 : vector<8x128xf32>
    %357 = arith.maximumf %253, %353 : vector<8x128xf32>
    %c24 = arith.constant 24 : index
    %358 = memref.load %arg1[%c24] : memref<96xf32, #tpu.memory_space<smem>>
    %c25 = arith.constant 25 : index
    %359 = memref.load %arg1[%c25] : memref<96xf32, #tpu.memory_space<smem>>
    %c26 = arith.constant 26 : index
    %360 = memref.load %arg1[%c26] : memref<96xf32, #tpu.memory_space<smem>>
    %c27 = arith.constant 27 : index
    %361 = memref.load %arg1[%c27] : memref<96xf32, #tpu.memory_space<smem>>
    %362 = vector.broadcast %358 : f32 to vector<8x128xf32>
    %363 = arith.mulf %32, %362 : vector<8x128xf32>
    %364 = vector.broadcast %359 : f32 to vector<8x128xf32>
    %365 = arith.mulf %39, %364 : vector<8x128xf32>
    %366 = arith.subf %363, %365 : vector<8x128xf32>
    %367 = vector.broadcast %360 : f32 to vector<8x128xf32>
    %368 = arith.mulf %46, %367 : vector<8x128xf32>
    %369 = arith.subf %366, %368 : vector<8x128xf32>
    %370 = vector.broadcast %361 : f32 to vector<8x128xf32>
    %371 = arith.mulf %53, %370 : vector<8x128xf32>
    %372 = arith.subf %369, %371 : vector<8x128xf32>
    %373 = vector.broadcast %359 : f32 to vector<8x128xf32>
    %374 = arith.mulf %32, %373 : vector<8x128xf32>
    %375 = vector.broadcast %358 : f32 to vector<8x128xf32>
    %376 = arith.mulf %39, %375 : vector<8x128xf32>
    %377 = arith.addf %374, %376 : vector<8x128xf32>
    %378 = vector.broadcast %361 : f32 to vector<8x128xf32>
    %379 = arith.mulf %46, %378 : vector<8x128xf32>
    %380 = arith.addf %377, %379 : vector<8x128xf32>
    %381 = vector.broadcast %360 : f32 to vector<8x128xf32>
    %382 = arith.mulf %53, %381 : vector<8x128xf32>
    %383 = arith.subf %380, %382 : vector<8x128xf32>
    %384 = vector.broadcast %360 : f32 to vector<8x128xf32>
    %385 = arith.mulf %32, %384 : vector<8x128xf32>
    %386 = vector.broadcast %361 : f32 to vector<8x128xf32>
    %387 = arith.mulf %39, %386 : vector<8x128xf32>
    %388 = arith.subf %385, %387 : vector<8x128xf32>
    %389 = vector.broadcast %358 : f32 to vector<8x128xf32>
    %390 = arith.mulf %46, %389 : vector<8x128xf32>
    %391 = arith.addf %388, %390 : vector<8x128xf32>
    %392 = vector.broadcast %359 : f32 to vector<8x128xf32>
    %393 = arith.mulf %53, %392 : vector<8x128xf32>
    %394 = arith.addf %391, %393 : vector<8x128xf32>
    %395 = vector.broadcast %361 : f32 to vector<8x128xf32>
    %396 = arith.mulf %32, %395 : vector<8x128xf32>
    %397 = vector.broadcast %360 : f32 to vector<8x128xf32>
    %398 = arith.mulf %39, %397 : vector<8x128xf32>
    %399 = arith.addf %396, %398 : vector<8x128xf32>
    %400 = vector.broadcast %359 : f32 to vector<8x128xf32>
    %401 = arith.mulf %46, %400 : vector<8x128xf32>
    %402 = arith.subf %399, %401 : vector<8x128xf32>
    %403 = vector.broadcast %358 : f32 to vector<8x128xf32>
    %404 = arith.mulf %53, %403 : vector<8x128xf32>
    %405 = arith.addf %402, %404 : vector<8x128xf32>
    %406 = arith.maximumf %302, %372 : vector<8x128xf32>
    %407 = arith.maximumf %303, %383 : vector<8x128xf32>
    %408 = arith.maximumf %304, %394 : vector<8x128xf32>
    %409 = arith.maximumf %305, %405 : vector<8x128xf32>
    %c28 = arith.constant 28 : index
    %410 = memref.load %arg1[%c28] : memref<96xf32, #tpu.memory_space<smem>>
    %c29 = arith.constant 29 : index
    %411 = memref.load %arg1[%c29] : memref<96xf32, #tpu.memory_space<smem>>
    %c30 = arith.constant 30 : index
    %412 = memref.load %arg1[%c30] : memref<96xf32, #tpu.memory_space<smem>>
    %c31 = arith.constant 31 : index
    %413 = memref.load %arg1[%c31] : memref<96xf32, #tpu.memory_space<smem>>
    %414 = vector.broadcast %410 : f32 to vector<8x128xf32>
    %415 = arith.mulf %32, %414 : vector<8x128xf32>
    %416 = vector.broadcast %411 : f32 to vector<8x128xf32>
    %417 = arith.mulf %39, %416 : vector<8x128xf32>
    %418 = arith.subf %415, %417 : vector<8x128xf32>
    %419 = vector.broadcast %412 : f32 to vector<8x128xf32>
    %420 = arith.mulf %46, %419 : vector<8x128xf32>
    %421 = arith.subf %418, %420 : vector<8x128xf32>
    %422 = vector.broadcast %413 : f32 to vector<8x128xf32>
    %423 = arith.mulf %53, %422 : vector<8x128xf32>
    %424 = arith.subf %421, %423 : vector<8x128xf32>
    %425 = vector.broadcast %411 : f32 to vector<8x128xf32>
    %426 = arith.mulf %32, %425 : vector<8x128xf32>
    %427 = vector.broadcast %410 : f32 to vector<8x128xf32>
    %428 = arith.mulf %39, %427 : vector<8x128xf32>
    %429 = arith.addf %426, %428 : vector<8x128xf32>
    %430 = vector.broadcast %413 : f32 to vector<8x128xf32>
    %431 = arith.mulf %46, %430 : vector<8x128xf32>
    %432 = arith.addf %429, %431 : vector<8x128xf32>
    %433 = vector.broadcast %412 : f32 to vector<8x128xf32>
    %434 = arith.mulf %53, %433 : vector<8x128xf32>
    %435 = arith.subf %432, %434 : vector<8x128xf32>
    %436 = vector.broadcast %412 : f32 to vector<8x128xf32>
    %437 = arith.mulf %32, %436 : vector<8x128xf32>
    %438 = vector.broadcast %413 : f32 to vector<8x128xf32>
    %439 = arith.mulf %39, %438 : vector<8x128xf32>
    %440 = arith.subf %437, %439 : vector<8x128xf32>
    %441 = vector.broadcast %410 : f32 to vector<8x128xf32>
    %442 = arith.mulf %46, %441 : vector<8x128xf32>
    %443 = arith.addf %440, %442 : vector<8x128xf32>
    %444 = vector.broadcast %411 : f32 to vector<8x128xf32>
    %445 = arith.mulf %53, %444 : vector<8x128xf32>
    %446 = arith.addf %443, %445 : vector<8x128xf32>
    %447 = vector.broadcast %413 : f32 to vector<8x128xf32>
    %448 = arith.mulf %32, %447 : vector<8x128xf32>
    %449 = vector.broadcast %412 : f32 to vector<8x128xf32>
    %450 = arith.mulf %39, %449 : vector<8x128xf32>
    %451 = arith.addf %448, %450 : vector<8x128xf32>
    %452 = vector.broadcast %411 : f32 to vector<8x128xf32>
    %453 = arith.mulf %46, %452 : vector<8x128xf32>
    %454 = arith.subf %451, %453 : vector<8x128xf32>
    %455 = vector.broadcast %410 : f32 to vector<8x128xf32>
    %456 = arith.mulf %53, %455 : vector<8x128xf32>
    %457 = arith.addf %454, %456 : vector<8x128xf32>
    %458 = arith.maximumf %354, %424 : vector<8x128xf32>
    %459 = arith.maximumf %355, %435 : vector<8x128xf32>
    %460 = arith.maximumf %356, %446 : vector<8x128xf32>
    %461 = arith.maximumf %357, %457 : vector<8x128xf32>
    %c32 = arith.constant 32 : index
    %462 = memref.load %arg1[%c32] : memref<96xf32, #tpu.memory_space<smem>>
    %c33 = arith.constant 33 : index
    %463 = memref.load %arg1[%c33] : memref<96xf32, #tpu.memory_space<smem>>
    %c34 = arith.constant 34 : index
    %464 = memref.load %arg1[%c34] : memref<96xf32, #tpu.memory_space<smem>>
    %c35 = arith.constant 35 : index
    %465 = memref.load %arg1[%c35] : memref<96xf32, #tpu.memory_space<smem>>
    %466 = vector.broadcast %462 : f32 to vector<8x128xf32>
    %467 = arith.mulf %32, %466 : vector<8x128xf32>
    %468 = vector.broadcast %463 : f32 to vector<8x128xf32>
    %469 = arith.mulf %39, %468 : vector<8x128xf32>
    %470 = arith.subf %467, %469 : vector<8x128xf32>
    %471 = vector.broadcast %464 : f32 to vector<8x128xf32>
    %472 = arith.mulf %46, %471 : vector<8x128xf32>
    %473 = arith.subf %470, %472 : vector<8x128xf32>
    %474 = vector.broadcast %465 : f32 to vector<8x128xf32>
    %475 = arith.mulf %53, %474 : vector<8x128xf32>
    %476 = arith.subf %473, %475 : vector<8x128xf32>
    %477 = vector.broadcast %463 : f32 to vector<8x128xf32>
    %478 = arith.mulf %32, %477 : vector<8x128xf32>
    %479 = vector.broadcast %462 : f32 to vector<8x128xf32>
    %480 = arith.mulf %39, %479 : vector<8x128xf32>
    %481 = arith.addf %478, %480 : vector<8x128xf32>
    %482 = vector.broadcast %465 : f32 to vector<8x128xf32>
    %483 = arith.mulf %46, %482 : vector<8x128xf32>
    %484 = arith.addf %481, %483 : vector<8x128xf32>
    %485 = vector.broadcast %464 : f32 to vector<8x128xf32>
    %486 = arith.mulf %53, %485 : vector<8x128xf32>
    %487 = arith.subf %484, %486 : vector<8x128xf32>
    %488 = vector.broadcast %464 : f32 to vector<8x128xf32>
    %489 = arith.mulf %32, %488 : vector<8x128xf32>
    %490 = vector.broadcast %465 : f32 to vector<8x128xf32>
    %491 = arith.mulf %39, %490 : vector<8x128xf32>
    %492 = arith.subf %489, %491 : vector<8x128xf32>
    %493 = vector.broadcast %462 : f32 to vector<8x128xf32>
    %494 = arith.mulf %46, %493 : vector<8x128xf32>
    %495 = arith.addf %492, %494 : vector<8x128xf32>
    %496 = vector.broadcast %463 : f32 to vector<8x128xf32>
    %497 = arith.mulf %53, %496 : vector<8x128xf32>
    %498 = arith.addf %495, %497 : vector<8x128xf32>
    %499 = vector.broadcast %465 : f32 to vector<8x128xf32>
    %500 = arith.mulf %32, %499 : vector<8x128xf32>
    %501 = vector.broadcast %464 : f32 to vector<8x128xf32>
    %502 = arith.mulf %39, %501 : vector<8x128xf32>
    %503 = arith.addf %500, %502 : vector<8x128xf32>
    %504 = vector.broadcast %463 : f32 to vector<8x128xf32>
    %505 = arith.mulf %46, %504 : vector<8x128xf32>
    %506 = arith.subf %503, %505 : vector<8x128xf32>
    %507 = vector.broadcast %462 : f32 to vector<8x128xf32>
    %508 = arith.mulf %53, %507 : vector<8x128xf32>
    %509 = arith.addf %506, %508 : vector<8x128xf32>
    %510 = arith.maximumf %406, %476 : vector<8x128xf32>
    %511 = arith.maximumf %407, %487 : vector<8x128xf32>
    %512 = arith.maximumf %408, %498 : vector<8x128xf32>
    %513 = arith.maximumf %409, %509 : vector<8x128xf32>
    %c36 = arith.constant 36 : index
    %514 = memref.load %arg1[%c36] : memref<96xf32, #tpu.memory_space<smem>>
    %c37 = arith.constant 37 : index
    %515 = memref.load %arg1[%c37] : memref<96xf32, #tpu.memory_space<smem>>
    %c38 = arith.constant 38 : index
    %516 = memref.load %arg1[%c38] : memref<96xf32, #tpu.memory_space<smem>>
    %c39 = arith.constant 39 : index
    %517 = memref.load %arg1[%c39] : memref<96xf32, #tpu.memory_space<smem>>
    %518 = vector.broadcast %514 : f32 to vector<8x128xf32>
    %519 = arith.mulf %32, %518 : vector<8x128xf32>
    %520 = vector.broadcast %515 : f32 to vector<8x128xf32>
    %521 = arith.mulf %39, %520 : vector<8x128xf32>
    %522 = arith.subf %519, %521 : vector<8x128xf32>
    %523 = vector.broadcast %516 : f32 to vector<8x128xf32>
    %524 = arith.mulf %46, %523 : vector<8x128xf32>
    %525 = arith.subf %522, %524 : vector<8x128xf32>
    %526 = vector.broadcast %517 : f32 to vector<8x128xf32>
    %527 = arith.mulf %53, %526 : vector<8x128xf32>
    %528 = arith.subf %525, %527 : vector<8x128xf32>
    %529 = vector.broadcast %515 : f32 to vector<8x128xf32>
    %530 = arith.mulf %32, %529 : vector<8x128xf32>
    %531 = vector.broadcast %514 : f32 to vector<8x128xf32>
    %532 = arith.mulf %39, %531 : vector<8x128xf32>
    %533 = arith.addf %530, %532 : vector<8x128xf32>
    %534 = vector.broadcast %517 : f32 to vector<8x128xf32>
    %535 = arith.mulf %46, %534 : vector<8x128xf32>
    %536 = arith.addf %533, %535 : vector<8x128xf32>
    %537 = vector.broadcast %516 : f32 to vector<8x128xf32>
    %538 = arith.mulf %53, %537 : vector<8x128xf32>
    %539 = arith.subf %536, %538 : vector<8x128xf32>
    %540 = vector.broadcast %516 : f32 to vector<8x128xf32>
    %541 = arith.mulf %32, %540 : vector<8x128xf32>
    %542 = vector.broadcast %517 : f32 to vector<8x128xf32>
    %543 = arith.mulf %39, %542 : vector<8x128xf32>
    %544 = arith.subf %541, %543 : vector<8x128xf32>
    %545 = vector.broadcast %514 : f32 to vector<8x128xf32>
    %546 = arith.mulf %46, %545 : vector<8x128xf32>
    %547 = arith.addf %544, %546 : vector<8x128xf32>
    %548 = vector.broadcast %515 : f32 to vector<8x128xf32>
    %549 = arith.mulf %53, %548 : vector<8x128xf32>
    %550 = arith.addf %547, %549 : vector<8x128xf32>
    %551 = vector.broadcast %517 : f32 to vector<8x128xf32>
    %552 = arith.mulf %32, %551 : vector<8x128xf32>
    %553 = vector.broadcast %516 : f32 to vector<8x128xf32>
    %554 = arith.mulf %39, %553 : vector<8x128xf32>
    %555 = arith.addf %552, %554 : vector<8x128xf32>
    %556 = vector.broadcast %515 : f32 to vector<8x128xf32>
    %557 = arith.mulf %46, %556 : vector<8x128xf32>
    %558 = arith.subf %555, %557 : vector<8x128xf32>
    %559 = vector.broadcast %514 : f32 to vector<8x128xf32>
    %560 = arith.mulf %53, %559 : vector<8x128xf32>
    %561 = arith.addf %558, %560 : vector<8x128xf32>
    %562 = arith.maximumf %458, %528 : vector<8x128xf32>
    %563 = arith.maximumf %459, %539 : vector<8x128xf32>
    %564 = arith.maximumf %460, %550 : vector<8x128xf32>
    %565 = arith.maximumf %461, %561 : vector<8x128xf32>
    %c40 = arith.constant 40 : index
    %566 = memref.load %arg1[%c40] : memref<96xf32, #tpu.memory_space<smem>>
    %c41 = arith.constant 41 : index
    %567 = memref.load %arg1[%c41] : memref<96xf32, #tpu.memory_space<smem>>
    %c42 = arith.constant 42 : index
    %568 = memref.load %arg1[%c42] : memref<96xf32, #tpu.memory_space<smem>>
    %c43 = arith.constant 43 : index
    %569 = memref.load %arg1[%c43] : memref<96xf32, #tpu.memory_space<smem>>
    %570 = vector.broadcast %566 : f32 to vector<8x128xf32>
    %571 = arith.mulf %32, %570 : vector<8x128xf32>
    %572 = vector.broadcast %567 : f32 to vector<8x128xf32>
    %573 = arith.mulf %39, %572 : vector<8x128xf32>
    %574 = arith.subf %571, %573 : vector<8x128xf32>
    %575 = vector.broadcast %568 : f32 to vector<8x128xf32>
    %576 = arith.mulf %46, %575 : vector<8x128xf32>
    %577 = arith.subf %574, %576 : vector<8x128xf32>
    %578 = vector.broadcast %569 : f32 to vector<8x128xf32>
    %579 = arith.mulf %53, %578 : vector<8x128xf32>
    %580 = arith.subf %577, %579 : vector<8x128xf32>
    %581 = vector.broadcast %567 : f32 to vector<8x128xf32>
    %582 = arith.mulf %32, %581 : vector<8x128xf32>
    %583 = vector.broadcast %566 : f32 to vector<8x128xf32>
    %584 = arith.mulf %39, %583 : vector<8x128xf32>
    %585 = arith.addf %582, %584 : vector<8x128xf32>
    %586 = vector.broadcast %569 : f32 to vector<8x128xf32>
    %587 = arith.mulf %46, %586 : vector<8x128xf32>
    %588 = arith.addf %585, %587 : vector<8x128xf32>
    %589 = vector.broadcast %568 : f32 to vector<8x128xf32>
    %590 = arith.mulf %53, %589 : vector<8x128xf32>
    %591 = arith.subf %588, %590 : vector<8x128xf32>
    %592 = vector.broadcast %568 : f32 to vector<8x128xf32>
    %593 = arith.mulf %32, %592 : vector<8x128xf32>
    %594 = vector.broadcast %569 : f32 to vector<8x128xf32>
    %595 = arith.mulf %39, %594 : vector<8x128xf32>
    %596 = arith.subf %593, %595 : vector<8x128xf32>
    %597 = vector.broadcast %566 : f32 to vector<8x128xf32>
    %598 = arith.mulf %46, %597 : vector<8x128xf32>
    %599 = arith.addf %596, %598 : vector<8x128xf32>
    %600 = vector.broadcast %567 : f32 to vector<8x128xf32>
    %601 = arith.mulf %53, %600 : vector<8x128xf32>
    %602 = arith.addf %599, %601 : vector<8x128xf32>
    %603 = vector.broadcast %569 : f32 to vector<8x128xf32>
    %604 = arith.mulf %32, %603 : vector<8x128xf32>
    %605 = vector.broadcast %568 : f32 to vector<8x128xf32>
    %606 = arith.mulf %39, %605 : vector<8x128xf32>
    %607 = arith.addf %604, %606 : vector<8x128xf32>
    %608 = vector.broadcast %567 : f32 to vector<8x128xf32>
    %609 = arith.mulf %46, %608 : vector<8x128xf32>
    %610 = arith.subf %607, %609 : vector<8x128xf32>
    %611 = vector.broadcast %566 : f32 to vector<8x128xf32>
    %612 = arith.mulf %53, %611 : vector<8x128xf32>
    %613 = arith.addf %610, %612 : vector<8x128xf32>
    %614 = arith.maximumf %510, %580 : vector<8x128xf32>
    %615 = arith.maximumf %511, %591 : vector<8x128xf32>
    %616 = arith.maximumf %512, %602 : vector<8x128xf32>
    %617 = arith.maximumf %513, %613 : vector<8x128xf32>
    %c44 = arith.constant 44 : index
    %618 = memref.load %arg1[%c44] : memref<96xf32, #tpu.memory_space<smem>>
    %c45 = arith.constant 45 : index
    %619 = memref.load %arg1[%c45] : memref<96xf32, #tpu.memory_space<smem>>
    %c46 = arith.constant 46 : index
    %620 = memref.load %arg1[%c46] : memref<96xf32, #tpu.memory_space<smem>>
    %c47 = arith.constant 47 : index
    %621 = memref.load %arg1[%c47] : memref<96xf32, #tpu.memory_space<smem>>
    %622 = vector.broadcast %618 : f32 to vector<8x128xf32>
    %623 = arith.mulf %32, %622 : vector<8x128xf32>
    %624 = vector.broadcast %619 : f32 to vector<8x128xf32>
    %625 = arith.mulf %39, %624 : vector<8x128xf32>
    %626 = arith.subf %623, %625 : vector<8x128xf32>
    %627 = vector.broadcast %620 : f32 to vector<8x128xf32>
    %628 = arith.mulf %46, %627 : vector<8x128xf32>
    %629 = arith.subf %626, %628 : vector<8x128xf32>
    %630 = vector.broadcast %621 : f32 to vector<8x128xf32>
    %631 = arith.mulf %53, %630 : vector<8x128xf32>
    %632 = arith.subf %629, %631 : vector<8x128xf32>
    %633 = vector.broadcast %619 : f32 to vector<8x128xf32>
    %634 = arith.mulf %32, %633 : vector<8x128xf32>
    %635 = vector.broadcast %618 : f32 to vector<8x128xf32>
    %636 = arith.mulf %39, %635 : vector<8x128xf32>
    %637 = arith.addf %634, %636 : vector<8x128xf32>
    %638 = vector.broadcast %621 : f32 to vector<8x128xf32>
    %639 = arith.mulf %46, %638 : vector<8x128xf32>
    %640 = arith.addf %637, %639 : vector<8x128xf32>
    %641 = vector.broadcast %620 : f32 to vector<8x128xf32>
    %642 = arith.mulf %53, %641 : vector<8x128xf32>
    %643 = arith.subf %640, %642 : vector<8x128xf32>
    %644 = vector.broadcast %620 : f32 to vector<8x128xf32>
    %645 = arith.mulf %32, %644 : vector<8x128xf32>
    %646 = vector.broadcast %621 : f32 to vector<8x128xf32>
    %647 = arith.mulf %39, %646 : vector<8x128xf32>
    %648 = arith.subf %645, %647 : vector<8x128xf32>
    %649 = vector.broadcast %618 : f32 to vector<8x128xf32>
    %650 = arith.mulf %46, %649 : vector<8x128xf32>
    %651 = arith.addf %648, %650 : vector<8x128xf32>
    %652 = vector.broadcast %619 : f32 to vector<8x128xf32>
    %653 = arith.mulf %53, %652 : vector<8x128xf32>
    %654 = arith.addf %651, %653 : vector<8x128xf32>
    %655 = vector.broadcast %621 : f32 to vector<8x128xf32>
    %656 = arith.mulf %32, %655 : vector<8x128xf32>
    %657 = vector.broadcast %620 : f32 to vector<8x128xf32>
    %658 = arith.mulf %39, %657 : vector<8x128xf32>
    %659 = arith.addf %656, %658 : vector<8x128xf32>
    %660 = vector.broadcast %619 : f32 to vector<8x128xf32>
    %661 = arith.mulf %46, %660 : vector<8x128xf32>
    %662 = arith.subf %659, %661 : vector<8x128xf32>
    %663 = vector.broadcast %618 : f32 to vector<8x128xf32>
    %664 = arith.mulf %53, %663 : vector<8x128xf32>
    %665 = arith.addf %662, %664 : vector<8x128xf32>
    %666 = arith.maximumf %562, %632 : vector<8x128xf32>
    %667 = arith.maximumf %563, %643 : vector<8x128xf32>
    %668 = arith.maximumf %564, %654 : vector<8x128xf32>
    %669 = arith.maximumf %565, %665 : vector<8x128xf32>
    %c48 = arith.constant 48 : index
    %670 = memref.load %arg1[%c48] : memref<96xf32, #tpu.memory_space<smem>>
    %c49 = arith.constant 49 : index
    %671 = memref.load %arg1[%c49] : memref<96xf32, #tpu.memory_space<smem>>
    %c50 = arith.constant 50 : index
    %672 = memref.load %arg1[%c50] : memref<96xf32, #tpu.memory_space<smem>>
    %c51 = arith.constant 51 : index
    %673 = memref.load %arg1[%c51] : memref<96xf32, #tpu.memory_space<smem>>
    %674 = vector.broadcast %670 : f32 to vector<8x128xf32>
    %675 = arith.mulf %32, %674 : vector<8x128xf32>
    %676 = vector.broadcast %671 : f32 to vector<8x128xf32>
    %677 = arith.mulf %39, %676 : vector<8x128xf32>
    %678 = arith.subf %675, %677 : vector<8x128xf32>
    %679 = vector.broadcast %672 : f32 to vector<8x128xf32>
    %680 = arith.mulf %46, %679 : vector<8x128xf32>
    %681 = arith.subf %678, %680 : vector<8x128xf32>
    %682 = vector.broadcast %673 : f32 to vector<8x128xf32>
    %683 = arith.mulf %53, %682 : vector<8x128xf32>
    %684 = arith.subf %681, %683 : vector<8x128xf32>
    %685 = vector.broadcast %671 : f32 to vector<8x128xf32>
    %686 = arith.mulf %32, %685 : vector<8x128xf32>
    %687 = vector.broadcast %670 : f32 to vector<8x128xf32>
    %688 = arith.mulf %39, %687 : vector<8x128xf32>
    %689 = arith.addf %686, %688 : vector<8x128xf32>
    %690 = vector.broadcast %673 : f32 to vector<8x128xf32>
    %691 = arith.mulf %46, %690 : vector<8x128xf32>
    %692 = arith.addf %689, %691 : vector<8x128xf32>
    %693 = vector.broadcast %672 : f32 to vector<8x128xf32>
    %694 = arith.mulf %53, %693 : vector<8x128xf32>
    %695 = arith.subf %692, %694 : vector<8x128xf32>
    %696 = vector.broadcast %672 : f32 to vector<8x128xf32>
    %697 = arith.mulf %32, %696 : vector<8x128xf32>
    %698 = vector.broadcast %673 : f32 to vector<8x128xf32>
    %699 = arith.mulf %39, %698 : vector<8x128xf32>
    %700 = arith.subf %697, %699 : vector<8x128xf32>
    %701 = vector.broadcast %670 : f32 to vector<8x128xf32>
    %702 = arith.mulf %46, %701 : vector<8x128xf32>
    %703 = arith.addf %700, %702 : vector<8x128xf32>
    %704 = vector.broadcast %671 : f32 to vector<8x128xf32>
    %705 = arith.mulf %53, %704 : vector<8x128xf32>
    %706 = arith.addf %703, %705 : vector<8x128xf32>
    %707 = vector.broadcast %673 : f32 to vector<8x128xf32>
    %708 = arith.mulf %32, %707 : vector<8x128xf32>
    %709 = vector.broadcast %672 : f32 to vector<8x128xf32>
    %710 = arith.mulf %39, %709 : vector<8x128xf32>
    %711 = arith.addf %708, %710 : vector<8x128xf32>
    %712 = vector.broadcast %671 : f32 to vector<8x128xf32>
    %713 = arith.mulf %46, %712 : vector<8x128xf32>
    %714 = arith.subf %711, %713 : vector<8x128xf32>
    %715 = vector.broadcast %670 : f32 to vector<8x128xf32>
    %716 = arith.mulf %53, %715 : vector<8x128xf32>
    %717 = arith.addf %714, %716 : vector<8x128xf32>
    %718 = arith.maximumf %614, %684 : vector<8x128xf32>
    %719 = arith.maximumf %615, %695 : vector<8x128xf32>
    %720 = arith.maximumf %616, %706 : vector<8x128xf32>
    %721 = arith.maximumf %617, %717 : vector<8x128xf32>
    %c52 = arith.constant 52 : index
    %722 = memref.load %arg1[%c52] : memref<96xf32, #tpu.memory_space<smem>>
    %c53 = arith.constant 53 : index
    %723 = memref.load %arg1[%c53] : memref<96xf32, #tpu.memory_space<smem>>
    %c54 = arith.constant 54 : index
    %724 = memref.load %arg1[%c54] : memref<96xf32, #tpu.memory_space<smem>>
    %c55 = arith.constant 55 : index
    %725 = memref.load %arg1[%c55] : memref<96xf32, #tpu.memory_space<smem>>
    %726 = vector.broadcast %722 : f32 to vector<8x128xf32>
    %727 = arith.mulf %32, %726 : vector<8x128xf32>
    %728 = vector.broadcast %723 : f32 to vector<8x128xf32>
    %729 = arith.mulf %39, %728 : vector<8x128xf32>
    %730 = arith.subf %727, %729 : vector<8x128xf32>
    %731 = vector.broadcast %724 : f32 to vector<8x128xf32>
    %732 = arith.mulf %46, %731 : vector<8x128xf32>
    %733 = arith.subf %730, %732 : vector<8x128xf32>
    %734 = vector.broadcast %725 : f32 to vector<8x128xf32>
    %735 = arith.mulf %53, %734 : vector<8x128xf32>
    %736 = arith.subf %733, %735 : vector<8x128xf32>
    %737 = vector.broadcast %723 : f32 to vector<8x128xf32>
    %738 = arith.mulf %32, %737 : vector<8x128xf32>
    %739 = vector.broadcast %722 : f32 to vector<8x128xf32>
    %740 = arith.mulf %39, %739 : vector<8x128xf32>
    %741 = arith.addf %738, %740 : vector<8x128xf32>
    %742 = vector.broadcast %725 : f32 to vector<8x128xf32>
    %743 = arith.mulf %46, %742 : vector<8x128xf32>
    %744 = arith.addf %741, %743 : vector<8x128xf32>
    %745 = vector.broadcast %724 : f32 to vector<8x128xf32>
    %746 = arith.mulf %53, %745 : vector<8x128xf32>
    %747 = arith.subf %744, %746 : vector<8x128xf32>
    %748 = vector.broadcast %724 : f32 to vector<8x128xf32>
    %749 = arith.mulf %32, %748 : vector<8x128xf32>
    %750 = vector.broadcast %725 : f32 to vector<8x128xf32>
    %751 = arith.mulf %39, %750 : vector<8x128xf32>
    %752 = arith.subf %749, %751 : vector<8x128xf32>
    %753 = vector.broadcast %722 : f32 to vector<8x128xf32>
    %754 = arith.mulf %46, %753 : vector<8x128xf32>
    %755 = arith.addf %752, %754 : vector<8x128xf32>
    %756 = vector.broadcast %723 : f32 to vector<8x128xf32>
    %757 = arith.mulf %53, %756 : vector<8x128xf32>
    %758 = arith.addf %755, %757 : vector<8x128xf32>
    %759 = vector.broadcast %725 : f32 to vector<8x128xf32>
    %760 = arith.mulf %32, %759 : vector<8x128xf32>
    %761 = vector.broadcast %724 : f32 to vector<8x128xf32>
    %762 = arith.mulf %39, %761 : vector<8x128xf32>
    %763 = arith.addf %760, %762 : vector<8x128xf32>
    %764 = vector.broadcast %723 : f32 to vector<8x128xf32>
    %765 = arith.mulf %46, %764 : vector<8x128xf32>
    %766 = arith.subf %763, %765 : vector<8x128xf32>
    %767 = vector.broadcast %722 : f32 to vector<8x128xf32>
    %768 = arith.mulf %53, %767 : vector<8x128xf32>
    %769 = arith.addf %766, %768 : vector<8x128xf32>
    %770 = arith.maximumf %666, %736 : vector<8x128xf32>
    %771 = arith.maximumf %667, %747 : vector<8x128xf32>
    %772 = arith.maximumf %668, %758 : vector<8x128xf32>
    %773 = arith.maximumf %669, %769 : vector<8x128xf32>
    %c56 = arith.constant 56 : index
    %774 = memref.load %arg1[%c56] : memref<96xf32, #tpu.memory_space<smem>>
    %c57 = arith.constant 57 : index
    %775 = memref.load %arg1[%c57] : memref<96xf32, #tpu.memory_space<smem>>
    %c58 = arith.constant 58 : index
    %776 = memref.load %arg1[%c58] : memref<96xf32, #tpu.memory_space<smem>>
    %c59 = arith.constant 59 : index
    %777 = memref.load %arg1[%c59] : memref<96xf32, #tpu.memory_space<smem>>
    %778 = vector.broadcast %774 : f32 to vector<8x128xf32>
    %779 = arith.mulf %32, %778 : vector<8x128xf32>
    %780 = vector.broadcast %775 : f32 to vector<8x128xf32>
    %781 = arith.mulf %39, %780 : vector<8x128xf32>
    %782 = arith.subf %779, %781 : vector<8x128xf32>
    %783 = vector.broadcast %776 : f32 to vector<8x128xf32>
    %784 = arith.mulf %46, %783 : vector<8x128xf32>
    %785 = arith.subf %782, %784 : vector<8x128xf32>
    %786 = vector.broadcast %777 : f32 to vector<8x128xf32>
    %787 = arith.mulf %53, %786 : vector<8x128xf32>
    %788 = arith.subf %785, %787 : vector<8x128xf32>
    %789 = vector.broadcast %775 : f32 to vector<8x128xf32>
    %790 = arith.mulf %32, %789 : vector<8x128xf32>
    %791 = vector.broadcast %774 : f32 to vector<8x128xf32>
    %792 = arith.mulf %39, %791 : vector<8x128xf32>
    %793 = arith.addf %790, %792 : vector<8x128xf32>
    %794 = vector.broadcast %777 : f32 to vector<8x128xf32>
    %795 = arith.mulf %46, %794 : vector<8x128xf32>
    %796 = arith.addf %793, %795 : vector<8x128xf32>
    %797 = vector.broadcast %776 : f32 to vector<8x128xf32>
    %798 = arith.mulf %53, %797 : vector<8x128xf32>
    %799 = arith.subf %796, %798 : vector<8x128xf32>
    %800 = vector.broadcast %776 : f32 to vector<8x128xf32>
    %801 = arith.mulf %32, %800 : vector<8x128xf32>
    %802 = vector.broadcast %777 : f32 to vector<8x128xf32>
    %803 = arith.mulf %39, %802 : vector<8x128xf32>
    %804 = arith.subf %801, %803 : vector<8x128xf32>
    %805 = vector.broadcast %774 : f32 to vector<8x128xf32>
    %806 = arith.mulf %46, %805 : vector<8x128xf32>
    %807 = arith.addf %804, %806 : vector<8x128xf32>
    %808 = vector.broadcast %775 : f32 to vector<8x128xf32>
    %809 = arith.mulf %53, %808 : vector<8x128xf32>
    %810 = arith.addf %807, %809 : vector<8x128xf32>
    %811 = vector.broadcast %777 : f32 to vector<8x128xf32>
    %812 = arith.mulf %32, %811 : vector<8x128xf32>
    %813 = vector.broadcast %776 : f32 to vector<8x128xf32>
    %814 = arith.mulf %39, %813 : vector<8x128xf32>
    %815 = arith.addf %812, %814 : vector<8x128xf32>
    %816 = vector.broadcast %775 : f32 to vector<8x128xf32>
    %817 = arith.mulf %46, %816 : vector<8x128xf32>
    %818 = arith.subf %815, %817 : vector<8x128xf32>
    %819 = vector.broadcast %774 : f32 to vector<8x128xf32>
    %820 = arith.mulf %53, %819 : vector<8x128xf32>
    %821 = arith.addf %818, %820 : vector<8x128xf32>
    %822 = arith.maximumf %718, %788 : vector<8x128xf32>
    %823 = arith.maximumf %719, %799 : vector<8x128xf32>
    %824 = arith.maximumf %720, %810 : vector<8x128xf32>
    %825 = arith.maximumf %721, %821 : vector<8x128xf32>
    %c60 = arith.constant 60 : index
    %826 = memref.load %arg1[%c60] : memref<96xf32, #tpu.memory_space<smem>>
    %c61 = arith.constant 61 : index
    %827 = memref.load %arg1[%c61] : memref<96xf32, #tpu.memory_space<smem>>
    %c62 = arith.constant 62 : index
    %828 = memref.load %arg1[%c62] : memref<96xf32, #tpu.memory_space<smem>>
    %c63 = arith.constant 63 : index
    %829 = memref.load %arg1[%c63] : memref<96xf32, #tpu.memory_space<smem>>
    %830 = vector.broadcast %826 : f32 to vector<8x128xf32>
    %831 = arith.mulf %32, %830 : vector<8x128xf32>
    %832 = vector.broadcast %827 : f32 to vector<8x128xf32>
    %833 = arith.mulf %39, %832 : vector<8x128xf32>
    %834 = arith.subf %831, %833 : vector<8x128xf32>
    %835 = vector.broadcast %828 : f32 to vector<8x128xf32>
    %836 = arith.mulf %46, %835 : vector<8x128xf32>
    %837 = arith.subf %834, %836 : vector<8x128xf32>
    %838 = vector.broadcast %829 : f32 to vector<8x128xf32>
    %839 = arith.mulf %53, %838 : vector<8x128xf32>
    %840 = arith.subf %837, %839 : vector<8x128xf32>
    %841 = vector.broadcast %827 : f32 to vector<8x128xf32>
    %842 = arith.mulf %32, %841 : vector<8x128xf32>
    %843 = vector.broadcast %826 : f32 to vector<8x128xf32>
    %844 = arith.mulf %39, %843 : vector<8x128xf32>
    %845 = arith.addf %842, %844 : vector<8x128xf32>
    %846 = vector.broadcast %829 : f32 to vector<8x128xf32>
    %847 = arith.mulf %46, %846 : vector<8x128xf32>
    %848 = arith.addf %845, %847 : vector<8x128xf32>
    %849 = vector.broadcast %828 : f32 to vector<8x128xf32>
    %850 = arith.mulf %53, %849 : vector<8x128xf32>
    %851 = arith.subf %848, %850 : vector<8x128xf32>
    %852 = vector.broadcast %828 : f32 to vector<8x128xf32>
    %853 = arith.mulf %32, %852 : vector<8x128xf32>
    %854 = vector.broadcast %829 : f32 to vector<8x128xf32>
    %855 = arith.mulf %39, %854 : vector<8x128xf32>
    %856 = arith.subf %853, %855 : vector<8x128xf32>
    %857 = vector.broadcast %826 : f32 to vector<8x128xf32>
    %858 = arith.mulf %46, %857 : vector<8x128xf32>
    %859 = arith.addf %856, %858 : vector<8x128xf32>
    %860 = vector.broadcast %827 : f32 to vector<8x128xf32>
    %861 = arith.mulf %53, %860 : vector<8x128xf32>
    %862 = arith.addf %859, %861 : vector<8x128xf32>
    %863 = vector.broadcast %829 : f32 to vector<8x128xf32>
    %864 = arith.mulf %32, %863 : vector<8x128xf32>
    %865 = vector.broadcast %828 : f32 to vector<8x128xf32>
    %866 = arith.mulf %39, %865 : vector<8x128xf32>
    %867 = arith.addf %864, %866 : vector<8x128xf32>
    %868 = vector.broadcast %827 : f32 to vector<8x128xf32>
    %869 = arith.mulf %46, %868 : vector<8x128xf32>
    %870 = arith.subf %867, %869 : vector<8x128xf32>
    %871 = vector.broadcast %826 : f32 to vector<8x128xf32>
    %872 = arith.mulf %53, %871 : vector<8x128xf32>
    %873 = arith.addf %870, %872 : vector<8x128xf32>
    %874 = arith.maximumf %770, %840 : vector<8x128xf32>
    %875 = arith.maximumf %771, %851 : vector<8x128xf32>
    %876 = arith.maximumf %772, %862 : vector<8x128xf32>
    %877 = arith.maximumf %773, %873 : vector<8x128xf32>
    %c64 = arith.constant 64 : index
    %878 = memref.load %arg1[%c64] : memref<96xf32, #tpu.memory_space<smem>>
    %c65 = arith.constant 65 : index
    %879 = memref.load %arg1[%c65] : memref<96xf32, #tpu.memory_space<smem>>
    %c66 = arith.constant 66 : index
    %880 = memref.load %arg1[%c66] : memref<96xf32, #tpu.memory_space<smem>>
    %c67 = arith.constant 67 : index
    %881 = memref.load %arg1[%c67] : memref<96xf32, #tpu.memory_space<smem>>
    %882 = vector.broadcast %878 : f32 to vector<8x128xf32>
    %883 = arith.mulf %32, %882 : vector<8x128xf32>
    %884 = vector.broadcast %879 : f32 to vector<8x128xf32>
    %885 = arith.mulf %39, %884 : vector<8x128xf32>
    %886 = arith.subf %883, %885 : vector<8x128xf32>
    %887 = vector.broadcast %880 : f32 to vector<8x128xf32>
    %888 = arith.mulf %46, %887 : vector<8x128xf32>
    %889 = arith.subf %886, %888 : vector<8x128xf32>
    %890 = vector.broadcast %881 : f32 to vector<8x128xf32>
    %891 = arith.mulf %53, %890 : vector<8x128xf32>
    %892 = arith.subf %889, %891 : vector<8x128xf32>
    %893 = vector.broadcast %879 : f32 to vector<8x128xf32>
    %894 = arith.mulf %32, %893 : vector<8x128xf32>
    %895 = vector.broadcast %878 : f32 to vector<8x128xf32>
    %896 = arith.mulf %39, %895 : vector<8x128xf32>
    %897 = arith.addf %894, %896 : vector<8x128xf32>
    %898 = vector.broadcast %881 : f32 to vector<8x128xf32>
    %899 = arith.mulf %46, %898 : vector<8x128xf32>
    %900 = arith.addf %897, %899 : vector<8x128xf32>
    %901 = vector.broadcast %880 : f32 to vector<8x128xf32>
    %902 = arith.mulf %53, %901 : vector<8x128xf32>
    %903 = arith.subf %900, %902 : vector<8x128xf32>
    %904 = vector.broadcast %880 : f32 to vector<8x128xf32>
    %905 = arith.mulf %32, %904 : vector<8x128xf32>
    %906 = vector.broadcast %881 : f32 to vector<8x128xf32>
    %907 = arith.mulf %39, %906 : vector<8x128xf32>
    %908 = arith.subf %905, %907 : vector<8x128xf32>
    %909 = vector.broadcast %878 : f32 to vector<8x128xf32>
    %910 = arith.mulf %46, %909 : vector<8x128xf32>
    %911 = arith.addf %908, %910 : vector<8x128xf32>
    %912 = vector.broadcast %879 : f32 to vector<8x128xf32>
    %913 = arith.mulf %53, %912 : vector<8x128xf32>
    %914 = arith.addf %911, %913 : vector<8x128xf32>
    %915 = vector.broadcast %881 : f32 to vector<8x128xf32>
    %916 = arith.mulf %32, %915 : vector<8x128xf32>
    %917 = vector.broadcast %880 : f32 to vector<8x128xf32>
    %918 = arith.mulf %39, %917 : vector<8x128xf32>
    %919 = arith.addf %916, %918 : vector<8x128xf32>
    %920 = vector.broadcast %879 : f32 to vector<8x128xf32>
    %921 = arith.mulf %46, %920 : vector<8x128xf32>
    %922 = arith.subf %919, %921 : vector<8x128xf32>
    %923 = vector.broadcast %878 : f32 to vector<8x128xf32>
    %924 = arith.mulf %53, %923 : vector<8x128xf32>
    %925 = arith.addf %922, %924 : vector<8x128xf32>
    %926 = arith.maximumf %822, %892 : vector<8x128xf32>
    %927 = arith.maximumf %823, %903 : vector<8x128xf32>
    %928 = arith.maximumf %824, %914 : vector<8x128xf32>
    %929 = arith.maximumf %825, %925 : vector<8x128xf32>
    %c68 = arith.constant 68 : index
    %930 = memref.load %arg1[%c68] : memref<96xf32, #tpu.memory_space<smem>>
    %c69 = arith.constant 69 : index
    %931 = memref.load %arg1[%c69] : memref<96xf32, #tpu.memory_space<smem>>
    %c70 = arith.constant 70 : index
    %932 = memref.load %arg1[%c70] : memref<96xf32, #tpu.memory_space<smem>>
    %c71 = arith.constant 71 : index
    %933 = memref.load %arg1[%c71] : memref<96xf32, #tpu.memory_space<smem>>
    %934 = vector.broadcast %930 : f32 to vector<8x128xf32>
    %935 = arith.mulf %32, %934 : vector<8x128xf32>
    %936 = vector.broadcast %931 : f32 to vector<8x128xf32>
    %937 = arith.mulf %39, %936 : vector<8x128xf32>
    %938 = arith.subf %935, %937 : vector<8x128xf32>
    %939 = vector.broadcast %932 : f32 to vector<8x128xf32>
    %940 = arith.mulf %46, %939 : vector<8x128xf32>
    %941 = arith.subf %938, %940 : vector<8x128xf32>
    %942 = vector.broadcast %933 : f32 to vector<8x128xf32>
    %943 = arith.mulf %53, %942 : vector<8x128xf32>
    %944 = arith.subf %941, %943 : vector<8x128xf32>
    %945 = vector.broadcast %931 : f32 to vector<8x128xf32>
    %946 = arith.mulf %32, %945 : vector<8x128xf32>
    %947 = vector.broadcast %930 : f32 to vector<8x128xf32>
    %948 = arith.mulf %39, %947 : vector<8x128xf32>
    %949 = arith.addf %946, %948 : vector<8x128xf32>
    %950 = vector.broadcast %933 : f32 to vector<8x128xf32>
    %951 = arith.mulf %46, %950 : vector<8x128xf32>
    %952 = arith.addf %949, %951 : vector<8x128xf32>
    %953 = vector.broadcast %932 : f32 to vector<8x128xf32>
    %954 = arith.mulf %53, %953 : vector<8x128xf32>
    %955 = arith.subf %952, %954 : vector<8x128xf32>
    %956 = vector.broadcast %932 : f32 to vector<8x128xf32>
    %957 = arith.mulf %32, %956 : vector<8x128xf32>
    %958 = vector.broadcast %933 : f32 to vector<8x128xf32>
    %959 = arith.mulf %39, %958 : vector<8x128xf32>
    %960 = arith.subf %957, %959 : vector<8x128xf32>
    %961 = vector.broadcast %930 : f32 to vector<8x128xf32>
    %962 = arith.mulf %46, %961 : vector<8x128xf32>
    %963 = arith.addf %960, %962 : vector<8x128xf32>
    %964 = vector.broadcast %931 : f32 to vector<8x128xf32>
    %965 = arith.mulf %53, %964 : vector<8x128xf32>
    %966 = arith.addf %963, %965 : vector<8x128xf32>
    %967 = vector.broadcast %933 : f32 to vector<8x128xf32>
    %968 = arith.mulf %32, %967 : vector<8x128xf32>
    %969 = vector.broadcast %932 : f32 to vector<8x128xf32>
    %970 = arith.mulf %39, %969 : vector<8x128xf32>
    %971 = arith.addf %968, %970 : vector<8x128xf32>
    %972 = vector.broadcast %931 : f32 to vector<8x128xf32>
    %973 = arith.mulf %46, %972 : vector<8x128xf32>
    %974 = arith.subf %971, %973 : vector<8x128xf32>
    %975 = vector.broadcast %930 : f32 to vector<8x128xf32>
    %976 = arith.mulf %53, %975 : vector<8x128xf32>
    %977 = arith.addf %974, %976 : vector<8x128xf32>
    %978 = arith.maximumf %874, %944 : vector<8x128xf32>
    %979 = arith.maximumf %875, %955 : vector<8x128xf32>
    %980 = arith.maximumf %876, %966 : vector<8x128xf32>
    %981 = arith.maximumf %877, %977 : vector<8x128xf32>
    %c72 = arith.constant 72 : index
    %982 = memref.load %arg1[%c72] : memref<96xf32, #tpu.memory_space<smem>>
    %c73 = arith.constant 73 : index
    %983 = memref.load %arg1[%c73] : memref<96xf32, #tpu.memory_space<smem>>
    %c74 = arith.constant 74 : index
    %984 = memref.load %arg1[%c74] : memref<96xf32, #tpu.memory_space<smem>>
    %c75 = arith.constant 75 : index
    %985 = memref.load %arg1[%c75] : memref<96xf32, #tpu.memory_space<smem>>
    %986 = vector.broadcast %982 : f32 to vector<8x128xf32>
    %987 = arith.mulf %32, %986 : vector<8x128xf32>
    %988 = vector.broadcast %983 : f32 to vector<8x128xf32>
    %989 = arith.mulf %39, %988 : vector<8x128xf32>
    %990 = arith.subf %987, %989 : vector<8x128xf32>
    %991 = vector.broadcast %984 : f32 to vector<8x128xf32>
    %992 = arith.mulf %46, %991 : vector<8x128xf32>
    %993 = arith.subf %990, %992 : vector<8x128xf32>
    %994 = vector.broadcast %985 : f32 to vector<8x128xf32>
    %995 = arith.mulf %53, %994 : vector<8x128xf32>
    %996 = arith.subf %993, %995 : vector<8x128xf32>
    %997 = vector.broadcast %983 : f32 to vector<8x128xf32>
    %998 = arith.mulf %32, %997 : vector<8x128xf32>
    %999 = vector.broadcast %982 : f32 to vector<8x128xf32>
    %1000 = arith.mulf %39, %999 : vector<8x128xf32>
    %1001 = arith.addf %998, %1000 : vector<8x128xf32>
    %1002 = vector.broadcast %985 : f32 to vector<8x128xf32>
    %1003 = arith.mulf %46, %1002 : vector<8x128xf32>
    %1004 = arith.addf %1001, %1003 : vector<8x128xf32>
    %1005 = vector.broadcast %984 : f32 to vector<8x128xf32>
    %1006 = arith.mulf %53, %1005 : vector<8x128xf32>
    %1007 = arith.subf %1004, %1006 : vector<8x128xf32>
    %1008 = vector.broadcast %984 : f32 to vector<8x128xf32>
    %1009 = arith.mulf %32, %1008 : vector<8x128xf32>
    %1010 = vector.broadcast %985 : f32 to vector<8x128xf32>
    %1011 = arith.mulf %39, %1010 : vector<8x128xf32>
    %1012 = arith.subf %1009, %1011 : vector<8x128xf32>
    %1013 = vector.broadcast %982 : f32 to vector<8x128xf32>
    %1014 = arith.mulf %46, %1013 : vector<8x128xf32>
    %1015 = arith.addf %1012, %1014 : vector<8x128xf32>
    %1016 = vector.broadcast %983 : f32 to vector<8x128xf32>
    %1017 = arith.mulf %53, %1016 : vector<8x128xf32>
    %1018 = arith.addf %1015, %1017 : vector<8x128xf32>
    %1019 = vector.broadcast %985 : f32 to vector<8x128xf32>
    %1020 = arith.mulf %32, %1019 : vector<8x128xf32>
    %1021 = vector.broadcast %984 : f32 to vector<8x128xf32>
    %1022 = arith.mulf %39, %1021 : vector<8x128xf32>
    %1023 = arith.addf %1020, %1022 : vector<8x128xf32>
    %1024 = vector.broadcast %983 : f32 to vector<8x128xf32>
    %1025 = arith.mulf %46, %1024 : vector<8x128xf32>
    %1026 = arith.subf %1023, %1025 : vector<8x128xf32>
    %1027 = vector.broadcast %982 : f32 to vector<8x128xf32>
    %1028 = arith.mulf %53, %1027 : vector<8x128xf32>
    %1029 = arith.addf %1026, %1028 : vector<8x128xf32>
    %1030 = arith.maximumf %926, %996 : vector<8x128xf32>
    %1031 = arith.maximumf %927, %1007 : vector<8x128xf32>
    %1032 = arith.maximumf %928, %1018 : vector<8x128xf32>
    %1033 = arith.maximumf %929, %1029 : vector<8x128xf32>
    %c76 = arith.constant 76 : index
    %1034 = memref.load %arg1[%c76] : memref<96xf32, #tpu.memory_space<smem>>
    %c77 = arith.constant 77 : index
    %1035 = memref.load %arg1[%c77] : memref<96xf32, #tpu.memory_space<smem>>
    %c78 = arith.constant 78 : index
    %1036 = memref.load %arg1[%c78] : memref<96xf32, #tpu.memory_space<smem>>
    %c79 = arith.constant 79 : index
    %1037 = memref.load %arg1[%c79] : memref<96xf32, #tpu.memory_space<smem>>
    %1038 = vector.broadcast %1034 : f32 to vector<8x128xf32>
    %1039 = arith.mulf %32, %1038 : vector<8x128xf32>
    %1040 = vector.broadcast %1035 : f32 to vector<8x128xf32>
    %1041 = arith.mulf %39, %1040 : vector<8x128xf32>
    %1042 = arith.subf %1039, %1041 : vector<8x128xf32>
    %1043 = vector.broadcast %1036 : f32 to vector<8x128xf32>
    %1044 = arith.mulf %46, %1043 : vector<8x128xf32>
    %1045 = arith.subf %1042, %1044 : vector<8x128xf32>
    %1046 = vector.broadcast %1037 : f32 to vector<8x128xf32>
    %1047 = arith.mulf %53, %1046 : vector<8x128xf32>
    %1048 = arith.subf %1045, %1047 : vector<8x128xf32>
    %1049 = vector.broadcast %1035 : f32 to vector<8x128xf32>
    %1050 = arith.mulf %32, %1049 : vector<8x128xf32>
    %1051 = vector.broadcast %1034 : f32 to vector<8x128xf32>
    %1052 = arith.mulf %39, %1051 : vector<8x128xf32>
    %1053 = arith.addf %1050, %1052 : vector<8x128xf32>
    %1054 = vector.broadcast %1037 : f32 to vector<8x128xf32>
    %1055 = arith.mulf %46, %1054 : vector<8x128xf32>
    %1056 = arith.addf %1053, %1055 : vector<8x128xf32>
    %1057 = vector.broadcast %1036 : f32 to vector<8x128xf32>
    %1058 = arith.mulf %53, %1057 : vector<8x128xf32>
    %1059 = arith.subf %1056, %1058 : vector<8x128xf32>
    %1060 = vector.broadcast %1036 : f32 to vector<8x128xf32>
    %1061 = arith.mulf %32, %1060 : vector<8x128xf32>
    %1062 = vector.broadcast %1037 : f32 to vector<8x128xf32>
    %1063 = arith.mulf %39, %1062 : vector<8x128xf32>
    %1064 = arith.subf %1061, %1063 : vector<8x128xf32>
    %1065 = vector.broadcast %1034 : f32 to vector<8x128xf32>
    %1066 = arith.mulf %46, %1065 : vector<8x128xf32>
    %1067 = arith.addf %1064, %1066 : vector<8x128xf32>
    %1068 = vector.broadcast %1035 : f32 to vector<8x128xf32>
    %1069 = arith.mulf %53, %1068 : vector<8x128xf32>
    %1070 = arith.addf %1067, %1069 : vector<8x128xf32>
    %1071 = vector.broadcast %1037 : f32 to vector<8x128xf32>
    %1072 = arith.mulf %32, %1071 : vector<8x128xf32>
    %1073 = vector.broadcast %1036 : f32 to vector<8x128xf32>
    %1074 = arith.mulf %39, %1073 : vector<8x128xf32>
    %1075 = arith.addf %1072, %1074 : vector<8x128xf32>
    %1076 = vector.broadcast %1035 : f32 to vector<8x128xf32>
    %1077 = arith.mulf %46, %1076 : vector<8x128xf32>
    %1078 = arith.subf %1075, %1077 : vector<8x128xf32>
    %1079 = vector.broadcast %1034 : f32 to vector<8x128xf32>
    %1080 = arith.mulf %53, %1079 : vector<8x128xf32>
    %1081 = arith.addf %1078, %1080 : vector<8x128xf32>
    %1082 = arith.maximumf %978, %1048 : vector<8x128xf32>
    %1083 = arith.maximumf %979, %1059 : vector<8x128xf32>
    %1084 = arith.maximumf %980, %1070 : vector<8x128xf32>
    %1085 = arith.maximumf %981, %1081 : vector<8x128xf32>
    %c80 = arith.constant 80 : index
    %1086 = memref.load %arg1[%c80] : memref<96xf32, #tpu.memory_space<smem>>
    %c81 = arith.constant 81 : index
    %1087 = memref.load %arg1[%c81] : memref<96xf32, #tpu.memory_space<smem>>
    %c82 = arith.constant 82 : index
    %1088 = memref.load %arg1[%c82] : memref<96xf32, #tpu.memory_space<smem>>
    %c83 = arith.constant 83 : index
    %1089 = memref.load %arg1[%c83] : memref<96xf32, #tpu.memory_space<smem>>
    %1090 = vector.broadcast %1086 : f32 to vector<8x128xf32>
    %1091 = arith.mulf %32, %1090 : vector<8x128xf32>
    %1092 = vector.broadcast %1087 : f32 to vector<8x128xf32>
    %1093 = arith.mulf %39, %1092 : vector<8x128xf32>
    %1094 = arith.subf %1091, %1093 : vector<8x128xf32>
    %1095 = vector.broadcast %1088 : f32 to vector<8x128xf32>
    %1096 = arith.mulf %46, %1095 : vector<8x128xf32>
    %1097 = arith.subf %1094, %1096 : vector<8x128xf32>
    %1098 = vector.broadcast %1089 : f32 to vector<8x128xf32>
    %1099 = arith.mulf %53, %1098 : vector<8x128xf32>
    %1100 = arith.subf %1097, %1099 : vector<8x128xf32>
    %1101 = vector.broadcast %1087 : f32 to vector<8x128xf32>
    %1102 = arith.mulf %32, %1101 : vector<8x128xf32>
    %1103 = vector.broadcast %1086 : f32 to vector<8x128xf32>
    %1104 = arith.mulf %39, %1103 : vector<8x128xf32>
    %1105 = arith.addf %1102, %1104 : vector<8x128xf32>
    %1106 = vector.broadcast %1089 : f32 to vector<8x128xf32>
    %1107 = arith.mulf %46, %1106 : vector<8x128xf32>
    %1108 = arith.addf %1105, %1107 : vector<8x128xf32>
    %1109 = vector.broadcast %1088 : f32 to vector<8x128xf32>
    %1110 = arith.mulf %53, %1109 : vector<8x128xf32>
    %1111 = arith.subf %1108, %1110 : vector<8x128xf32>
    %1112 = vector.broadcast %1088 : f32 to vector<8x128xf32>
    %1113 = arith.mulf %32, %1112 : vector<8x128xf32>
    %1114 = vector.broadcast %1089 : f32 to vector<8x128xf32>
    %1115 = arith.mulf %39, %1114 : vector<8x128xf32>
    %1116 = arith.subf %1113, %1115 : vector<8x128xf32>
    %1117 = vector.broadcast %1086 : f32 to vector<8x128xf32>
    %1118 = arith.mulf %46, %1117 : vector<8x128xf32>
    %1119 = arith.addf %1116, %1118 : vector<8x128xf32>
    %1120 = vector.broadcast %1087 : f32 to vector<8x128xf32>
    %1121 = arith.mulf %53, %1120 : vector<8x128xf32>
    %1122 = arith.addf %1119, %1121 : vector<8x128xf32>
    %1123 = vector.broadcast %1089 : f32 to vector<8x128xf32>
    %1124 = arith.mulf %32, %1123 : vector<8x128xf32>
    %1125 = vector.broadcast %1088 : f32 to vector<8x128xf32>
    %1126 = arith.mulf %39, %1125 : vector<8x128xf32>
    %1127 = arith.addf %1124, %1126 : vector<8x128xf32>
    %1128 = vector.broadcast %1087 : f32 to vector<8x128xf32>
    %1129 = arith.mulf %46, %1128 : vector<8x128xf32>
    %1130 = arith.subf %1127, %1129 : vector<8x128xf32>
    %1131 = vector.broadcast %1086 : f32 to vector<8x128xf32>
    %1132 = arith.mulf %53, %1131 : vector<8x128xf32>
    %1133 = arith.addf %1130, %1132 : vector<8x128xf32>
    %1134 = arith.maximumf %1030, %1100 : vector<8x128xf32>
    %1135 = arith.maximumf %1031, %1111 : vector<8x128xf32>
    %1136 = arith.maximumf %1032, %1122 : vector<8x128xf32>
    %1137 = arith.maximumf %1033, %1133 : vector<8x128xf32>
    %c84 = arith.constant 84 : index
    %1138 = memref.load %arg1[%c84] : memref<96xf32, #tpu.memory_space<smem>>
    %c85 = arith.constant 85 : index
    %1139 = memref.load %arg1[%c85] : memref<96xf32, #tpu.memory_space<smem>>
    %c86 = arith.constant 86 : index
    %1140 = memref.load %arg1[%c86] : memref<96xf32, #tpu.memory_space<smem>>
    %c87 = arith.constant 87 : index
    %1141 = memref.load %arg1[%c87] : memref<96xf32, #tpu.memory_space<smem>>
    %1142 = vector.broadcast %1138 : f32 to vector<8x128xf32>
    %1143 = arith.mulf %32, %1142 : vector<8x128xf32>
    %1144 = vector.broadcast %1139 : f32 to vector<8x128xf32>
    %1145 = arith.mulf %39, %1144 : vector<8x128xf32>
    %1146 = arith.subf %1143, %1145 : vector<8x128xf32>
    %1147 = vector.broadcast %1140 : f32 to vector<8x128xf32>
    %1148 = arith.mulf %46, %1147 : vector<8x128xf32>
    %1149 = arith.subf %1146, %1148 : vector<8x128xf32>
    %1150 = vector.broadcast %1141 : f32 to vector<8x128xf32>
    %1151 = arith.mulf %53, %1150 : vector<8x128xf32>
    %1152 = arith.subf %1149, %1151 : vector<8x128xf32>
    %1153 = vector.broadcast %1139 : f32 to vector<8x128xf32>
    %1154 = arith.mulf %32, %1153 : vector<8x128xf32>
    %1155 = vector.broadcast %1138 : f32 to vector<8x128xf32>
    %1156 = arith.mulf %39, %1155 : vector<8x128xf32>
    %1157 = arith.addf %1154, %1156 : vector<8x128xf32>
    %1158 = vector.broadcast %1141 : f32 to vector<8x128xf32>
    %1159 = arith.mulf %46, %1158 : vector<8x128xf32>
    %1160 = arith.addf %1157, %1159 : vector<8x128xf32>
    %1161 = vector.broadcast %1140 : f32 to vector<8x128xf32>
    %1162 = arith.mulf %53, %1161 : vector<8x128xf32>
    %1163 = arith.subf %1160, %1162 : vector<8x128xf32>
    %1164 = vector.broadcast %1140 : f32 to vector<8x128xf32>
    %1165 = arith.mulf %32, %1164 : vector<8x128xf32>
    %1166 = vector.broadcast %1141 : f32 to vector<8x128xf32>
    %1167 = arith.mulf %39, %1166 : vector<8x128xf32>
    %1168 = arith.subf %1165, %1167 : vector<8x128xf32>
    %1169 = vector.broadcast %1138 : f32 to vector<8x128xf32>
    %1170 = arith.mulf %46, %1169 : vector<8x128xf32>
    %1171 = arith.addf %1168, %1170 : vector<8x128xf32>
    %1172 = vector.broadcast %1139 : f32 to vector<8x128xf32>
    %1173 = arith.mulf %53, %1172 : vector<8x128xf32>
    %1174 = arith.addf %1171, %1173 : vector<8x128xf32>
    %1175 = vector.broadcast %1141 : f32 to vector<8x128xf32>
    %1176 = arith.mulf %32, %1175 : vector<8x128xf32>
    %1177 = vector.broadcast %1140 : f32 to vector<8x128xf32>
    %1178 = arith.mulf %39, %1177 : vector<8x128xf32>
    %1179 = arith.addf %1176, %1178 : vector<8x128xf32>
    %1180 = vector.broadcast %1139 : f32 to vector<8x128xf32>
    %1181 = arith.mulf %46, %1180 : vector<8x128xf32>
    %1182 = arith.subf %1179, %1181 : vector<8x128xf32>
    %1183 = vector.broadcast %1138 : f32 to vector<8x128xf32>
    %1184 = arith.mulf %53, %1183 : vector<8x128xf32>
    %1185 = arith.addf %1182, %1184 : vector<8x128xf32>
    %1186 = arith.maximumf %1082, %1152 : vector<8x128xf32>
    %1187 = arith.maximumf %1083, %1163 : vector<8x128xf32>
    %1188 = arith.maximumf %1084, %1174 : vector<8x128xf32>
    %1189 = arith.maximumf %1085, %1185 : vector<8x128xf32>
    %c88 = arith.constant 88 : index
    %1190 = memref.load %arg1[%c88] : memref<96xf32, #tpu.memory_space<smem>>
    %c89 = arith.constant 89 : index
    %1191 = memref.load %arg1[%c89] : memref<96xf32, #tpu.memory_space<smem>>
    %c90 = arith.constant 90 : index
    %1192 = memref.load %arg1[%c90] : memref<96xf32, #tpu.memory_space<smem>>
    %c91 = arith.constant 91 : index
    %1193 = memref.load %arg1[%c91] : memref<96xf32, #tpu.memory_space<smem>>
    %1194 = vector.broadcast %1190 : f32 to vector<8x128xf32>
    %1195 = arith.mulf %32, %1194 : vector<8x128xf32>
    %1196 = vector.broadcast %1191 : f32 to vector<8x128xf32>
    %1197 = arith.mulf %39, %1196 : vector<8x128xf32>
    %1198 = arith.subf %1195, %1197 : vector<8x128xf32>
    %1199 = vector.broadcast %1192 : f32 to vector<8x128xf32>
    %1200 = arith.mulf %46, %1199 : vector<8x128xf32>
    %1201 = arith.subf %1198, %1200 : vector<8x128xf32>
    %1202 = vector.broadcast %1193 : f32 to vector<8x128xf32>
    %1203 = arith.mulf %53, %1202 : vector<8x128xf32>
    %1204 = arith.subf %1201, %1203 : vector<8x128xf32>
    %1205 = vector.broadcast %1191 : f32 to vector<8x128xf32>
    %1206 = arith.mulf %32, %1205 : vector<8x128xf32>
    %1207 = vector.broadcast %1190 : f32 to vector<8x128xf32>
    %1208 = arith.mulf %39, %1207 : vector<8x128xf32>
    %1209 = arith.addf %1206, %1208 : vector<8x128xf32>
    %1210 = vector.broadcast %1193 : f32 to vector<8x128xf32>
    %1211 = arith.mulf %46, %1210 : vector<8x128xf32>
    %1212 = arith.addf %1209, %1211 : vector<8x128xf32>
    %1213 = vector.broadcast %1192 : f32 to vector<8x128xf32>
    %1214 = arith.mulf %53, %1213 : vector<8x128xf32>
    %1215 = arith.subf %1212, %1214 : vector<8x128xf32>
    %1216 = vector.broadcast %1192 : f32 to vector<8x128xf32>
    %1217 = arith.mulf %32, %1216 : vector<8x128xf32>
    %1218 = vector.broadcast %1193 : f32 to vector<8x128xf32>
    %1219 = arith.mulf %39, %1218 : vector<8x128xf32>
    %1220 = arith.subf %1217, %1219 : vector<8x128xf32>
    %1221 = vector.broadcast %1190 : f32 to vector<8x128xf32>
    %1222 = arith.mulf %46, %1221 : vector<8x128xf32>
    %1223 = arith.addf %1220, %1222 : vector<8x128xf32>
    %1224 = vector.broadcast %1191 : f32 to vector<8x128xf32>
    %1225 = arith.mulf %53, %1224 : vector<8x128xf32>
    %1226 = arith.addf %1223, %1225 : vector<8x128xf32>
    %1227 = vector.broadcast %1193 : f32 to vector<8x128xf32>
    %1228 = arith.mulf %32, %1227 : vector<8x128xf32>
    %1229 = vector.broadcast %1192 : f32 to vector<8x128xf32>
    %1230 = arith.mulf %39, %1229 : vector<8x128xf32>
    %1231 = arith.addf %1228, %1230 : vector<8x128xf32>
    %1232 = vector.broadcast %1191 : f32 to vector<8x128xf32>
    %1233 = arith.mulf %46, %1232 : vector<8x128xf32>
    %1234 = arith.subf %1231, %1233 : vector<8x128xf32>
    %1235 = vector.broadcast %1190 : f32 to vector<8x128xf32>
    %1236 = arith.mulf %53, %1235 : vector<8x128xf32>
    %1237 = arith.addf %1234, %1236 : vector<8x128xf32>
    %1238 = arith.maximumf %1134, %1204 : vector<8x128xf32>
    %1239 = arith.maximumf %1135, %1215 : vector<8x128xf32>
    %1240 = arith.maximumf %1136, %1226 : vector<8x128xf32>
    %1241 = arith.maximumf %1137, %1237 : vector<8x128xf32>
    %c92 = arith.constant 92 : index
    %1242 = memref.load %arg1[%c92] : memref<96xf32, #tpu.memory_space<smem>>
    %c93 = arith.constant 93 : index
    %1243 = memref.load %arg1[%c93] : memref<96xf32, #tpu.memory_space<smem>>
    %c94 = arith.constant 94 : index
    %1244 = memref.load %arg1[%c94] : memref<96xf32, #tpu.memory_space<smem>>
    %c95 = arith.constant 95 : index
    %1245 = memref.load %arg1[%c95] : memref<96xf32, #tpu.memory_space<smem>>
    %1246 = vector.broadcast %1242 : f32 to vector<8x128xf32>
    %1247 = arith.mulf %32, %1246 : vector<8x128xf32>
    %1248 = vector.broadcast %1243 : f32 to vector<8x128xf32>
    %1249 = arith.mulf %39, %1248 : vector<8x128xf32>
    %1250 = arith.subf %1247, %1249 : vector<8x128xf32>
    %1251 = vector.broadcast %1244 : f32 to vector<8x128xf32>
    %1252 = arith.mulf %46, %1251 : vector<8x128xf32>
    %1253 = arith.subf %1250, %1252 : vector<8x128xf32>
    %1254 = vector.broadcast %1245 : f32 to vector<8x128xf32>
    %1255 = arith.mulf %53, %1254 : vector<8x128xf32>
    %1256 = arith.subf %1253, %1255 : vector<8x128xf32>
    %1257 = vector.broadcast %1243 : f32 to vector<8x128xf32>
    %1258 = arith.mulf %32, %1257 : vector<8x128xf32>
    %1259 = vector.broadcast %1242 : f32 to vector<8x128xf32>
    %1260 = arith.mulf %39, %1259 : vector<8x128xf32>
    %1261 = arith.addf %1258, %1260 : vector<8x128xf32>
    %1262 = vector.broadcast %1245 : f32 to vector<8x128xf32>
    %1263 = arith.mulf %46, %1262 : vector<8x128xf32>
    %1264 = arith.addf %1261, %1263 : vector<8x128xf32>
    %1265 = vector.broadcast %1244 : f32 to vector<8x128xf32>
    %1266 = arith.mulf %53, %1265 : vector<8x128xf32>
    %1267 = arith.subf %1264, %1266 : vector<8x128xf32>
    %1268 = vector.broadcast %1244 : f32 to vector<8x128xf32>
    %1269 = arith.mulf %32, %1268 : vector<8x128xf32>
    %1270 = vector.broadcast %1245 : f32 to vector<8x128xf32>
    %1271 = arith.mulf %39, %1270 : vector<8x128xf32>
    %1272 = arith.subf %1269, %1271 : vector<8x128xf32>
    %1273 = vector.broadcast %1242 : f32 to vector<8x128xf32>
    %1274 = arith.mulf %46, %1273 : vector<8x128xf32>
    %1275 = arith.addf %1272, %1274 : vector<8x128xf32>
    %1276 = vector.broadcast %1243 : f32 to vector<8x128xf32>
    %1277 = arith.mulf %53, %1276 : vector<8x128xf32>
    %1278 = arith.addf %1275, %1277 : vector<8x128xf32>
    %1279 = vector.broadcast %1245 : f32 to vector<8x128xf32>
    %1280 = arith.mulf %32, %1279 : vector<8x128xf32>
    %1281 = vector.broadcast %1244 : f32 to vector<8x128xf32>
    %1282 = arith.mulf %39, %1281 : vector<8x128xf32>
    %1283 = arith.addf %1280, %1282 : vector<8x128xf32>
    %1284 = vector.broadcast %1243 : f32 to vector<8x128xf32>
    %1285 = arith.mulf %46, %1284 : vector<8x128xf32>
    %1286 = arith.subf %1283, %1285 : vector<8x128xf32>
    %1287 = vector.broadcast %1242 : f32 to vector<8x128xf32>
    %1288 = arith.mulf %53, %1287 : vector<8x128xf32>
    %1289 = arith.addf %1286, %1288 : vector<8x128xf32>
    %1290 = arith.maximumf %1186, %1256 : vector<8x128xf32>
    %1291 = arith.maximumf %1187, %1267 : vector<8x128xf32>
    %1292 = arith.maximumf %1188, %1278 : vector<8x128xf32>
    %1293 = arith.maximumf %1189, %1289 : vector<8x128xf32>
    %1294 = arith.maximumf %1238, %1290 : vector<8x128xf32>
    %1295 = arith.maximumf %1239, %1291 : vector<8x128xf32>
    %1296 = arith.maximumf %1240, %1292 : vector<8x128xf32>
    %1297 = arith.maximumf %1241, %1293 : vector<8x128xf32>
    %1298 = math.absf %1294 : vector<8x128xf32>
    %cst = arith.constant 0.000000e+00 : f32
    %1299 = vector.broadcast %cst : f32 to vector<8x128xf32>
    %1300 = arith.cmpf olt, %1294, %1299 : vector<8x128xf32>
    %cst_16 = arith.constant -0.0012624911 : f32
    %1301 = vector.broadcast %cst_16 : f32 to vector<8x128xf32>
    %1302 = arith.mulf %1301, %1298 : vector<8x128xf32>
    %cst_17 = arith.constant 6.670090e-03 : f32
    %1303 = vector.broadcast %cst_17 : f32 to vector<8x128xf32>
    %1304 = arith.addf %1302, %1303 : vector<8x128xf32>
    %1305 = arith.mulf %1304, %1298 : vector<8x128xf32>
    %cst_18 = arith.constant -0.0170881264 : f32
    %1306 = vector.broadcast %cst_18 : f32 to vector<8x128xf32>
    %1307 = arith.addf %1305, %1306 : vector<8x128xf32>
    %1308 = arith.mulf %1307, %1298 : vector<8x128xf32>
    %cst_19 = arith.constant 0.0308918804 : f32
    %1309 = vector.broadcast %cst_19 : f32 to vector<8x128xf32>
    %1310 = arith.addf %1308, %1309 : vector<8x128xf32>
    %1311 = arith.mulf %1310, %1298 : vector<8x128xf32>
    %cst_20 = arith.constant -0.0501743034 : f32
    %1312 = vector.broadcast %cst_20 : f32 to vector<8x128xf32>
    %1313 = arith.addf %1311, %1312 : vector<8x128xf32>
    %1314 = arith.mulf %1313, %1298 : vector<8x128xf32>
    %cst_21 = arith.constant 0.0889789909 : f32
    %1315 = vector.broadcast %cst_21 : f32 to vector<8x128xf32>
    %1316 = arith.addf %1314, %1315 : vector<8x128xf32>
    %1317 = arith.mulf %1316, %1298 : vector<8x128xf32>
    %cst_22 = arith.constant -0.214598805 : f32
    %1318 = vector.broadcast %cst_22 : f32 to vector<8x128xf32>
    %1319 = arith.addf %1317, %1318 : vector<8x128xf32>
    %1320 = arith.mulf %1319, %1298 : vector<8x128xf32>
    %cst_23 = arith.constant 1.57079625 : f32
    %1321 = vector.broadcast %cst_23 : f32 to vector<8x128xf32>
    %1322 = arith.addf %1320, %1321 : vector<8x128xf32>
    %cst_24 = arith.constant 1.000000e+00 : f32
    %1323 = vector.broadcast %cst_24 : f32 to vector<8x128xf32>
    %1324 = arith.subf %1323, %1298 : vector<8x128xf32>
    %1325 = math.sqrt %1324 : vector<8x128xf32>
    %1326 = arith.mulf %1325, %1322 : vector<8x128xf32>
    %cst_25 = arith.constant 3.14159274 : f32
    %1327 = vector.broadcast %cst_25 : f32 to vector<8x128xf32>
    %1328 = arith.subf %1327, %1326 : vector<8x128xf32>
    %1329 = arith.select %1300, %1328, %1326 : vector<8x128xi1>, vector<8x128xf32>
    %cst_26 = arith.constant 2.000000e+00 : f32
    %1330 = vector.broadcast %cst_26 : f32 to vector<8x128xf32>
    %1331 = arith.mulf %1330, %1329 : vector<8x128xf32>
    %cst_27 = arith.constant 0.899999976 : f32
    %1332 = vector.broadcast %cst_27 : f32 to vector<8x128xf32>
    %1333 = arith.cmpf ogt, %1298, %1332 : vector<8x128xf32>
    %cst_28 = arith.constant 1.000000e+00 : f32
    %1334 = vector.broadcast %cst_28 : f32 to vector<8x128xf32>
    %1335 = arith.cmpf ole, %1298, %1334 : vector<8x128xf32>
    %1336 = arith.andi %1333, %1335 : vector<8x128xi1>
    %cst_29 = arith.constant -4.58831453 : f32
    %1337 = vector.broadcast %cst_29 : f32 to vector<8x128xf32>
    %1338 = arith.mulf %1337, %1294 : vector<8x128xf32>
    %cst_30 = arith.constant 5.03153706 : f32
    %cst_31 = arith.constant 1.25164843 : f32
    %1339 = vector.broadcast %cst_30 : f32 to vector<8x128xf32>
    %1340 = vector.broadcast %cst_31 : f32 to vector<8x128xf32>
    %1341 = arith.select %1300, %1339, %1340 : vector<8x128xi1>, vector<8x128xf32>
    %1342 = arith.addf %1338, %1341 : vector<8x128xf32>
    %1343 = arith.select %1336, %1342, %1331 : vector<8x128xi1>, vector<8x128xf32>
    %c0_32 = arith.constant 0 : index
    %1344 = arith.index_cast %1 : i32 to index
    %c0_33 = arith.constant 0 : index
    %1345 = vector.load %arg4[%c0_32, %1344, %c0_33] : memref<4x8x128xf32, #tpu.memory_space<vmem>>, vector<1x8x128xf32>
    %1346 = vector.shape_cast %1345 : vector<1x8x128xf32> to vector<8x128xf32>
    %1347 = vector.shape_cast %1343 : vector<8x128xf32> to vector<1x8x128xf32>
    tpu.vector_store %arg4[%c0_32, %1344, %c0_33], %1347 {strides = array<i32>} : memref<4x8x128xf32, #tpu.memory_space<vmem>>, vector<1x8x128xf32>,
    %1348 = math.absf %1295 : vector<8x128xf32>
    %cst_34 = arith.constant 0.000000e+00 : f32
    %1349 = vector.broadcast %cst_34 : f32 to vector<8x128xf32>
    %1350 = arith.cmpf olt, %1295, %1349 : vector<8x128xf32>
    %cst_35 = arith.constant -0.0012624911 : f32
    %1351 = vector.broadcast %cst_35 : f32 to vector<8x128xf32>
    %1352 = arith.mulf %1351, %1348 : vector<8x128xf32>
    %cst_36 = arith.constant 6.670090e-03 : f32
    %1353 = vector.broadcast %cst_36 : f32 to vector<8x128xf32>
    %1354 = arith.addf %1352, %1353 : vector<8x128xf32>
    %1355 = arith.mulf %1354, %1348 : vector<8x128xf32>
    %cst_37 = arith.constant -0.0170881264 : f32
    %1356 = vector.broadcast %cst_37 : f32 to vector<8x128xf32>
    %1357 = arith.addf %1355, %1356 : vector<8x128xf32>
    %1358 = arith.mulf %1357, %1348 : vector<8x128xf32>
    %cst_38 = arith.constant 0.0308918804 : f32
    %1359 = vector.broadcast %cst_38 : f32 to vector<8x128xf32>
    %1360 = arith.addf %1358, %1359 : vector<8x128xf32>
    %1361 = arith.mulf %1360, %1348 : vector<8x128xf32>
    %cst_39 = arith.constant -0.0501743034 : f32
    %1362 = vector.broadcast %cst_39 : f32 to vector<8x128xf32>
    %1363 = arith.addf %1361, %1362 : vector<8x128xf32>
    %1364 = arith.mulf %1363, %1348 : vector<8x128xf32>
    %cst_40 = arith.constant 0.0889789909 : f32
    %1365 = vector.broadcast %cst_40 : f32 to vector<8x128xf32>
    %1366 = arith.addf %1364, %1365 : vector<8x128xf32>
    %1367 = arith.mulf %1366, %1348 : vector<8x128xf32>
    %cst_41 = arith.constant -0.214598805 : f32
    %1368 = vector.broadcast %cst_41 : f32 to vector<8x128xf32>
    %1369 = arith.addf %1367, %1368 : vector<8x128xf32>
    %1370 = arith.mulf %1369, %1348 : vector<8x128xf32>
    %cst_42 = arith.constant 1.57079625 : f32
    %1371 = vector.broadcast %cst_42 : f32 to vector<8x128xf32>
    %1372 = arith.addf %1370, %1371 : vector<8x128xf32>
    %cst_43 = arith.constant 1.000000e+00 : f32
    %1373 = vector.broadcast %cst_43 : f32 to vector<8x128xf32>
    %1374 = arith.subf %1373, %1348 : vector<8x128xf32>
    %1375 = math.sqrt %1374 : vector<8x128xf32>
    %1376 = arith.mulf %1375, %1372 : vector<8x128xf32>
    %cst_44 = arith.constant 3.14159274 : f32
    %1377 = vector.broadcast %cst_44 : f32 to vector<8x128xf32>
    %1378 = arith.subf %1377, %1376 : vector<8x128xf32>
    %1379 = arith.select %1350, %1378, %1376 : vector<8x128xi1>, vector<8x128xf32>
    %cst_45 = arith.constant 2.000000e+00 : f32
    %1380 = vector.broadcast %cst_45 : f32 to vector<8x128xf32>
    %1381 = arith.mulf %1380, %1379 : vector<8x128xf32>
    %cst_46 = arith.constant 0.899999976 : f32
    %1382 = vector.broadcast %cst_46 : f32 to vector<8x128xf32>
    %1383 = arith.cmpf ogt, %1348, %1382 : vector<8x128xf32>
    %cst_47 = arith.constant 1.000000e+00 : f32
    %1384 = vector.broadcast %cst_47 : f32 to vector<8x128xf32>
    %1385 = arith.cmpf ole, %1348, %1384 : vector<8x128xf32>
    %1386 = arith.andi %1383, %1385 : vector<8x128xi1>
    %cst_48 = arith.constant -4.58831453 : f32
    %1387 = vector.broadcast %cst_48 : f32 to vector<8x128xf32>
    %1388 = arith.mulf %1387, %1295 : vector<8x128xf32>
    %cst_49 = arith.constant 5.03153706 : f32
    %cst_50 = arith.constant 1.25164843 : f32
    %1389 = vector.broadcast %cst_49 : f32 to vector<8x128xf32>
    %1390 = vector.broadcast %cst_50 : f32 to vector<8x128xf32>
    %1391 = arith.select %1350, %1389, %1390 : vector<8x128xi1>, vector<8x128xf32>
    %1392 = arith.addf %1388, %1391 : vector<8x128xf32>
    %1393 = arith.select %1386, %1392, %1381 : vector<8x128xi1>, vector<8x128xf32>
    %c1_51 = arith.constant 1 : index
    %1394 = arith.index_cast %1 : i32 to index
    %c0_52 = arith.constant 0 : index
    %1395 = vector.load %arg4[%c1_51, %1394, %c0_52] : memref<4x8x128xf32, #tpu.memory_space<vmem>>, vector<1x8x128xf32>
    %1396 = vector.shape_cast %1395 : vector<1x8x128xf32> to vector<8x128xf32>
    %1397 = vector.shape_cast %1393 : vector<8x128xf32> to vector<1x8x128xf32>
    tpu.vector_store %arg4[%c1_51, %1394, %c0_52], %1397 {strides = array<i32>} : memref<4x8x128xf32, #tpu.memory_space<vmem>>, vector<1x8x128xf32>,
    %1398 = math.absf %1296 : vector<8x128xf32>
    %cst_53 = arith.constant 0.000000e+00 : f32
    %1399 = vector.broadcast %cst_53 : f32 to vector<8x128xf32>
    %1400 = arith.cmpf olt, %1296, %1399 : vector<8x128xf32>
    %cst_54 = arith.constant -0.0012624911 : f32
    %1401 = vector.broadcast %cst_54 : f32 to vector<8x128xf32>
    %1402 = arith.mulf %1401, %1398 : vector<8x128xf32>
    %cst_55 = arith.constant 6.670090e-03 : f32
    %1403 = vector.broadcast %cst_55 : f32 to vector<8x128xf32>
    %1404 = arith.addf %1402, %1403 : vector<8x128xf32>
    %1405 = arith.mulf %1404, %1398 : vector<8x128xf32>
    %cst_56 = arith.constant -0.0170881264 : f32
    %1406 = vector.broadcast %cst_56 : f32 to vector<8x128xf32>
    %1407 = arith.addf %1405, %1406 : vector<8x128xf32>
    %1408 = arith.mulf %1407, %1398 : vector<8x128xf32>
    %cst_57 = arith.constant 0.0308918804 : f32
    %1409 = vector.broadcast %cst_57 : f32 to vector<8x128xf32>
    %1410 = arith.addf %1408, %1409 : vector<8x128xf32>
    %1411 = arith.mulf %1410, %1398 : vector<8x128xf32>
    %cst_58 = arith.constant -0.0501743034 : f32
    %1412 = vector.broadcast %cst_58 : f32 to vector<8x128xf32>
    %1413 = arith.addf %1411, %1412 : vector<8x128xf32>
    %1414 = arith.mulf %1413, %1398 : vector<8x128xf32>
    %cst_59 = arith.constant 0.0889789909 : f32
    %1415 = vector.broadcast %cst_59 : f32 to vector<8x128xf32>
    %1416 = arith.addf %1414, %1415 : vector<8x128xf32>
    %1417 = arith.mulf %1416, %1398 : vector<8x128xf32>
    %cst_60 = arith.constant -0.214598805 : f32
    %1418 = vector.broadcast %cst_60 : f32 to vector<8x128xf32>
    %1419 = arith.addf %1417, %1418 : vector<8x128xf32>
    %1420 = arith.mulf %1419, %1398 : vector<8x128xf32>
    %cst_61 = arith.constant 1.57079625 : f32
    %1421 = vector.broadcast %cst_61 : f32 to vector<8x128xf32>
    %1422 = arith.addf %1420, %1421 : vector<8x128xf32>
    %cst_62 = arith.constant 1.000000e+00 : f32
    %1423 = vector.broadcast %cst_62 : f32 to vector<8x128xf32>
    %1424 = arith.subf %1423, %1398 : vector<8x128xf32>
    %1425 = math.sqrt %1424 : vector<8x128xf32>
    %1426 = arith.mulf %1425, %1422 : vector<8x128xf32>
    %cst_63 = arith.constant 3.14159274 : f32
    %1427 = vector.broadcast %cst_63 : f32 to vector<8x128xf32>
    %1428 = arith.subf %1427, %1426 : vector<8x128xf32>
    %1429 = arith.select %1400, %1428, %1426 : vector<8x128xi1>, vector<8x128xf32>
    %cst_64 = arith.constant 2.000000e+00 : f32
    %1430 = vector.broadcast %cst_64 : f32 to vector<8x128xf32>
    %1431 = arith.mulf %1430, %1429 : vector<8x128xf32>
    %cst_65 = arith.constant 0.899999976 : f32
    %1432 = vector.broadcast %cst_65 : f32 to vector<8x128xf32>
    %1433 = arith.cmpf ogt, %1398, %1432 : vector<8x128xf32>
    %cst_66 = arith.constant 1.000000e+00 : f32
    %1434 = vector.broadcast %cst_66 : f32 to vector<8x128xf32>
    %1435 = arith.cmpf ole, %1398, %1434 : vector<8x128xf32>
    %1436 = arith.andi %1433, %1435 : vector<8x128xi1>
    %cst_67 = arith.constant -4.58831453 : f32
    %1437 = vector.broadcast %cst_67 : f32 to vector<8x128xf32>
    %1438 = arith.mulf %1437, %1296 : vector<8x128xf32>
    %cst_68 = arith.constant 5.03153706 : f32
    %cst_69 = arith.constant 1.25164843 : f32
    %1439 = vector.broadcast %cst_68 : f32 to vector<8x128xf32>
    %1440 = vector.broadcast %cst_69 : f32 to vector<8x128xf32>
    %1441 = arith.select %1400, %1439, %1440 : vector<8x128xi1>, vector<8x128xf32>
    %1442 = arith.addf %1438, %1441 : vector<8x128xf32>
    %1443 = arith.select %1436, %1442, %1431 : vector<8x128xi1>, vector<8x128xf32>
    %c2_70 = arith.constant 2 : index
    %1444 = arith.index_cast %1 : i32 to index
    %c0_71 = arith.constant 0 : index
    %1445 = vector.load %arg4[%c2_70, %1444, %c0_71] : memref<4x8x128xf32, #tpu.memory_space<vmem>>, vector<1x8x128xf32>
    %1446 = vector.shape_cast %1445 : vector<1x8x128xf32> to vector<8x128xf32>
    %1447 = vector.shape_cast %1443 : vector<8x128xf32> to vector<1x8x128xf32>
    tpu.vector_store %arg4[%c2_70, %1444, %c0_71], %1447 {strides = array<i32>} : memref<4x8x128xf32, #tpu.memory_space<vmem>>, vector<1x8x128xf32>,
    %1448 = math.absf %1297 : vector<8x128xf32>
    %cst_72 = arith.constant 0.000000e+00 : f32
    %1449 = vector.broadcast %cst_72 : f32 to vector<8x128xf32>
    %1450 = arith.cmpf olt, %1297, %1449 : vector<8x128xf32>
    %cst_73 = arith.constant -0.0012624911 : f32
    %1451 = vector.broadcast %cst_73 : f32 to vector<8x128xf32>
    %1452 = arith.mulf %1451, %1448 : vector<8x128xf32>
    %cst_74 = arith.constant 6.670090e-03 : f32
    %1453 = vector.broadcast %cst_74 : f32 to vector<8x128xf32>
    %1454 = arith.addf %1452, %1453 : vector<8x128xf32>
    %1455 = arith.mulf %1454, %1448 : vector<8x128xf32>
    %cst_75 = arith.constant -0.0170881264 : f32
    %1456 = vector.broadcast %cst_75 : f32 to vector<8x128xf32>
    %1457 = arith.addf %1455, %1456 : vector<8x128xf32>
    %1458 = arith.mulf %1457, %1448 : vector<8x128xf32>
    %cst_76 = arith.constant 0.0308918804 : f32
    %1459 = vector.broadcast %cst_76 : f32 to vector<8x128xf32>
    %1460 = arith.addf %1458, %1459 : vector<8x128xf32>
    %1461 = arith.mulf %1460, %1448 : vector<8x128xf32>
    %cst_77 = arith.constant -0.0501743034 : f32
    %1462 = vector.broadcast %cst_77 : f32 to vector<8x128xf32>
    %1463 = arith.addf %1461, %1462 : vector<8x128xf32>
    %1464 = arith.mulf %1463, %1448 : vector<8x128xf32>
    %cst_78 = arith.constant 0.0889789909 : f32
    %1465 = vector.broadcast %cst_78 : f32 to vector<8x128xf32>
    %1466 = arith.addf %1464, %1465 : vector<8x128xf32>
    %1467 = arith.mulf %1466, %1448 : vector<8x128xf32>
    %cst_79 = arith.constant -0.214598805 : f32
    %1468 = vector.broadcast %cst_79 : f32 to vector<8x128xf32>
    %1469 = arith.addf %1467, %1468 : vector<8x128xf32>
    %1470 = arith.mulf %1469, %1448 : vector<8x128xf32>
    %cst_80 = arith.constant 1.57079625 : f32
    %1471 = vector.broadcast %cst_80 : f32 to vector<8x128xf32>
    %1472 = arith.addf %1470, %1471 : vector<8x128xf32>
    %cst_81 = arith.constant 1.000000e+00 : f32
    %1473 = vector.broadcast %cst_81 : f32 to vector<8x128xf32>
    %1474 = arith.subf %1473, %1448 : vector<8x128xf32>
    %1475 = math.sqrt %1474 : vector<8x128xf32>
    %1476 = arith.mulf %1475, %1472 : vector<8x128xf32>
    %cst_82 = arith.constant 3.14159274 : f32
    %1477 = vector.broadcast %cst_82 : f32 to vector<8x128xf32>
    %1478 = arith.subf %1477, %1476 : vector<8x128xf32>
    %1479 = arith.select %1450, %1478, %1476 : vector<8x128xi1>, vector<8x128xf32>
    %cst_83 = arith.constant 2.000000e+00 : f32
    %1480 = vector.broadcast %cst_83 : f32 to vector<8x128xf32>
    %1481 = arith.mulf %1480, %1479 : vector<8x128xf32>
    %cst_84 = arith.constant 0.899999976 : f32
    %1482 = vector.broadcast %cst_84 : f32 to vector<8x128xf32>
    %1483 = arith.cmpf ogt, %1448, %1482 : vector<8x128xf32>
    %cst_85 = arith.constant 1.000000e+00 : f32
    %1484 = vector.broadcast %cst_85 : f32 to vector<8x128xf32>
    %1485 = arith.cmpf ole, %1448, %1484 : vector<8x128xf32>
    %1486 = arith.andi %1483, %1485 : vector<8x128xi1>
    %cst_86 = arith.constant -4.58831453 : f32
    %1487 = vector.broadcast %cst_86 : f32 to vector<8x128xf32>
    %1488 = arith.mulf %1487, %1297 : vector<8x128xf32>
    %cst_87 = arith.constant 5.03153706 : f32
    %cst_88 = arith.constant 1.25164843 : f32
    %1489 = vector.broadcast %cst_87 : f32 to vector<8x128xf32>
    %1490 = vector.broadcast %cst_88 : f32 to vector<8x128xf32>
    %1491 = arith.select %1450, %1489, %1490 : vector<8x128xi1>, vector<8x128xf32>
    %1492 = arith.addf %1488, %1491 : vector<8x128xf32>
    %1493 = arith.select %1486, %1492, %1481 : vector<8x128xi1>, vector<8x128xf32>
    %c3_89 = arith.constant 3 : index
    %1494 = arith.index_cast %1 : i32 to index
    %c0_90 = arith.constant 0 : index
    %1495 = vector.load %arg4[%c3_89, %1494, %c0_90] : memref<4x8x128xf32, #tpu.memory_space<vmem>>, vector<1x8x128xf32>
    %1496 = vector.shape_cast %1495 : vector<1x8x128xf32> to vector<8x128xf32>
    %1497 = vector.shape_cast %1493 : vector<8x128xf32> to vector<1x8x128xf32>
    tpu.vector_store %arg4[%c3_89, %1494, %c0_90], %1497 {strides = array<i32>} : memref<4x8x128xf32, #tpu.memory_space<vmem>>, vector<1x8x128xf32>,
    %c1_i32 = arith.constant 1 : i32
    return
  }
  func.func @transform_0(%arg0: i32) -> i32 {
    %c0_i32 = arith.constant 0 : i32
    %c0_i32_0 = arith.constant 0 : i32
    return %c0_i32 : i32
  }
  func.func @transform_1(%arg0: i32) -> (i32, i32, i32) {
    %c0_i32 = arith.constant 0 : i32
    %c0_i32_0 = arith.constant 0 : i32
    %c0_i32_1 = arith.constant 0 : i32
    return %c0_i32, %arg0, %c0_i32_0 : i32, i32, i32
  }
  func.func @transform_2(%arg0: i32) -> (i32, i32, i32) {
    %c0_i32 = arith.constant 0 : i32
    %c0_i32_0 = arith.constant 0 : i32
    %c0_i32_1 = arith.constant 0 : i32
    return %c0_i32, %arg0, %c0_i32_0 : i32, i32, i32
  }
  func.func @transform_3(%arg0: i32) -> (i32, i32, i32) {
    %c0_i32 = arith.constant 0 : i32
    %c0_i32_0 = arith.constant 0 : i32
    %c0_i32_1 = arith.constant 0 : i32
    return %c0_i32, %arg0, %c0_i32_0 : i32, i32, i32
  }
}

</mosaic_0001>

<bundles_post_ra>
// kernel: tpu_custom_call.1
= control target key start
LH: loop header
LB: loop body
LE: loop exit
PB: predicated region body
PF: predicated region fallthrough
CT: control target
= control target key end

     0   :  { %8 = vsyncpa [#allocation5], 0  ;;  %s2591_s0 = inlined_call_operand.hbm [shape: f32[96], index: 0, kind: input, shape index: {}]   ;;  %s2592_s1 = inlined_call_operand.hbm [shape: f32[4,8,128], index: 1, kind: input, shape index: {}]   ;;  %s2593_s2 = inlined_call_operand.hbm [shape: f32[4,8,128], index: 2, kind: input, shape index: {}]   ;;  %s2594_s3 = inlined_call_operand.hbm [shape: f32[4,8,128], index: 3, kind: output, shape index: {}]  }
   0x1   :  { %9 = vsyncpa [#allocation3], 0 }
   0x2   :  { %10 = vsyncpa [#allocation8], 0 }
   0x3   :  { %11 = vsyncpa [#allocation4], 0  ;;  %s1340_s14 = scalar_lea.hbm %s2591_s0, 16 }
   0x4   :  { %p1341_p0 = scmp.ne.s32.totalorder %s2591_s0, %s1340_s14  ;;  %p1344_p1 = scmp.lt.u32.totalorder %s1340_s14, %s2591_s0 }
   0x6   :  { %p1346_p2 = pnand %p1344_p1, %p1341_p0 }
   0x8   :  { %1349 = shalt.err (!%p1346_p2)
}
   0x9   :  { %s1424_s19 = smov [#allocation2]   ;;  %s1425_s22 = smov [#allocation6]  }
   0xa   :  { %19 = dma.hbm_to_smem %s2591_s0, 16, %s1424_s19, [#allocation5]  }
   0xb   :  { %s25_s23 = sshll.u32 %s1425_s22, 4  ;;  %s1350_s26 = scalar_lea.hbm %s2592_s1, 512  ;;  %s26_s23 = int_to_ptr.vmem [resolvable:$true] %s25_s23 }
   0xc   :  { %p1351_p3 = scmp.ne.s32.totalorder %s2592_s1, %s1350_s26  ;;  %p1354_p4 = scmp.lt.u32.totalorder %s1350_s26, %s2592_s1 }
   0xe   :  { %p1356_p5 = pnand %p1354_p4, %p1351_p3 }
  0x10   :  { %1359 = shalt.err (!%p1356_p5)
}
  0x11   :  { %s1360_s4 = scalar_lea.vmem %s26_s23, 512  ;;  %p1365_p7 = scmp.lt.s32.totalorder %s26_s23, %s26_s23 }
  0x12   :  { %p1361_p6 = scmp.ne.s32.totalorder %s26_s23, %s1360_s4  ;;  %p1366_p8 = scmp.lt.s32.totalorder %s1360_s4, %s1360_s4 }
  0x14   :  { %p1367_p9 = por %p1366_p8, %p1365_p7 }
  0x16   :  { %p1368_p10 = pnand %p1367_p9, %p1361_p6 }
  0x18   :  { %1371 = shalt.err (!%p1368_p10)
}
  0x19   :  { %s1426_s0 = smov 128   ;;  %s1427_s5 = smov 8  }
  0x1a   :  { %31 = dma.hbm_to_vmem [thread:$0]  %s2592_s1, 512, %s26_s23, [#allocation3], %s1426_s0, %s1426_s0, %s1427_s5  }
  0x1b   :  { %s1428_s8 = smov [#allocation7]   ;;  %s1372_s12 = scalar_lea.hbm %s2593_s2, 512 }
  0x1c   :  { %s37_s9 = sshll.u32 %s1428_s8, 4  ;;  %p1373_p11 = scmp.ne.s32.totalorder %s2593_s2, %s1372_s12  ;;  %s38_s9 = int_to_ptr.vmem [resolvable:$true] %s37_s9 }
  0x1d   :  { %p1376_p12 = scmp.lt.u32.totalorder %s1372_s12, %s2593_s2 }
  0x1f   :  { %p1378_p13 = pnand %p1376_p12, %p1373_p11 }
  0x21   :  { %1381 = shalt.err (!%p1378_p13)
}
  0x22   :  { %s1382_s17 = scalar_lea.vmem %s38_s9, 512  ;;  %p1387_p1 = scmp.lt.s32.totalorder %s38_s9, %s38_s9 }
  0x23   :  { %p1383_p0 = scmp.ne.s32.totalorder %s38_s9, %s1382_s17  ;;  %p1388_p2 = scmp.lt.s32.totalorder %s1382_s17, %s1382_s17 }
  0x25   :  { %p1389_p3 = por %p1388_p2, %p1387_p1 }
  0x27   :  { %p1390_p4 = pnand %p1389_p3, %p1383_p0 }
  0x29   :  { %1393 = shalt.err (!%p1390_p4)
}
  0x2a   :  { %43 = dma.hbm_to_vmem [thread:$0]  %s2593_s2, 512, %s38_s9, [#allocation8], %s1426_s0, %s1426_s0, %s1427_s5  }
  0x2b   :  { %1416 = dma.done.wait [#allocation5], 16  }
  0x2c   :  { %1417 = vsyncadd [#allocation5], 4294967280 }
  0x2d   :  { %1418 = dma.done.wait [#allocation3], 512  }
  0x2e   :  { %1419 = vsyncadd [#allocation3], 4294966784 }
  0x2f   :  { %1420 = dma.done.wait [#allocation8], 512  }
  0x30   :  { %1421 = vsyncadd [#allocation8], 4294966784 }
  0x31   :  { %53 = sfence }
  0x32   :  { %v54_v0 = vld [vmem:[#allocation7] sm:$0xff]  ;;  %v57_v1 = vld [vmem:[#allocation7 + $0x8] sm:$0xff]  ;;  %v60_v2 = vld [vmem:[#allocation7 + $0x10] sm:$0xff]  ;;  %s1493_s19 = sld [smem:[#allocation2]]  ;;  %s1495_s20 = sld [smem:[#allocation2 + $0x1]] }
  0x33   :  { %v63_v3 = vld [vmem:[#allocation7 + $0x18] sm:$0xff]  ;;  %v64_v4 = vld [vmem:[#allocation6] sm:$0xff]  ;;  %v66_v5 = vld [vmem:[#allocation6 + $0x8] sm:$0xff]  ;;  %s1231_s2 = sld [smem:[#allocation2 + $0x2]]  ;;  %s1232_s21 = sld [smem:[#allocation2 + $0x3]] }
  0x34   :  { %v68_v6 = vld [vmem:[#allocation6 + $0x10] sm:$0xff]  ;;  %v70_v7 = vld [vmem:[#allocation6 + $0x18] sm:$0xff]  ;;  %v71_v8 = vmul.f32 %v64_v4, %v54_v0  ;;  %v72_v9 = vmul.f32 %v66_v5, %v57_v1  ;;  %v78_v10 = vmul.f32 %v66_v5, %v54_v0  ;;  %v79_v11 = vmul.f32 %v64_v4, %v57_v1  ;;  %s1233_s22 = sld [smem:[#allocation2 + $0x4]]  ;;  %s1234_s23 = sld [smem:[#allocation2 + $0x5]] }
  0x35   :  { %v74_v12 = vmul.f32 %v68_v6, %v60_v2  ;;  %v76_v13 = vmul.f32 %v70_v7, %v63_v3  ;;  %v81_v14 = vmul.f32 %v70_v7, %v60_v2  ;;  %v83_v15 = vmul.f32 %v68_v6, %v63_v3  ;;  %s1235_s24 = sld [smem:[#allocation2 + $0x6]]  ;;  %s1236_s25 = sld [smem:[#allocation2 + $0x7]] }
  0x36   :  { %v73_v16 = vadd.f32 %v72_v9, %v71_v8  ;;  %v80_v17 = vsub.f32 %v78_v10, %v79_v11  ;;  %v85_v18 = vmul.f32 %v68_v6, %v54_v0  ;;  %v86_v19 = vmul.f32 %v70_v7, %v57_v1  ;;  %s1524_s26 = sld [smem:[#allocation2 + $0x8]]  ;;  %s1526_s27 = sld [smem:[#allocation2 + $0x9]] }
  0x37   :  { %v88_v20 = vmul.f32 %v64_v4, %v60_v2  ;;  %v90_v21 = vmul.f32 %v66_v5, %v63_v3  ;;  %v92_v22 = vmul.f32 %v70_v7, %v54_v0  ;;  %v93_v23 = vmul.f32 %v68_v6, %v57_v1  ;;  %s1534_s28 = sld [smem:[#allocation2 + $0xa]]  ;;  %s1539_s29 = sld [smem:[#allocation2 + $0xb]] }
  0x38   :  { %v75_v24 = vadd.f32 %v74_v12, %v73_v16  ;;  %v82_v25 = vsub.f32 %v80_v17, %v81_v14  ;;  %v87_v26 = vadd.f32 %v86_v19, %v85_v18  ;;  %v95_v27 = vmul.f32 %v66_v5, %v60_v2  ;;  %s1566_s30 = sld [smem:[#allocation2 + $0xc]]  ;;  %s1568_s4 = sld [smem:[#allocation2 + $0xd]] }
  0x39   :  { %v94_v28 = vsub.f32 %v92_v22, %v93_v23  ;;  %v97_v29 = vmul.f32 %v64_v4, %v63_v3  ;;  %v108_v33 = vstv %s1231_s2  ;;  %v103_v35 = vstv %s1493_s19  ;;  %s1578_s6 = sld [smem:[#allocation2 + $0xe]]  ;;  %s1587_s7 = sld [smem:[#allocation2 + $0xf]] }
  0x3a   :  { %v1497_v30 = vadd.f32 %v76_v13, %v75_v24  ;;  %v1499_v31 = vadd.f32 %v83_v15, %v82_v25  ;;  %v89_v32 = vsub.f32 %v87_v26, %v88_v20  ;;  %v105_v36 = vstv %s1495_s20  ;;  %s1613_s8 = sld [smem:[#allocation2 + $0x10]]  ;;  %s1615_s9 = sld [smem:[#allocation2 + $0x11]] }
  0x3b   :  { %v96_v34 = vadd.f32 %v95_v27, %v94_v28  ;;  %v111_v37 = vstv %s1232_s21  ;;  %v139_v56 = vstv %s1233_s22  ;;  %v141_v57 = vstv %s1234_s23  ;;  %s1624_s10 = sld [smem:[#allocation2 + $0x12]]  ;;  %s1629_s11 = sld [smem:[#allocation2 + $0x13]] }
  0x3c   :  { %v1503_v38 = vsub.f32 %v89_v32, %v90_v21  ;;  %v104_v39 = vmul.f32 %v103_v35, %v1497_v30  ;;  %v106_v40 = vmul.f32 %v105_v36, %v1499_v31  ;;  %v114_v41 = vmul.f32 %v105_v36, %v1497_v30  ;;  %s1645_s12 = sld [smem:[#allocation2 + $0x14]]  ;;  %s1647_s13 = sld [smem:[#allocation2 + $0x15]] }
  0x3d   :  { %v115_v42 = vmul.f32 %v103_v35, %v1499_v31  ;;  %v121_v43 = vmul.f32 %v108_v33, %v1497_v30  ;;  %v122_v44 = vmul.f32 %v111_v37, %v1499_v31  ;;  %v1511_v45 = vsub.f32 %v96_v34, %v97_v29  ;;  %s1660_s14 = sld [smem:[#allocation2 + $0x16]]  ;;  %s1666_s15 = sld [smem:[#allocation2 + $0x17]] }
  0x3e   :  { %v107_v46 = vsub.f32 %v104_v39, %v106_v40  ;;  %v109_v47 = vmul.f32 %v108_v33, %v1503_v38  ;;  %v117_v48 = vmul.f32 %v111_v37, %v1503_v38  ;;  %v124_v49 = vmul.f32 %v103_v35, %v1503_v38  ;;  %s1702_s16 = sld [smem:[#allocation2 + $0x18]]  ;;  %s1704_s17 = sld [smem:[#allocation2 + $0x19]] }
  0x3f   :  { %v116_v50 = vadd.f32 %v115_v42, %v114_v41  ;;  %v123_v51 = vsub.f32 %v121_v43, %v122_v44  ;;  %v128_v52 = vmul.f32 %v111_v37, %v1497_v30  ;;  %v129_v53 = vmul.f32 %v108_v33, %v1499_v31  ;;  %s1713_s1 = sld [smem:[#allocation2 + $0x1a]]  ;;  %s1718_s18 = sld [smem:[#allocation2 + $0x1b]] }
  0x40   :  { %v1519_v54 = vmul.f32 %v111_v37, %v1511_v45  ;;  %v1522_v55 = vmul.f32 %v108_v33, %v1511_v45  ;;  %v131_v59 = vmul.f32 %v105_v36, %v1503_v38  ;;  %v140_v60 = vmul.f32 %v139_v56, %v1497_v30  ;;  %s1733_s19 = sld [smem:[#allocation2 + $0x1c]]  ;;  %s1735_s20 = sld [smem:[#allocation2 + $0x1d]] }
  0x41   :  { %v130_v58 = vadd.f32 %v129_v53, %v128_v52  ;;  %v142_v61 = vmul.f32 %v141_v57, %v1499_v31  ;;  %v1531_v62 = vsub.f32 %v107_v46, %v109_v47  ;;  %v126_v63 = vmul.f32 %v105_v36, %v1511_v45  ;;  %s1746_s2 = sld [smem:[#allocation2 + $0x1e]]  ;;  %s1752_s21 = sld [smem:[#allocation2 + $0x1f]] }
  0x42   :  { %v144_v0 = vstv %s1235_s24  ;;  %v147_v1 = vstv %s1236_s25  ;;  %v1536_v2 = vadd.f32 %v117_v48, %v116_v50  ;;  %v125_v3 = vadd.f32 %v124_v49, %v123_v51  ;;  %s1782_s22 = sld [smem:[#allocation2 + $0x20]]  ;;  %s1784_s23 = sld [smem:[#allocation2 + $0x21]] }
  0x43   :  { %v143_v4 = vsub.f32 %v140_v60, %v142_v61  ;;  %v145_v5 = vmul.f32 %v144_v0, %v1503_v38  ;;  %v133_v6 = vmul.f32 %v103_v35, %v1511_v45  ;;  %v150_v7 = vmul.f32 %v141_v57, %v1497_v30  ;;  %s1793_s24 = sld [smem:[#allocation2 + $0x22]]  ;;  %s1798_s25 = sld [smem:[#allocation2 + $0x23]] }
  0x44   :  { %v151_v8 = vmul.f32 %v139_v56, %v1499_v31  ;;  %v153_v9 = vmul.f32 %v147_v1, %v1503_v38  ;;  %v132_v10 = vsub.f32 %v130_v58, %v131_v59  ;;  %v1546_v11 = vmul.f32 %v147_v1, %v1511_v45 }
  0x45   :  { %v157_v12 = vmul.f32 %v144_v0, %v1497_v30  ;;  %v158_v13 = vmul.f32 %v147_v1, %v1499_v31  ;;  %v1551_v15 = vmul.f32 %v144_v0, %v1511_v45  ;;  %v160_v16 = vmul.f32 %v139_v56, %v1503_v38 }
  0x46   :  { %v152_v14 = vadd.f32 %v151_v8, %v150_v7  ;;  %v164_v17 = vmul.f32 %v147_v1, %v1497_v30  ;;  %v1555_v18 = vsub.f32 %v143_v4, %v145_v5  ;;  %v165_v20 = vmul.f32 %v144_v0, %v1499_v31 }
  0x47   :  { %v159_v19 = vsub.f32 %v157_v12, %v158_v13  ;;  %v167_v21 = vmul.f32 %v141_v57, %v1503_v38  ;;  %v162_v23 = vmul.f32 %v141_v57, %v1511_v45  ;;  %v175_v24 = vstv %s1524_s26  ;;  %s1813_s26 = sld [smem:[#allocation2 + $0x24]] }
  0x48   :  { %v1559_v22 = vadd.f32 %v153_v9, %v152_v14  ;;  %v177_v25 = vstv %s1526_s27  ;;  %v166_v27 = vadd.f32 %v165_v20, %v164_v17  ;;  %v176_v28 = vmul.f32 %v175_v24, %v1497_v30  ;;  %s1815_s27 = sld [smem:[#allocation2 + $0x25]] }
  0x49   :  { %v161_v26 = vadd.f32 %v160_v16, %v159_v19  ;;  %v178_v29 = vmul.f32 %v177_v25, %v1499_v31  ;;  %v113_v32 = vsub.f32 %v1531_v62, %v1519_v54  ;;  %v180_v33 = vstv %s1534_s28  ;;  %s1826_s28 = sld [smem:[#allocation2 + $0x26]] }
  0x4a   :  { %v186_v34 = vmul.f32 %v177_v25, %v1497_v30  ;;  %v120_v35 = vsub.f32 %v1536_v2, %v1522_v55  ;;  %v168_v36 = vsub.f32 %v166_v27, %v167_v21  ;;  %v169_v37 = vmul.f32 %v139_v56, %v1511_v45 }
  0x4b   :  { %v183_v39 = vstv %s1539_s29  ;;  %v1580_v40 = vadd.f32 %v126_v63, %v125_v3  ;;  %v1582_v41 = vadd.f32 %v133_v6, %v132_v10  ;;  %v1584_v42 = vadd.f32 %v162_v23, %v161_v26  ;;  %s1832_s29 = sld [smem:[#allocation2 + $0x27]] }
  0x4c   :  { %v187_v43 = vmul.f32 %v175_v24, %v1499_v31  ;;  %v149_v44 = vsub.f32 %v1555_v18, %v1546_v11  ;;  %v156_v46 = vsub.f32 %v1559_v22, %v1551_v15  ;;  %v179_v47 = vsub.f32 %v176_v28, %v178_v29 }
  0x4d   :  { %v193_v48 = vmul.f32 %v180_v33, %v1497_v30  ;;  %v181_v49 = vmul.f32 %v180_v33, %v1503_v38  ;;  %v189_v51 = vmul.f32 %v183_v39, %v1503_v38  ;;  %v194_v52 = vmul.f32 %v183_v39, %v1499_v31 }
  0x4e   :  { %v188_v50 = vadd.f32 %v187_v43, %v186_v34  ;;  %v1597_v53 = vadd.f32 %v169_v37, %v168_v36  ;;  %v184_v56 = vmul.f32 %v183_v39, %v1511_v45  ;;  %v200_v57 = vmul.f32 %v183_v39, %v1497_v30 }
  0x4f   :  { %v201_v58 = vmul.f32 %v180_v33, %v1499_v31  ;;  %v209_v59 = vmax.f32 %v1580_v40, %v1584_v42  ;;  %v1605_v60 = vmul.f32 %v180_v33, %v1511_v45  ;;  %v195_v61 = vsub.f32 %v193_v48, %v194_v52 }
  0x50   :  { %v196_v63 = vmul.f32 %v175_v24, %v1503_v38  ;;  %v203_v1 = vmul.f32 %v177_v25, %v1503_v38  ;;  %v215_v3 = vstv %s1566_s30  ;;  %v217_v4 = vstv %s1568_s4  ;;  %s1862_s30 = sld [smem:[#allocation2 + $0x28]]  ;;  %s1864_s4 = sld [smem:[#allocation2 + $0x29]] }
  0x51   :  { %v202_v0 = vadd.f32 %v201_v58, %v200_v57  ;;  %v182_v5 = vsub.f32 %v179_v47, %v181_v49  ;;  %v190_v6 = vadd.f32 %v189_v51, %v188_v50  ;;  %v216_v7 = vmul.f32 %v215_v3, %v1497_v30 }
  0x52   :  { %v218_v8 = vmul.f32 %v217_v4, %v1499_v31  ;;  %v210_v9 = vmax.f32 %v1582_v41, %v1597_v53  ;;  %v198_v10 = vmul.f32 %v177_v25, %v1511_v45  ;;  %v220_v12 = vstv %s1578_s6  ;;  %s1873_s6 = sld [smem:[#allocation2 + $0x2a]] }
  0x53   :  { %v226_v13 = vmul.f32 %v217_v4, %v1497_v30  ;;  %v197_v14 = vadd.f32 %v196_v63, %v195_v61  ;;  %v221_v17 = vmul.f32 %v220_v12, %v1503_v38  ;;  %v223_v19 = vstv %s1587_s7  ;;  %s1878_s7 = sld [smem:[#allocation2 + $0x2b]] }
  0x54   :  { %v219_v16 = vsub.f32 %v216_v7, %v218_v8  ;;  %v204_v20 = vsub.f32 %v202_v0, %v203_v1  ;;  %v205_v21 = vmul.f32 %v175_v24, %v1511_v45  ;;  %v227_v23 = vmul.f32 %v215_v3, %v1499_v31 }
  0x55   :  { %v229_v26 = vmul.f32 %v223_v19, %v1503_v38  ;;  %v185_v25 = vsub.f32 %v182_v5, %v184_v56  ;;  %v192_v27 = vsub.f32 %v190_v6, %v1605_v60  ;;  %v224_v28 = vmul.f32 %v223_v19, %v1511_v45 }
  0x56   :  { %v233_v29 = vmul.f32 %v220_v12, %v1497_v30  ;;  %v222_v33 = vsub.f32 %v219_v16, %v221_v17  ;;  %v228_v34 = vadd.f32 %v227_v23, %v226_v13  ;;  %v234_v36 = vmul.f32 %v223_v19, %v1499_v31 }
  0x57   :  { %v236_v24 = vmul.f32 %v215_v3, %v1503_v38  ;;  %v199_v37 = vadd.f32 %v198_v10, %v197_v14  ;;  %v231_v39 = vmul.f32 %v220_v12, %v1511_v45  ;;  %v240_v40 = vmul.f32 %v223_v19, %v1497_v30 }
  0x58   :  { %v241_v41 = vmul.f32 %v220_v12, %v1499_v31  ;;  %v206_v42 = vadd.f32 %v205_v21, %v204_v20  ;;  %v230_v43 = vadd.f32 %v229_v26, %v228_v34  ;;  %v235_v47 = vsub.f32 %v233_v29, %v234_v36 }
  0x59   :  { %v243_v48 = vmul.f32 %v217_v4, %v1503_v38  ;;  %v238_v49 = vmul.f32 %v217_v4, %v1511_v45  ;;  %v255_v51 = vstv %s1613_s8  ;;  %v257_v52 = vstv %s1615_s9  ;;  %s1893_s8 = sld [smem:[#allocation2 + $0x2c]]  ;;  %s1895_s9 = sld [smem:[#allocation2 + $0x2d]] }
  0x5a   :  { %v242_v50 = vadd.f32 %v241_v41, %v240_v40  ;;  %v225_v53 = vsub.f32 %v222_v33, %v224_v28  ;;  %v237_v56 = vadd.f32 %v236_v24, %v235_v47  ;;  %v256_v57 = vmul.f32 %v255_v51, %v1497_v30 }
  0x5b   :  { %v258_v58 = vmul.f32 %v257_v52, %v1499_v31  ;;  %v1652_v60 = vmax.f32 %v113_v32, %v185_v25  ;;  %v232_v61 = vsub.f32 %v230_v43, %v231_v39  ;;  %v260_v63 = vstv %s1624_s10  ;;  %s1906_s10 = sld [smem:[#allocation2 + $0x2e]] }
  0x5c   :  { %v266_v0 = vmul.f32 %v257_v52, %v1497_v30  ;;  %v1656_v1 = vmax.f32 %v199_v37, %v209_v59  ;;  %v244_v4 = vsub.f32 %v242_v50, %v243_v48  ;;  %v245_v5 = vmul.f32 %v215_v3, %v1511_v45 }
  0x5d   :  { %v263_v6 = vstv %s1629_s11  ;;  %v1662_v7 = vadd.f32 %v238_v49, %v237_v56  ;;  %v259_v8 = vsub.f32 %v256_v57, %v258_v58  ;;  %v261_v10 = vmul.f32 %v260_v63, %v1503_v38  ;;  %s1912_s11 = sld [smem:[#allocation2 + $0x2f]] }
  0x5e   :  { %v267_v54 = vmul.f32 %v255_v51, %v1499_v31  ;;  %v1668_v62 = vmax.f32 %v206_v42, %v210_v9  ;;  %v1673_v32 = vmax.f32 %v120_v35, %v192_v27  ;;  %v1678_v59 = vmax.f32 %v149_v44, %v225_v53 }
  0x5f   :  { %v273_v3 = vmul.f32 %v260_v63, %v1497_v30  ;;  %v1684_v12 = vmax.f32 %v156_v46, %v232_v61  ;;  %v269_v13 = vmul.f32 %v263_v6, %v1503_v38  ;;  %v274_v55 = vmul.f32 %v263_v6, %v1499_v31 }
  0x60   :  { %v268_v9 = vadd.f32 %v267_v54, %v266_v0  ;;  %v1688_v2 = vadd.f32 %v245_v5, %v244_v4  ;;  %v264_v11 = vmul.f32 %v263_v6, %v1511_v45  ;;  %v280_v18 = vmul.f32 %v263_v6, %v1497_v30 }
  0x61   :  { %v281_v35 = vmul.f32 %v260_v63, %v1499_v31  ;;  %v289_v44 = vmax.f32 %v1662_v7, %v1656_v1  ;;  %v262_v15 = vsub.f32 %v259_v8, %v261_v10  ;;  %v275_v22 = vsub.f32 %v273_v3, %v274_v55 }
  0x62   :  { %v276_v46 = vmul.f32 %v255_v51, %v1503_v38  ;;  %v283_v16 = vmul.f32 %v257_v52, %v1503_v38  ;;  %v295_v17 = vstv %s1645_s12  ;;  %v297_v19 = vstv %s1647_s13  ;;  %s1942_s12 = sld [smem:[#allocation2 + $0x30]]  ;;  %s1944_s13 = sld [smem:[#allocation2 + $0x31]] }
  0x63   :  { %v282_v14 = vadd.f32 %v281_v35, %v280_v18  ;;  %v270_v20 = vadd.f32 %v269_v13, %v268_v9  ;;  %v271_v21 = vmul.f32 %v260_v63, %v1511_v45  ;;  %v296_v23 = vmul.f32 %v295_v17, %v1497_v30 }
  0x64   :  { %v298_v26 = vmul.f32 %v297_v19, %v1499_v31  ;;  %v290_v25 = vmax.f32 %v1688_v2, %v1668_v62  ;;  %v278_v27 = vmul.f32 %v257_v52, %v1511_v45  ;;  %v300_v28 = vstv %s1660_s14  ;;  %s1953_s14 = sld [smem:[#allocation2 + $0x32]] }
  0x65   :  { %v306_v29 = vmul.f32 %v297_v19, %v1497_v30  ;;  %v277_v33 = vadd.f32 %v276_v46, %v275_v22  ;;  %v301_v36 = vmul.f32 %v300_v28, %v1503_v38  ;;  %v303_v24 = vstv %s1666_s15  ;;  %s1958_s15 = sld [smem:[#allocation2 + $0x33]] }
  0x66   :  { %v299_v34 = vsub.f32 %v296_v23, %v298_v26  ;;  %v284_v37 = vsub.f32 %v282_v14, %v283_v16  ;;  %v285_v39 = vmul.f32 %v255_v51, %v1511_v45  ;;  %v307_v40 = vmul.f32 %v295_v17, %v1499_v31 }
  0x67   :  { %v309_v41 = vmul.f32 %v303_v24, %v1503_v38  ;;  %v265_v42 = vsub.f32 %v262_v15, %v264_v11  ;;  %v272_v43 = vsub.f32 %v270_v20, %v271_v21  ;;  %v304_v47 = vmul.f32 %v303_v24, %v1511_v45 }
  0x68   :  { %v313_v48 = vmul.f32 %v300_v28, %v1497_v30  ;;  %v302_v49 = vsub.f32 %v299_v34, %v301_v36  ;;  %v308_v50 = vadd.f32 %v307_v40, %v306_v29  ;;  %v314_v52 = vmul.f32 %v303_v24, %v1499_v31 }
  0x69   :  { %v316_v51 = vmul.f32 %v295_v17, %v1503_v38  ;;  %v279_v53 = vadd.f32 %v278_v27, %v277_v33  ;;  %v311_v56 = vmul.f32 %v300_v28, %v1511_v45  ;;  %v320_v57 = vmul.f32 %v303_v24, %v1497_v30 }
  0x6a   :  { %v321_v58 = vmul.f32 %v300_v28, %v1499_v31  ;;  %v286_v61 = vadd.f32 %v285_v39, %v284_v37  ;;  %v310_v63 = vadd.f32 %v309_v41, %v308_v50  ;;  %v315_v0 = vsub.f32 %v313_v48, %v314_v52 }
  0x6b   :  { %v323_v1 = vmul.f32 %v297_v19, %v1503_v38  ;;  %v318_v4 = vmul.f32 %v297_v19, %v1511_v45  ;;  %v335_v6 = vstv %s1702_s16  ;;  %v337_v7 = vstv %s1704_s17  ;;  %s1973_s16 = sld [smem:[#allocation2 + $0x34]]  ;;  %s1975_s17 = sld [smem:[#allocation2 + $0x35]] }
  0x6c   :  { %v322_v5 = vadd.f32 %v321_v58, %v320_v57  ;;  %v305_v8 = vsub.f32 %v302_v49, %v304_v47  ;;  %v317_v10 = vadd.f32 %v316_v51, %v315_v0  ;;  %v336_v54 = vmul.f32 %v335_v6, %v1497_v30 }
  0x6d   :  { %v338_v62 = vmul.f32 %v337_v7, %v1499_v31  ;;  %v1738_v3 = vmax.f32 %v1652_v60, %v265_v42  ;;  %v312_v9 = vsub.f32 %v310_v63, %v311_v56  ;;  %v340_v13 = vstv %s1713_s1  ;;  %s1986_s1 = sld [smem:[#allocation2 + $0x36]] }
  0x6e   :  { %v346_v55 = vmul.f32 %v337_v7, %v1497_v30  ;;  %v1742_v2 = vmax.f32 %v279_v53, %v289_v44  ;;  %v324_v11 = vsub.f32 %v322_v5, %v323_v1  ;;  %v325_v18 = vmul.f32 %v295_v17, %v1511_v45 }
  0x6f   :  { %v343_v35 = vstv %s1718_s18  ;;  %v1748_v15 = vadd.f32 %v318_v4, %v317_v10  ;;  %v339_v22 = vsub.f32 %v336_v54, %v338_v62  ;;  %v341_v46 = vmul.f32 %v340_v13, %v1503_v38  ;;  %s1992_s18 = sld [smem:[#allocation2 + $0x37]] }
  0x70   :  { %v347_v60 = vmul.f32 %v335_v6, %v1499_v31  ;;  %v1754_v14 = vmax.f32 %v286_v61, %v290_v25  ;;  %v1757_v44 = vmax.f32 %v1673_v32, %v272_v43  ;;  %v1760_v16 = vmax.f32 %v1678_v59, %v305_v8 }
  0x71   :  { %v353_v17 = vmul.f32 %v340_v13, %v1497_v30  ;;  %v1764_v19 = vmax.f32 %v1684_v12, %v312_v9  ;;  %v349_v21 = vmul.f32 %v343_v35, %v1503_v38  ;;  %v354_v23 = vmul.f32 %v343_v35, %v1499_v31 }
  0x72   :  { %v348_v20 = vadd.f32 %v347_v60, %v346_v55  ;;  %v1768_v26 = vadd.f32 %v325_v18, %v324_v11  ;;  %v344_v32 = vmul.f32 %v343_v35, %v1511_v45  ;;  %v360_v25 = vmul.f32 %v343_v35, %v1497_v30 }
  0x73   :  { %v361_v59 = vmul.f32 %v340_v13, %v1499_v31  ;;  %v369_v27 = vmax.f32 %v1748_v15, %v1742_v2  ;;  %v342_v28 = vsub.f32 %v339_v22, %v341_v46  ;;  %v355_v12 = vsub.f32 %v353_v17, %v354_v23 }
  0x74   :  { %v356_v29 = vmul.f32 %v335_v6, %v1503_v38  ;;  %v363_v34 = vmul.f32 %v337_v7, %v1503_v38  ;;  %v375_v36 = vstv %s1733_s19  ;;  %v377_v24 = vstv %s1735_s20  ;;  %s2022_s19 = sld [smem:[#allocation2 + $0x38]]  ;;  %s2024_s20 = sld [smem:[#allocation2 + $0x39]] }
  0x75   :  { %v362_v33 = vadd.f32 %v361_v59, %v360_v25  ;;  %v350_v37 = vadd.f32 %v349_v21, %v348_v20  ;;  %v351_v39 = vmul.f32 %v340_v13, %v1511_v45  ;;  %v376_v40 = vmul.f32 %v375_v36, %v1497_v30 }
  0x76   :  { %v378_v41 = vmul.f32 %v377_v24, %v1499_v31  ;;  %v370_v42 = vmax.f32 %v1768_v26, %v1754_v14  ;;  %v358_v43 = vmul.f32 %v337_v7, %v1511_v45  ;;  %v380_v47 = vstv %s1746_s2  ;;  %s2033_s2 = sld [smem:[#allocation2 + $0x3a]] }
  0x77   :  { %v386_v48 = vmul.f32 %v377_v24, %v1497_v30  ;;  %v357_v49 = vadd.f32 %v356_v29, %v355_v12  ;;  %v381_v52 = vmul.f32 %v380_v47, %v1503_v38  ;;  %v383_v51 = vstv %s1752_s21  ;;  %s2038_s21 = sld [smem:[#allocation2 + $0x3b]] }
  0x78   :  { %v379_v50 = vsub.f32 %v376_v40, %v378_v41  ;;  %v364_v53 = vsub.f32 %v362_v33, %v363_v34  ;;  %v365_v56 = vmul.f32 %v335_v6, %v1511_v45  ;;  %v387_v57 = vmul.f32 %v375_v36, %v1499_v31 }
  0x79   :  { %v389_v58 = vmul.f32 %v383_v51, %v1503_v38  ;;  %v345_v61 = vsub.f32 %v342_v28, %v344_v32  ;;  %v352_v63 = vsub.f32 %v350_v37, %v351_v39  ;;  %v384_v0 = vmul.f32 %v383_v51, %v1511_v45 }
  0x7a   :  { %v393_v1 = vmul.f32 %v380_v47, %v1497_v30  ;;  %v382_v4 = vsub.f32 %v379_v50, %v381_v52  ;;  %v388_v5 = vadd.f32 %v387_v57, %v386_v48  ;;  %v394_v7 = vmul.f32 %v383_v51, %v1499_v31 }
  0x7b   :  { %v396_v6 = vmul.f32 %v375_v36, %v1503_v38  ;;  %v359_v8 = vadd.f32 %v358_v43, %v357_v49  ;;  %v391_v10 = vmul.f32 %v380_v47, %v1511_v45  ;;  %v400_v54 = vmul.f32 %v383_v51, %v1497_v30 }
  0x7c   :  { %v401_v62 = vmul.f32 %v380_v47, %v1499_v31  ;;  %v366_v9 = vadd.f32 %v365_v56, %v364_v53  ;;  %v390_v13 = vadd.f32 %v389_v58, %v388_v5  ;;  %v395_v55 = vsub.f32 %v393_v1, %v394_v7 }
  0x7d   :  { %v403_v2 = vmul.f32 %v377_v24, %v1503_v38  ;;  %v398_v11 = vmul.f32 %v377_v24, %v1511_v45  ;;  %v415_v35 = vstv %s1782_s22  ;;  %v417_v15 = vstv %s1784_s23  ;;  %s2053_s22 = sld [smem:[#allocation2 + $0x3c]]  ;;  %s2055_s23 = sld [smem:[#allocation2 + $0x3d]] }
  0x7e   :  { %v402_v18 = vadd.f32 %v401_v62, %v400_v54  ;;  %v385_v22 = vsub.f32 %v382_v4, %v384_v0  ;;  %v397_v46 = vadd.f32 %v396_v6, %v395_v55  ;;  %v416_v60 = vmul.f32 %v415_v35, %v1497_v30 }
  0x7f   :  { %v418_v14 = vmul.f32 %v417_v15, %v1499_v31  ;;  %v1818_v17 = vmax.f32 %v1738_v3, %v345_v61  ;;  %v392_v20 = vsub.f32 %v390_v13, %v391_v10  ;;  %v420_v21 = vstv %s1793_s24  ;;  %s2066_s24 = sld [smem:[#allocation2 + $0x3e]] }
  0x80   :  { %v426_v23 = vmul.f32 %v417_v15, %v1497_v30  ;;  %v1822_v26 = vmax.f32 %v359_v8, %v369_v27  ;;  %v404_v32 = vsub.f32 %v402_v18, %v403_v2  ;;  %v405_v25 = vmul.f32 %v375_v36, %v1511_v45 }
  0x81   :  { %v423_v59 = vstv %s1798_s25  ;;  %v1828_v28 = vadd.f32 %v398_v11, %v397_v46  ;;  %v419_v12 = vsub.f32 %v416_v60, %v418_v14  ;;  %v421_v29 = vmul.f32 %v420_v21, %v1503_v38  ;;  %s2072_s25 = sld [smem:[#allocation2 + $0x3f]] }
  0x82   :  { %v427_v3 = vmul.f32 %v415_v35, %v1499_v31  ;;  %v1834_v33 = vmax.f32 %v366_v9, %v370_v42  ;;  %v1837_v27 = vmax.f32 %v1757_v44, %v352_v63  ;;  %v1840_v34 = vmax.f32 %v1760_v16, %v385_v22 }
  0x83   :  { %v433_v36 = vmul.f32 %v420_v21, %v1497_v30  ;;  %v1844_v24 = vmax.f32 %v1764_v19, %v392_v20  ;;  %v429_v39 = vmul.f32 %v423_v59, %v1503_v38  ;;  %v434_v40 = vmul.f32 %v423_v59, %v1499_v31 }
  0x84   :  { %v428_v37 = vadd.f32 %v427_v3, %v426_v23  ;;  %v1848_v41 = vadd.f32 %v405_v25, %v404_v32  ;;  %v424_v44 = vmul.f32 %v423_v59, %v1511_v45  ;;  %v440_v42 = vmul.f32 %v423_v59, %v1497_v30 }
  0x85   :  { %v441_v16 = vmul.f32 %v420_v21, %v1499_v31  ;;  %v449_v43 = vmax.f32 %v1828_v28, %v1822_v26  ;;  %v422_v47 = vsub.f32 %v419_v12, %v421_v29  ;;  %v435_v19 = vsub.f32 %v433_v36, %v434_v40 }
  0x86   :  { %v436_v48 = vmul.f32 %v415_v35, %v1503_v38  ;;  %v443_v50 = vmul.f32 %v417_v15, %v1503_v38  ;;  %v455_v52 = vstv %s1813_s26  ;;  %v457_v51 = vstv %s1815_s27  ;;  %s2102_s26 = sld [smem:[#allocation2 + $0x40]]  ;;  %s2104_s27 = sld [smem:[#allocation2 + $0x41]] }
  0x87   :  { %v442_v49 = vadd.f32 %v441_v16, %v440_v42  ;;  %v430_v53 = vadd.f32 %v429_v39, %v428_v37  ;;  %v431_v56 = vmul.f32 %v420_v21, %v1511_v45  ;;  %v456_v57 = vmul.f32 %v455_v52, %v1497_v30 }
  0x88   :  { %v458_v58 = vmul.f32 %v457_v51, %v1499_v31  ;;  %v450_v61 = vmax.f32 %v1848_v41, %v1834_v33  ;;  %v438_v63 = vmul.f32 %v417_v15, %v1511_v45  ;;  %v460_v0 = vstv %s1826_s28  ;;  %s2113_s28 = sld [smem:[#allocation2 + $0x42]] }
  0x89   :  { %v466_v1 = vmul.f32 %v457_v51, %v1497_v30  ;;  %v437_v4 = vadd.f32 %v436_v48, %v435_v19  ;;  %v461_v7 = vmul.f32 %v460_v0, %v1503_v38  ;;  %v463_v6 = vstv %s1832_s29  ;;  %s2118_s29 = sld [smem:[#allocation2 + $0x43]] }
  0x8a   :  { %v459_v5 = vsub.f32 %v456_v57, %v458_v58  ;;  %v444_v8 = vsub.f32 %v442_v49, %v443_v50  ;;  %v445_v10 = vmul.f32 %v415_v35, %v1511_v45  ;;  %v467_v54 = vmul.f32 %v455_v52, %v1499_v31 }
  0x8b   :  { %v469_v62 = vmul.f32 %v463_v6, %v1503_v38  ;;  %v425_v9 = vsub.f32 %v422_v47, %v424_v44  ;;  %v432_v13 = vsub.f32 %v430_v53, %v431_v56  ;;  %v464_v55 = vmul.f32 %v463_v6, %v1511_v45 }
  0x8c   :  { %v473_v2 = vmul.f32 %v460_v0, %v1497_v30  ;;  %v462_v11 = vsub.f32 %v459_v5, %v461_v7  ;;  %v468_v18 = vadd.f32 %v467_v54, %v466_v1  ;;  %v474_v15 = vmul.f32 %v463_v6, %v1499_v31 }
  0x8d   :  { %v476_v35 = vmul.f32 %v455_v52, %v1503_v38  ;;  %v439_v22 = vadd.f32 %v438_v63, %v437_v4  ;;  %v471_v46 = vmul.f32 %v460_v0, %v1511_v45  ;;  %v480_v60 = vmul.f32 %v463_v6, %v1497_v30 }
  0x8e   :  { %v481_v14 = vmul.f32 %v460_v0, %v1499_v31  ;;  %v446_v20 = vadd.f32 %v445_v10, %v444_v8  ;;  %v470_v21 = vadd.f32 %v469_v62, %v468_v18  ;;  %v475_v23 = vsub.f32 %v473_v2, %v474_v15 }
  0x8f   :  { %v483_v26 = vmul.f32 %v457_v51, %v1503_v38  ;;  %v478_v32 = vmul.f32 %v457_v51, %v1511_v45  ;;  %v495_v59 = vstv %s1862_s30  ;;  %v497_v28 = vstv %s1864_s4  ;;  %s2133_s30 = sld [smem:[#allocation2 + $0x44]]  ;;  %s2135_s4 = sld [smem:[#allocation2 + $0x45]] }
  0x90   :  { %v482_v25 = vadd.f32 %v481_v14, %v480_v60  ;;  %v465_v12 = vsub.f32 %v462_v11, %v464_v55  ;;  %v477_v29 = vadd.f32 %v476_v35, %v475_v23  ;;  %v496_v3 = vmul.f32 %v495_v59, %v1497_v30 }
  0x91   :  { %v498_v33 = vmul.f32 %v497_v28, %v1499_v31  ;;  %v1898_v36 = vmax.f32 %v1818_v17, %v425_v9  ;;  %v472_v37 = vsub.f32 %v470_v21, %v471_v46  ;;  %v500_v39 = vstv %s1873_s6  ;;  %s2146_s6 = sld [smem:[#allocation2 + $0x46]] }
  0x92   :  { %v506_v40 = vmul.f32 %v497_v28, %v1497_v30  ;;  %v1902_v41 = vmax.f32 %v439_v22, %v449_v43  ;;  %v484_v44 = vsub.f32 %v482_v25, %v483_v26  ;;  %v485_v42 = vmul.f32 %v455_v52, %v1511_v45 }
  0x93   :  { %v503_v16 = vstv %s1878_s7  ;;  %v1908_v47 = vadd.f32 %v478_v32, %v477_v29  ;;  %v499_v19 = vsub.f32 %v496_v3, %v498_v33  ;;  %v501_v48 = vmul.f32 %v500_v39, %v1503_v38  ;;  %s2152_s7 = sld [smem:[#allocation2 + $0x47]] }
  0x94   :  { %v507_v17 = vmul.f32 %v495_v59, %v1499_v31  ;;  %v1914_v49 = vmax.f32 %v446_v20, %v450_v61  ;;  %v1917_v43 = vmax.f32 %v1837_v27, %v432_v13  ;;  %v1920_v50 = vmax.f32 %v1840_v34, %v465_v12 }
  0x95   :  { %v513_v52 = vmul.f32 %v500_v39, %v1497_v30  ;;  %v1924_v51 = vmax.f32 %v1844_v24, %v472_v37  ;;  %v509_v56 = vmul.f32 %v503_v16, %v1503_v38  ;;  %v514_v57 = vmul.f32 %v503_v16, %v1499_v31 }
  0x96   :  { %v508_v53 = vadd.f32 %v507_v17, %v506_v40  ;;  %v1928_v58 = vadd.f32 %v485_v42, %v484_v44  ;;  %v504_v27 = vmul.f32 %v503_v16, %v1511_v45  ;;  %v520_v61 = vmul.f32 %v503_v16, %v1497_v30 }
  0x97   :  { %v521_v34 = vmul.f32 %v500_v39, %v1499_v31  ;;  %v529_v63 = vmax.f32 %v1908_v47, %v1902_v41  ;;  %v502_v0 = vsub.f32 %v499_v19, %v501_v48  ;;  %v515_v24 = vsub.f32 %v513_v52, %v514_v57 }
  0x98   :  { %v516_v1 = vmul.f32 %v495_v59, %v1503_v38  ;;  %v523_v5 = vmul.f32 %v497_v28, %v1503_v38  ;;  %v535_v7 = vstv %s1893_s8  ;;  %v537_v6 = vstv %s1895_s9  ;;  %s2182_s8 = sld [smem:[#allocation2 + $0x48]]  ;;  %s2184_s9 = sld [smem:[#allocation2 + $0x49]] }
  0x99   :  { %v522_v4 = vadd.f32 %v521_v34, %v520_v61  ;;  %v510_v8 = vadd.f32 %v509_v56, %v508_v53  ;;  %v511_v10 = vmul.f32 %v500_v39, %v1511_v45  ;;  %v536_v54 = vmul.f32 %v535_v7, %v1497_v30 }
  0x9a   :  { %v538_v62 = vmul.f32 %v537_v6, %v1499_v31  ;;  %v530_v9 = vmax.f32 %v1928_v58, %v1914_v49  ;;  %v518_v13 = vmul.f32 %v497_v28, %v1511_v45  ;;  %v540_v55 = vstv %s1906_s10  ;;  %s2193_s10 = sld [smem:[#allocation2 + $0x4a]] }
  0x9b   :  { %v546_v2 = vmul.f32 %v537_v6, %v1497_v30  ;;  %v517_v11 = vadd.f32 %v516_v1, %v515_v24  ;;  %v541_v15 = vmul.f32 %v540_v55, %v1503_v38  ;;  %v543_v35 = vstv %s1912_s11  ;;  %s2198_s11 = sld [smem:[#allocation2 + $0x4b]] }
  0x9c   :  { %v539_v18 = vsub.f32 %v536_v54, %v538_v62  ;;  %v524_v22 = vsub.f32 %v522_v4, %v523_v5  ;;  %v525_v46 = vmul.f32 %v495_v59, %v1511_v45  ;;  %v547_v60 = vmul.f32 %v535_v7, %v1499_v31 }
  0x9d   :  { %v549_v14 = vmul.f32 %v543_v35, %v1503_v38  ;;  %v505_v20 = vsub.f32 %v502_v0, %v504_v27  ;;  %v512_v21 = vsub.f32 %v510_v8, %v511_v10  ;;  %v544_v23 = vmul.f32 %v543_v35, %v1511_v45 }
  0x9e   :  { %v553_v26 = vmul.f32 %v540_v55, %v1497_v30  ;;  %v542_v32 = vsub.f32 %v539_v18, %v541_v15  ;;  %v548_v25 = vadd.f32 %v547_v60, %v546_v2  ;;  %v554_v28 = vmul.f32 %v543_v35, %v1499_v31 }
  0x9f   :  { %v556_v59 = vmul.f32 %v535_v7, %v1503_v38  ;;  %v519_v12 = vadd.f32 %v518_v13, %v517_v11  ;;  %v551_v29 = vmul.f32 %v540_v55, %v1511_v45  ;;  %v560_v3 = vmul.f32 %v543_v35, %v1497_v30 }
  0xa0   :  { %v561_v33 = vmul.f32 %v540_v55, %v1499_v31  ;;  %v526_v37 = vadd.f32 %v525_v46, %v524_v22  ;;  %v550_v39 = vadd.f32 %v549_v14, %v548_v25  ;;  %v555_v40 = vsub.f32 %v553_v26, %v554_v28 }
  0xa1   :  { %v563_v41 = vmul.f32 %v537_v6, %v1503_v38  ;;  %v558_v44 = vmul.f32 %v537_v6, %v1511_v45  ;;  %v575_v16 = vstv %s1942_s12  ;;  %v577_v47 = vstv %s1944_s13  ;;  %s2213_s12 = sld [smem:[#allocation2 + $0x4c]]  ;;  %s2215_s13 = sld [smem:[#allocation2 + $0x4d]] }
  0xa2   :  { %v562_v42 = vadd.f32 %v561_v33, %v560_v3  ;;  %v545_v19 = vsub.f32 %v542_v32, %v544_v23  ;;  %v557_v48 = vadd.f32 %v556_v59, %v555_v40  ;;  %v576_v17 = vmul.f32 %v575_v16, %v1497_v30 }
  0xa3   :  { %v578_v49 = vmul.f32 %v577_v47, %v1499_v31  ;;  %v1978_v52 = vmax.f32 %v1898_v36, %v505_v20  ;;  %v552_v53 = vsub.f32 %v550_v39, %v551_v29  ;;  %v580_v56 = vstv %s1953_s14  ;;  %s2226_s14 = sld [smem:[#allocation2 + $0x4e]] }
  0xa4   :  { %v586_v57 = vmul.f32 %v577_v47, %v1497_v30  ;;  %v1982_v58 = vmax.f32 %v519_v12, %v529_v63  ;;  %v564_v27 = vsub.f32 %v562_v42, %v563_v41  ;;  %v565_v61 = vmul.f32 %v535_v7, %v1511_v45 }
  0xa5   :  { %v583_v34 = vstv %s1958_s15  ;;  %v1988_v0 = vadd.f32 %v558_v44, %v557_v48  ;;  %v579_v24 = vsub.f32 %v576_v17, %v578_v49  ;;  %v581_v1 = vmul.f32 %v580_v56, %v1503_v38  ;;  %s2232_s15 = sld [smem:[#allocation2 + $0x4f]] }
  0xa6   :  { %v587_v36 = vmul.f32 %v575_v16, %v1499_v31  ;;  %v1994_v4 = vmax.f32 %v526_v37, %v530_v9  ;;  %v1997_v63 = vmax.f32 %v1917_v43, %v512_v21  ;;  %v2000_v5 = vmax.f32 %v1920_v50, %v545_v19 }
  0xa7   :  { %v593_v7 = vmul.f32 %v580_v56, %v1497_v30  ;;  %v2004_v6 = vmax.f32 %v1924_v51, %v552_v53  ;;  %v589_v10 = vmul.f32 %v583_v34, %v1503_v38  ;;  %v594_v54 = vmul.f32 %v583_v34, %v1499_v31 }
  0xa8   :  { %v588_v8 = vadd.f32 %v587_v36, %v586_v57  ;;  %v2008_v62 = vadd.f32 %v565_v61, %v564_v27  ;;  %v584_v43 = vmul.f32 %v583_v34, %v1511_v45  ;;  %v600_v9 = vmul.f32 %v583_v34, %v1497_v30 }
  0xa9   :  { %v601_v50 = vmul.f32 %v580_v56, %v1499_v31  ;;  %v609_v13 = vmax.f32 %v1988_v0, %v1982_v58  ;;  %v582_v55 = vsub.f32 %v579_v24, %v581_v1  ;;  %v595_v51 = vsub.f32 %v593_v7, %v594_v54 }
  0xaa   :  { %v596_v2 = vmul.f32 %v575_v16, %v1503_v38  ;;  %v603_v18 = vmul.f32 %v577_v47, %v1503_v38  ;;  %v615_v15 = vstv %s1973_s16  ;;  %v617_v35 = vstv %s1975_s17  ;;  %s2264_s16 = sld [smem:[#allocation2 + $0x50]]  ;;  %s2266_s17 = sld [smem:[#allocation2 + $0x51]] }
  0xab   :  { %v602_v11 = vadd.f32 %v601_v50, %v600_v9  ;;  %v590_v22 = vadd.f32 %v589_v10, %v588_v8  ;;  %v591_v46 = vmul.f32 %v580_v56, %v1511_v45  ;;  %v616_v60 = vmul.f32 %v615_v15, %v1497_v30 }
  0xac   :  { %v618_v14 = vmul.f32 %v617_v35, %v1499_v31  ;;  %v610_v20 = vmax.f32 %v2008_v62, %v1994_v4  ;;  %v598_v21 = vmul.f32 %v577_v47, %v1511_v45  ;;  %v620_v23 = vstv %s1986_s1  ;;  %s2275_s1 = sld [smem:[#allocation2 + $0x52]] }
  0xad   :  { %v626_v26 = vmul.f32 %v617_v35, %v1497_v30  ;;  %v597_v32 = vadd.f32 %v596_v2, %v595_v51  ;;  %v621_v28 = vmul.f32 %v620_v23, %v1503_v38  ;;  %v623_v59 = vstv %s1992_s18  ;;  %s2280_s18 = sld [smem:[#allocation2 + $0x53]] }
  0xae   :  { %v619_v25 = vsub.f32 %v616_v60, %v618_v14  ;;  %v604_v12 = vsub.f32 %v602_v11, %v603_v18  ;;  %v605_v29 = vmul.f32 %v575_v16, %v1511_v45  ;;  %v627_v3 = vmul.f32 %v615_v15, %v1499_v31 }
  0xaf   :  { %v629_v33 = vmul.f32 %v623_v59, %v1503_v38  ;;  %v585_v37 = vsub.f32 %v582_v55, %v584_v43  ;;  %v592_v39 = vsub.f32 %v590_v22, %v591_v46  ;;  %v624_v40 = vmul.f32 %v623_v59, %v1511_v45 }
  0xb0   :  { %v633_v41 = vmul.f32 %v620_v23, %v1497_v30  ;;  %v622_v44 = vsub.f32 %v619_v25, %v621_v28  ;;  %v628_v42 = vadd.f32 %v627_v3, %v626_v26  ;;  %v634_v47 = vmul.f32 %v623_v59, %v1499_v31 }
  0xb1   :  { %v636_v16 = vmul.f32 %v615_v15, %v1503_v38  ;;  %v599_v19 = vadd.f32 %v598_v21, %v597_v32  ;;  %v631_v48 = vmul.f32 %v620_v23, %v1511_v45  ;;  %v640_v17 = vmul.f32 %v623_v59, %v1497_v30 }
  0xb2   :  { %v641_v49 = vmul.f32 %v620_v23, %v1499_v31  ;;  %v606_v53 = vadd.f32 %v605_v29, %v604_v12  ;;  %v630_v56 = vadd.f32 %v629_v33, %v628_v42  ;;  %v635_v57 = vsub.f32 %v633_v41, %v634_v47 }
  0xb3   :  { %v643_v58 = vmul.f32 %v617_v35, %v1503_v38  ;;  %v638_v27 = vmul.f32 %v617_v35, %v1511_v45  ;;  %v655_v34 = vstv %s2022_s19  ;;  %v657_v0 = vstv %s2024_s20  ;;  %s2296_s19 = sld [smem:[#allocation2 + $0x54]]  ;;  %s2298_s20 = sld [smem:[#allocation2 + $0x55]] }
  0xb4   :  { %v642_v61 = vadd.f32 %v641_v49, %v640_v17  ;;  %v625_v24 = vsub.f32 %v622_v44, %v624_v40  ;;  %v637_v1 = vadd.f32 %v636_v16, %v635_v57  ;;  %v656_v36 = vmul.f32 %v655_v34, %v1497_v30 }
  0xb5   :  { %v658_v4 = vmul.f32 %v657_v0, %v1499_v31  ;;  %v2058_v7 = vmax.f32 %v1978_v52, %v585_v37  ;;  %v632_v8 = vsub.f32 %v630_v56, %v631_v48  ;;  %v660_v10 = vstv %s2033_s2  ;;  %s2309_s2 = sld [smem:[#allocation2 + $0x56]] }
  0xb6   :  { %v666_v54 = vmul.f32 %v657_v0, %v1497_v30  ;;  %v2062_v62 = vmax.f32 %v599_v19, %v609_v13  ;;  %v644_v43 = vsub.f32 %v642_v61, %v643_v58  ;;  %v645_v9 = vmul.f32 %v615_v15, %v1511_v45 }
  0xb7   :  { %v663_v50 = vstv %s2038_s21  ;;  %v2068_v55 = vadd.f32 %v638_v27, %v637_v1  ;;  %v659_v51 = vsub.f32 %v656_v36, %v658_v4  ;;  %v661_v2 = vmul.f32 %v660_v10, %v1503_v38  ;;  %s2315_s21 = sld [smem:[#allocation2 + $0x57]] }
  0xb8   :  { %v667_v52 = vmul.f32 %v655_v34, %v1499_v31  ;;  %v2074_v11 = vmax.f32 %v606_v53, %v610_v20  ;;  %v2077_v13 = vmax.f32 %v1997_v63, %v592_v39  ;;  %v2080_v18 = vmax.f32 %v2000_v5, %v625_v24 }
  0xb9   :  { %v673_v15 = vmul.f32 %v660_v10, %v1497_v30  ;;  %v2084_v35 = vmax.f32 %v2004_v6, %v632_v8  ;;  %v669_v46 = vmul.f32 %v663_v50, %v1503_v38  ;;  %v674_v60 = vmul.f32 %v663_v50, %v1499_v31 }
  0xba   :  { %v668_v22 = vadd.f32 %v667_v52, %v666_v54  ;;  %v2088_v14 = vadd.f32 %v645_v9, %v644_v43  ;;  %v664_v63 = vmul.f32 %v663_v50, %v1511_v45  ;;  %v680_v20 = vmul.f32 %v663_v50, %v1497_v30 }
  0xbb   :  { %v681_v5 = vmul.f32 %v660_v10, %v1499_v31  ;;  %v689_v21 = vmax.f32 %v2068_v55, %v2062_v62  ;;  %v662_v23 = vsub.f32 %v659_v51, %v661_v2  ;;  %v675_v6 = vsub.f32 %v673_v15, %v674_v60 }
  0xbc   :  { %v676_v26 = vmul.f32 %v655_v34, %v1503_v38  ;;  %v683_v25 = vmul.f32 %v657_v0, %v1503_v38  ;;  %v695_v28 = vstv %s2053_s22  ;;  %v697_v59 = vstv %s2055_s23  ;;  %s2350_s22 = sld [smem:[#allocation2 + $0x58]]  ;;  %s2352_s23 = sld [smem:[#allocation2 + $0x59]] }
  0xbd   :  { %v682_v32 = vadd.f32 %v681_v5, %v680_v20  ;;  %v670_v12 = vadd.f32 %v669_v46, %v668_v22  ;;  %v671_v29 = vmul.f32 %v660_v10, %v1511_v45  ;;  %v696_v3 = vmul.f32 %v695_v28, %v1497_v30 }
  0xbe   :  { %v698_v33 = vmul.f32 %v697_v59, %v1499_v31  ;;  %v690_v37 = vmax.f32 %v2088_v14, %v2074_v11  ;;  %v678_v39 = vmul.f32 %v657_v0, %v1511_v45  ;;  %v700_v40 = vstv %s2066_s24  ;;  %s2360_s24 = sld [smem:[#allocation2 + $0x5a]] }
  0xbf   :  { %v706_v41 = vmul.f32 %v697_v59, %v1497_v30  ;;  %v677_v44 = vadd.f32 %v676_v26, %v675_v6  ;;  %v701_v47 = vmul.f32 %v700_v40, %v1503_v38  ;;  %v703_v16 = vstv %s2072_s25  ;;  %s2365_s25 = sld [smem:[#allocation2 + $0x5b]] }
  0xc0   :  { %v699_v42 = vsub.f32 %v696_v3, %v698_v33  ;;  %v684_v19 = vsub.f32 %v682_v32, %v683_v25  ;;  %v685_v48 = vmul.f32 %v655_v34, %v1511_v45  ;;  %v707_v17 = vmul.f32 %v695_v28, %v1499_v31 }
  0xc1   :  { %v709_v49 = vmul.f32 %v703_v16, %v1503_v38  ;;  %v665_v53 = vsub.f32 %v662_v23, %v664_v63  ;;  %v672_v56 = vsub.f32 %v670_v12, %v671_v29  ;;  %v704_v57 = vmul.f32 %v703_v16, %v1511_v45 }
  0xc2   :  { %v713_v58 = vmul.f32 %v700_v40, %v1497_v30  ;;  %v702_v27 = vsub.f32 %v699_v42, %v701_v47  ;;  %v708_v61 = vadd.f32 %v707_v17, %v706_v41  ;;  %v714_v0 = vmul.f32 %v703_v16, %v1499_v31 }
  0xc3   :  { %v716_v34 = vmul.f32 %v695_v28, %v1503_v38  ;;  %v679_v24 = vadd.f32 %v678_v39, %v677_v44  ;;  %v711_v1 = vmul.f32 %v700_v40, %v1511_v45  ;;  %v720_v36 = vmul.f32 %v703_v16, %v1497_v30 }
  0xc4   :  { %v721_v4 = vmul.f32 %v700_v40, %v1499_v31  ;;  %v686_v8 = vadd.f32 %v685_v48, %v684_v19  ;;  %v710_v10 = vadd.f32 %v709_v49, %v708_v61  ;;  %v715_v54 = vsub.f32 %v713_v58, %v714_v0 }
  0xc5   :  { %v723_v62 = vmul.f32 %v697_v59, %v1503_v38  ;;  %v718_v43 = vmul.f32 %v697_v59, %v1511_v45  ;;  %v735_v50 = vstv %s2102_s26  ;;  %v737_v55 = vstv %s2104_s27  ;;  %s2383_s26 = sld [smem:[#allocation2 + $0x5c]]  ;;  %s2385_s27 = sld [smem:[#allocation2 + $0x5d]] }
  0xc6   :  { %v722_v9 = vadd.f32 %v721_v4, %v720_v36  ;;  %v705_v51 = vsub.f32 %v702_v27, %v704_v57  ;;  %v717_v2 = vadd.f32 %v716_v34, %v715_v54  ;;  %v736_v52 = vmul.f32 %v735_v50, %v1497_v30 }
  0xc7   :  { %v738_v11 = vmul.f32 %v737_v55, %v1499_v31  ;;  %v2138_v15 = vmax.f32 %v2058_v7, %v665_v53  ;;  %v712_v22 = vsub.f32 %v710_v10, %v711_v1  ;;  %v740_v46 = vstv %s2113_s28  ;;  %s1323_s28 = sld [smem:[#allocation2 + $0x5e]] }
  0xc8   :  { %v746_v60 = vmul.f32 %v737_v55, %v1497_v30  ;;  %v2142_v14 = vmax.f32 %v679_v24, %v689_v21  ;;  %v724_v63 = vsub.f32 %v722_v9, %v723_v62  ;;  %v725_v20 = vmul.f32 %v695_v28, %v1511_v45 }
  0xc9   :  { %v743_v5 = vstv %s2118_s29  ;;  %v2148_v23 = vadd.f32 %v718_v43, %v717_v2  ;;  %v739_v6 = vsub.f32 %v736_v52, %v738_v11  ;;  %v741_v26 = vmul.f32 %v740_v46, %v1503_v38  ;;  %s1324_s29 = sld [smem:[#allocation2 + $0x5f]] }
  0xca   :  { %v747_v7 = vmul.f32 %v735_v50, %v1499_v31  ;;  %v2154_v32 = vmax.f32 %v686_v8, %v690_v37  ;;  %v2157_v21 = vmax.f32 %v2077_v13, %v672_v56  ;;  %v2160_v25 = vmax.f32 %v2080_v18, %v705_v51 }
  0xcb   :  { %v753_v28 = vmul.f32 %v740_v46, %v1497_v30  ;;  %v2164_v59 = vmax.f32 %v2084_v35, %v712_v22  ;;  %v749_v29 = vmul.f32 %v743_v5, %v1503_v38  ;;  %v754_v3 = vmul.f32 %v743_v5, %v1499_v31 }
  0xcc   :  { %v748_v12 = vadd.f32 %v747_v7, %v746_v60  ;;  %v2168_v33 = vadd.f32 %v725_v20, %v724_v63  ;;  %v744_v13 = vmul.f32 %v743_v5, %v1511_v45  ;;  %v760_v37 = vmul.f32 %v743_v5, %v1497_v30 }
  0xcd   :  { %v761_v18 = vmul.f32 %v740_v46, %v1499_v31  ;;  %v769_v39 = vmax.f32 %v2148_v23, %v2142_v14  ;;  %v742_v40 = vsub.f32 %v739_v6, %v741_v26  ;;  %v755_v35 = vsub.f32 %v753_v28, %v754_v3 }
  0xce   :  { %v756_v41 = vmul.f32 %v735_v50, %v1503_v38  ;;  %v763_v42 = vmul.f32 %v737_v55, %v1503_v38  ;;  %v775_v47 = vstv %s2133_s30  ;;  %v777_v16 = vstv %s2135_s4  ;;  %s1430_s30 = smov [#allocation9]  }
  0xcf   :  { %v762_v44 = vadd.f32 %v761_v18, %v760_v37  ;;  %v750_v19 = vadd.f32 %v749_v29, %v748_v12  ;;  %v751_v48 = vmul.f32 %v740_v46, %v1511_v45  ;;  %v776_v17 = vmul.f32 %v775_v47, %v1497_v30  ;;  %s1207_s4 = sshll.u32 %s1430_s30, 4  ;;  %s1208_s4 = int_to_ptr.vmem [resolvable:$true] %s1207_s4 }
  0xd0   :  { %v778_v49 = vmul.f32 %v777_v16, %v1499_v31  ;;  %v770_v53 = vmax.f32 %v2168_v33, %v2154_v32  ;;  %v758_v56 = vmul.f32 %v737_v55, %v1511_v45  ;;  %v780_v57 = vstv %s2146_s6  ;;  %s1394_s6 = scalar_lea.vmem %s1208_s4, 512  ;;  %p1399_p6 = scmp.lt.s32.totalorder %s1208_s4, %s1208_s4 }
  0xd1   :  { %v786_v58 = vmul.f32 %v777_v16, %v1497_v30  ;;  %v757_v27 = vadd.f32 %v756_v41, %v755_v35  ;;  %v781_v0 = vmul.f32 %v780_v57, %v1503_v38  ;;  %v783_v34 = vstv %s2152_s7  ;;  %p1395_p5 = scmp.ne.s32.totalorder %s1208_s4, %s1394_s6  ;;  %p1400_p7 = scmp.lt.s32.totalorder %s1394_s6, %s1394_s6 }
  0xd2   :  { %v779_v61 = vsub.f32 %v776_v17, %v778_v49  ;;  %v764_v24 = vsub.f32 %v762_v44, %v763_v42  ;;  %v765_v1 = vmul.f32 %v735_v50, %v1511_v45  ;;  %v787_v36 = vmul.f32 %v775_v47, %v1499_v31 }
  0xd3   :  { %v789_v4 = vmul.f32 %v783_v34, %v1503_v38  ;;  %v745_v8 = vsub.f32 %v742_v40, %v744_v13  ;;  %v752_v10 = vsub.f32 %v750_v19, %v751_v48  ;;  %v784_v54 = vmul.f32 %v783_v34, %v1511_v45  ;;  %p1401_p8 = por %p1400_p7, %p1399_p6 }
  0xd4   :  { %v793_v62 = vmul.f32 %v780_v57, %v1497_v30  ;;  %v782_v43 = vsub.f32 %v779_v61, %v781_v0  ;;  %v788_v9 = vadd.f32 %v787_v36, %v786_v58  ;;  %v794_v55 = vmul.f32 %v783_v34, %v1499_v31 }
  0xd5   :  { %v796_v50 = vmul.f32 %v775_v47, %v1503_v38  ;;  %v759_v51 = vadd.f32 %v758_v56, %v757_v27  ;;  %v791_v2 = vmul.f32 %v780_v57, %v1511_v45  ;;  %v800_v52 = vmul.f32 %v783_v34, %v1497_v30  ;;  %p1402_p9 = pnand %p1401_p8, %p1395_p5 }
  0xd6   :  { %v801_v11 = vmul.f32 %v780_v57, %v1499_v31  ;;  %v766_v22 = vadd.f32 %v765_v1, %v764_v24  ;;  %v790_v46 = vadd.f32 %v789_v4, %v788_v9  ;;  %v795_v60 = vsub.f32 %v793_v62, %v794_v55 }
  0xd7   :  { %v803_v14 = vmul.f32 %v777_v16, %v1503_v38  ;;  %v798_v63 = vmul.f32 %v777_v16, %v1511_v45  ;;  %v815_v5 = vstv %s2182_s8  ;;  %v817_v23 = vstv %s2184_s9 }
  0xd8   :  { %v802_v20 = vadd.f32 %v801_v11, %v800_v52  ;;  %v785_v6 = vsub.f32 %v782_v43, %v784_v54  ;;  %v797_v26 = vadd.f32 %v796_v50, %v795_v60  ;;  %v816_v7 = vmul.f32 %v815_v5, %v1497_v30 }
  0xd9   :  { %v818_v32 = vmul.f32 %v817_v23, %v1499_v31  ;;  %v2218_v28 = vmax.f32 %v2138_v15, %v745_v8  ;;  %v792_v12 = vsub.f32 %v790_v46, %v791_v2  ;;  %v820_v29 = vstv %s2193_s10 }
  0xda   :  { %v826_v3 = vmul.f32 %v817_v23, %v1497_v30  ;;  %v2222_v33 = vmax.f32 %v759_v51, %v769_v39  ;;  %v804_v13 = vsub.f32 %v802_v20, %v803_v14  ;;  %v805_v37 = vmul.f32 %v775_v47, %v1511_v45 }
  0xdb   :  { %v823_v18 = vstv %s2198_s11  ;;  %v2228_v40 = vadd.f32 %v798_v63, %v797_v26  ;;  %v819_v35 = vsub.f32 %v816_v7, %v818_v32  ;;  %v821_v41 = vmul.f32 %v820_v29, %v1503_v38 }
  0xdc   :  { %v827_v15 = vmul.f32 %v815_v5, %v1499_v31  ;;  %v2234_v44 = vmax.f32 %v766_v22, %v770_v53  ;;  %v2237_v39 = vmax.f32 %v2157_v21, %v752_v10  ;;  %v2240_v42 = vmax.f32 %v2160_v25, %v785_v6 }
  0xdd   :  { %v833_v47 = vmul.f32 %v820_v29, %v1497_v30  ;;  %v2244_v16 = vmax.f32 %v2164_v59, %v792_v12  ;;  %v829_v48 = vmul.f32 %v823_v18, %v1503_v38  ;;  %v834_v17 = vmul.f32 %v823_v18, %v1499_v31 }
  0xde   :  { %v828_v19 = vadd.f32 %v827_v15, %v826_v3  ;;  %v2248_v49 = vadd.f32 %v805_v37, %v804_v13  ;;  %v2251_v21 = vmul.f32 %v823_v18, %v1511_v45  ;;  %v840_v25 = vmul.f32 %v823_v18, %v1497_v30 }
  0xdf   :  { %v841_v53 = vmul.f32 %v820_v29, %v1499_v31  ;;  %v849_v56 = vmax.f32 %v2228_v40, %v2222_v33  ;;  %v822_v59 = vsub.f32 %v819_v35, %v821_v41  ;;  %v835_v57 = vsub.f32 %v833_v47, %v834_v17 }
  0xe0   :  { %v836_v58 = vmul.f32 %v815_v5, %v1503_v38  ;;  %v843_v61 = vmul.f32 %v817_v23, %v1503_v38  ;;  %v855_v0 = vstv %s2213_s12  ;;  %v857_v34 = vstv %s2215_s13 }
  0xe1   :  { %v842_v27 = vadd.f32 %v841_v53, %v840_v25  ;;  %v830_v24 = vadd.f32 %v829_v48, %v828_v19  ;;  %v831_v1 = vmul.f32 %v820_v29, %v1511_v45  ;;  %v856_v36 = vmul.f32 %v855_v0, %v1497_v30 }
  0xe2   :  { %v858_v4 = vmul.f32 %v857_v34, %v1499_v31  ;;  %v850_v8 = vmax.f32 %v2248_v49, %v2234_v44  ;;  %v838_v10 = vmul.f32 %v817_v23, %v1511_v45  ;;  %v860_v54 = vstv %s2226_s14 }
  0xe3   :  { %v866_v62 = vmul.f32 %v857_v34, %v1497_v30  ;;  %v837_v43 = vadd.f32 %v836_v58, %v835_v57  ;;  %v861_v55 = vmul.f32 %v860_v54, %v1503_v38  ;;  %v863_v50 = vstv %s2232_s15 }
  0xe4   :  { %v859_v9 = vsub.f32 %v856_v36, %v858_v4  ;;  %v844_v51 = vsub.f32 %v842_v27, %v843_v61  ;;  %v845_v2 = vmul.f32 %v815_v5, %v1511_v45  ;;  %v867_v52 = vmul.f32 %v855_v0, %v1499_v31 }
  0xe5   :  { %v869_v11 = vmul.f32 %v863_v50, %v1503_v38  ;;  %v825_v22 = vsub.f32 %v822_v59, %v2251_v21  ;;  %v832_v46 = vsub.f32 %v830_v24, %v831_v1  ;;  %v864_v60 = vmul.f32 %v863_v50, %v1511_v45 }
  0xe6   :  { %v873_v14 = vmul.f32 %v860_v54, %v1497_v30  ;;  %v862_v63 = vsub.f32 %v859_v9, %v861_v55  ;;  %v868_v20 = vadd.f32 %v867_v52, %v866_v62  ;;  %v874_v23 = vmul.f32 %v863_v50, %v1499_v31 }
  0xe7   :  { %v876_v5 = vmul.f32 %v855_v0, %v1503_v38  ;;  %v839_v6 = vadd.f32 %v838_v10, %v837_v43  ;;  %v871_v26 = vmul.f32 %v860_v54, %v1511_v45  ;;  %v880_v7 = vmul.f32 %v863_v50, %v1497_v30 }
  0xe8   :  { %v881_v32 = vmul.f32 %v860_v54, %v1499_v31  ;;  %v846_v12 = vadd.f32 %v845_v2, %v844_v51  ;;  %v870_v29 = vadd.f32 %v869_v11, %v868_v20  ;;  %v875_v3 = vsub.f32 %v873_v14, %v874_v23 }
  0xe9   :  { %v883_v33 = vmul.f32 %v857_v34, %v1503_v38  ;;  %v878_v13 = vmul.f32 %v857_v34, %v1511_v45  ;;  %v895_v18 = vstv %s2264_s16  ;;  %v897_v40 = vstv %s2266_s17 }
  0xea   :  { %v882_v37 = vadd.f32 %v881_v32, %v880_v7  ;;  %v865_v35 = vsub.f32 %v862_v63, %v864_v60  ;;  %v877_v41 = vadd.f32 %v876_v5, %v875_v3  ;;  %v896_v15 = vmul.f32 %v895_v18, %v1497_v30 }
  0xeb   :  { %v898_v44 = vmul.f32 %v897_v40, %v1499_v31  ;;  %v872_v47 = vsub.f32 %v870_v29, %v871_v26  ;;  %v885_v48 = vmul.f32 %v855_v0, %v1511_v45  ;;  %v900_v17 = vstv %s2275_s1 }
  0xec   :  { %v884_v19 = vsub.f32 %v882_v37, %v883_v33  ;;  %v2302_v49 = vmax.f32 %v839_v6, %v849_v56  ;;  %v2305_v21 = vmax.f32 %v2218_v28, %v825_v22  ;;  %v903_v25 = vstv %s2280_s18 }
  0xed   :  { %v906_v53 = vmul.f32 %v897_v40, %v1497_v30  ;;  %v2311_v59 = vadd.f32 %v878_v13, %v877_v41  ;;  %v899_v57 = vsub.f32 %v896_v15, %v898_v44  ;;  %v901_v58 = vmul.f32 %v900_v17, %v1503_v38 }
  0xee   :  { %v907_v27 = vmul.f32 %v895_v18, %v1499_v31  ;;  %v2317_v61 = vmax.f32 %v846_v12, %v850_v8  ;;  %v2320_v56 = vmax.f32 %v2237_v39, %v832_v46  ;;  %v2323_v28 = vmax.f32 %v2240_v42, %v865_v35 }
  0xef   :  { %v913_v0 = vmul.f32 %v900_v17, %v1497_v30  ;;  %v2326_v34 = vadd.f32 %v885_v48, %v884_v19  ;;  %v2329_v24 = vmax.f32 %v2244_v16, %v872_v47  ;;  %v909_v1 = vmul.f32 %v903_v25, %v1503_v38 }
  0xf0   :  { %v914_v36 = vmul.f32 %v903_v25, %v1499_v31  ;;  %v908_v4 = vadd.f32 %v907_v27, %v906_v53  ;;  %v916_v39 = vmul.f32 %v895_v18, %v1503_v38  ;;  %v920_v8 = vmul.f32 %v903_v25, %v1497_v30 }
  0xf1   :  { %v921_v42 = vmul.f32 %v900_v17, %v1499_v31  ;;  %v929_v10 = vmax.f32 %v2311_v59, %v2302_v49  ;;  %v2338_v54 = vsub.f32 %v899_v57, %v901_v58  ;;  %v2341_v16 = vmul.f32 %v903_v25, %v1511_v45 }
  0xf2   :  { %v915_v62 = vsub.f32 %v913_v0, %v914_v36  ;;  %v923_v9 = vmul.f32 %v897_v40, %v1503_v38  ;;  %v935_v55 = vstv %s2296_s19  ;;  %v937_v50 = vstv %s2298_s20 }
  0xf3   :  { %v922_v43 = vadd.f32 %v921_v42, %v920_v8  ;;  %v911_v51 = vmul.f32 %v900_v17, %v1511_v45  ;;  %v918_v2 = vmul.f32 %v897_v40, %v1511_v45  ;;  %v936_v52 = vmul.f32 %v935_v55, %v1497_v30 }
  0xf4   :  { %v938_v11 = vmul.f32 %v937_v50, %v1499_v31  ;;  %v910_v22 = vadd.f32 %v909_v1, %v908_v4  ;;  %v917_v46 = vadd.f32 %v916_v39, %v915_v62  ;;  %v940_v60 = vstv %s2309_s2 }
  0xf5   :  { %v946_v14 = vmul.f32 %v937_v50, %v1497_v30  ;;  %v930_v63 = vmax.f32 %v2326_v34, %v2317_v61  ;;  %v941_v23 = vmul.f32 %v940_v60, %v1503_v38  ;;  %v943_v5 = vstv %s2315_s21 }
  0xf6   :  { %v939_v20 = vsub.f32 %v936_v52, %v938_v11  ;;  %v924_v6 = vsub.f32 %v922_v43, %v923_v9  ;;  %v925_v26 = vmul.f32 %v895_v18, %v1511_v45  ;;  %v947_v7 = vmul.f32 %v935_v55, %v1499_v31 }
  0xf7   :  { %v949_v32 = vmul.f32 %v943_v5, %v1503_v38  ;;  %v905_v12 = vsub.f32 %v2338_v54, %v2341_v16  ;;  %v944_v3 = vmul.f32 %v943_v5, %v1511_v45  ;;  %v953_v33 = vmul.f32 %v940_v60, %v1497_v30 }
  0xf8   :  { %v942_v29 = vsub.f32 %v939_v20, %v941_v23  ;;  %v912_v13 = vsub.f32 %v910_v22, %v911_v51  ;;  %v919_v37 = vadd.f32 %v918_v2, %v917_v46  ;;  %v948_v40 = vadd.f32 %v947_v7, %v946_v14 }
  0xf9   :  { %v954_v18 = vmul.f32 %v943_v5, %v1499_v31  ;;  %v951_v35 = vmul.f32 %v940_v60, %v1511_v45  ;;  %v956_v41 = vmul.f32 %v935_v55, %v1503_v38  ;;  %v960_v15 = vmul.f32 %v943_v5, %v1497_v30 }
  0xfa   :  { %v961_v44 = vmul.f32 %v940_v60, %v1499_v31  ;;  %v926_v47 = vadd.f32 %v925_v26, %v924_v6  ;;  %v950_v19 = vadd.f32 %v949_v32, %v948_v40  ;;  %v963_v17 = vmul.f32 %v937_v50, %v1503_v38 }
  0xfb   :  { %v955_v48 = vsub.f32 %v953_v33, %v954_v18  ;;  %v945_v25 = vsub.f32 %v942_v29, %v944_v3  ;;  %v975_v57 = vstv %s2350_s22  ;;  %v977_v58 = vstv %s2352_s23 }
  0xfc   :  { %v962_v53 = vadd.f32 %v961_v44, %v960_v15  ;;  %v958_v27 = vmul.f32 %v937_v50, %v1511_v45  ;;  %v965_v61 = vmul.f32 %v935_v55, %v1511_v45  ;;  %v976_v0 = vmul.f32 %v975_v57, %v1497_v30 }
  0xfd   :  { %v978_v34 = vmul.f32 %v977_v58, %v1499_v31  ;;  %v952_v1 = vsub.f32 %v950_v19, %v951_v35  ;;  %v957_v36 = vadd.f32 %v956_v41, %v955_v48  ;;  %v980_v4 = vstv %s2360_s24 }
  0xfe   :  { %v986_v39 = vmul.f32 %v977_v58, %v1497_v30  ;;  %v964_v8 = vsub.f32 %v962_v53, %v963_v17  ;;  %v981_v54 = vmul.f32 %v980_v4, %v1503_v38  ;;  %v983_v16 = vstv %s2365_s25 }
  0xff   :  { %v979_v42 = vsub.f32 %v976_v0, %v978_v34  ;;  %v927_v62 = vmax.f32 %v2305_v21, %v905_v12  ;;  %v928_v43 = vmax.f32 %v2320_v56, %v912_v13  ;;  %v987_v9 = vmul.f32 %v975_v57, %v1499_v31 }
 0x100   :  { %v2397_v55 = vmax.f32 %v919_v37, %v929_v10  ;;  %v2399_v50 = vmax.f32 %v926_v47, %v930_v63  ;;  %v984_v2 = vmul.f32 %v983_v16, %v1511_v45  ;;  %v989_v11 = vmul.f32 %v983_v16, %v1503_v38 }
 0x101   :  { %v982_v51 = vsub.f32 %v979_v42, %v981_v54  ;;  %v988_v52 = vadd.f32 %v987_v9, %v986_v39  ;;  %v993_v21 = vmul.f32 %v980_v4, %v1497_v30  ;;  %v994_v56 = vmul.f32 %v983_v16, %v1499_v31 }
 0x102   :  { %v959_v22 = vadd.f32 %v958_v27, %v957_v36  ;;  %v966_v46 = vadd.f32 %v965_v61, %v964_v8  ;;  %v967_v49 = vmax.f32 %v2323_v28, %v945_v25  ;;  %v968_v59 = vmax.f32 %v2329_v24, %v952_v1 }
 0x103   :  { %v991_v10 = vmul.f32 %v980_v4, %v1511_v45  ;;  %v996_v60 = vmul.f32 %v975_v57, %v1503_v38  ;;  %v1000_v14 = vmul.f32 %v983_v16, %v1497_v30  ;;  %v1001_v63 = vmul.f32 %v980_v4, %v1499_v31 }
 0x104   :  { %v985_v20 = vsub.f32 %v982_v51, %v984_v2  ;;  %v998_v23 = vmul.f32 %v977_v58, %v1511_v45  ;;  %v1015_v5 = vstv %s2383_s26  ;;  %v1017_v6 = vstv %s2385_s27 }
 0x105   :  { %v990_v26 = vadd.f32 %v989_v11, %v988_v52  ;;  %v995_v7 = vsub.f32 %v993_v21, %v994_v56  ;;  %v1016_v32 = vmul.f32 %v1015_v5, %v1497_v30  ;;  %v1018_v28 = vmul.f32 %v1017_v6, %v1499_v31 }
 0x106   :  { %v1003_v24 = vmul.f32 %v977_v58, %v1503_v38  ;;  %v1020_v12 = vstv %s1323_s28  ;;  %v1023_v29 = vstv %s1324_s29  ;;  %v1026_v3 = vmul.f32 %v1017_v6, %v1497_v30 }
 0x107   :  { %v1002_v33 = vadd.f32 %v1001_v63, %v1000_v14  ;;  %v1005_v13 = vmul.f32 %v975_v57, %v1511_v45  ;;  %v1019_v37 = vsub.f32 %v1016_v32, %v1018_v28  ;;  %v1021_v40 = vmul.f32 %v1020_v12, %v1503_v38 }
 0x108   :  { %v1007_v18 = vmax.f32 %v927_v62, %v985_v20  ;;  %v1024_v35 = vmul.f32 %v1023_v29, %v1511_v45  ;;  %v1027_v41 = vmul.f32 %v1015_v5, %v1499_v31  ;;  %v1029_v15 = vmul.f32 %v1023_v29, %v1503_v38 }
 0x109   :  { %v992_v44 = vsub.f32 %v990_v26, %v991_v10  ;;  %v997_v47 = vadd.f32 %v996_v60, %v995_v7  ;;  %v1022_v19 = vsub.f32 %v1019_v37, %v1021_v40  ;;  %v1033_v48 = vmul.f32 %v1020_v12, %v1497_v30 }
 0x10a   :  { %v1028_v17 = vadd.f32 %v1027_v41, %v1026_v3  ;;  %v1031_v25 = vmul.f32 %v1020_v12, %v1511_v45  ;;  %v1034_v53 = vmul.f32 %v1023_v29, %v1499_v31  ;;  %v1036_v57 = vmul.f32 %v1015_v5, %v1503_v38 }
 0x10b   :  { %v1004_v58 = vsub.f32 %v1002_v33, %v1003_v24  ;;  %v1025_v27 = vsub.f32 %v1022_v19, %v1024_v35  ;;  %v1040_v61 = vmul.f32 %v1023_v29, %v1497_v30  ;;  %v1041_v0 = vmul.f32 %v1020_v12, %v1499_v31 }
 0x10c   :  { %v1009_v34 = vmax.f32 %v959_v22, %v2397_v55  ;;  %v1030_v1 = vadd.f32 %v1029_v15, %v1028_v17  ;;  %v1035_v36 = vsub.f32 %v1033_v48, %v1034_v53  ;;  %v1043_v4 = vmul.f32 %v1017_v6, %v1503_v38 }
 0x10d   :  { %v999_v39 = vadd.f32 %v998_v23, %v997_v47  ;;  %v1038_v8 = vmul.f32 %v1017_v6, %v1511_v45  ;;  %v1042_v42 = vadd.f32 %v1041_v0, %v1040_v61  ;;  %v1047_v54 = vmax.f32 %v967_v49, %v1025_v27 }
 0x10e   :  { %v1010_v16 = vmax.f32 %v966_v46, %v2399_v50  ;;  %v1008_v62 = vmax.f32 %v928_v43, %v992_v44  ;;  %v1032_v9 = vsub.f32 %v1030_v1, %v1031_v25  ;;  %v1037_v51 = vadd.f32 %v1036_v57, %v1035_v36 }
 0x10f   :  { %v1006_v2 = vadd.f32 %v1005_v13, %v1004_v58  ;;  %v1044_v30 = vsub.f32 %v1042_v42, %v1043_v4  ;;  %v1045_v31 = vmul.f32 %v1015_v5, %v1511_v45  ;;  %v2434_v52 = vmax.f32 %v1007_v18, %v1047_v54 }
 0x110   :  { %v1048_v55 = vmax.f32 %v968_v59, %v1032_v9  ;;  %v1049_v11 = vmax.f32 %v999_v39, %v1009_v34  ;;  %v1039_v21 = vadd.f32 %v1038_v8, %v1037_v51  ;;  %v1429_v36 = vmov 1.2516484  }
 0x111   :  { %v2437_v38 = vand.u32 2147483647, %v2434_v52  ;;  %v1050_v22 = vmax.f32 %v1006_v2, %v1010_v16  ;;  %v1046_v49 = vadd.f32 %v1045_v31, %v1044_v30  ;;  %vm1056_vm0 = vcmp.lt.f32.partialorder %v2434_v52, 0.0 }
 0x112   :  { %v2439_v56 = vmax.f32 %v1008_v62, %v1048_v55  ;;  %v2448_v45 = vmax.f32 %v1039_v21, %v1049_v11  ;;  %v1086_v61 = vmul.f32 -4.5883145, %v2434_v52  ;;  %v1087_v4 = vsel %vm1056_vm0, 5.031537, %v1429_v36 }
 0x113   :  { %v1057_v43 = vmul.f32 -0.0012624911, %v2437_v38  ;;  %v2443_v50 = vsub.f32 1.0, %v2437_v38  ;;  %v2451_v60 = vmax.f32 %v1046_v49, %v1050_v22  ;;  %vm1083_vm3 = vcmp.gt.f32.partialorder %v2437_v38, 0.9 }
 0x114   :  { %v2446_v46 = vand.u32 2147483647, %v2439_v56  ;;  %v2459_v5 = vand.u32 2147483647, %v2448_v45  ;;  %vm1084_vm4 = vcmp.le.f32.partialorder %v2437_v38, 1.0  ;;  %v1088_v30 = vadd.f32 %v1087_v4, %v1086_v61 }
 0x115   :  { %v1058_v59 = vadd.f32 0.00667009, %v1057_v43  ;;  %1332 = vrsqrt.f32 %v2443_v50  ;;  %v2466_v32 = vand.u32 2147483647, %v2451_v60  ;;  %vm1074_vm1 = vcmp.eq.f32.partialorder %v2443_v50, inf  ;;  %vm2537_vm12 = vmand %vm1083_vm3, %vm1084_vm4 }
 0x116   :  { %v1093_v10 = vmul.f32 -0.0012624911, %v2446_v46  ;;  %v2455_v63 = vsub.f32 1.0, %v2446_v46  ;;  %v1130_v7 = vmul.f32 -0.0012624911, %v2459_v5  ;;  %v2469_v24 = vsub.f32 1.0, %v2459_v5 }
 0x117   :  { %v1059_v14 = vmul.f32 %v1058_v59, %v2437_v38  ;;  %v1167_v37 = vmul.f32 -0.0012624911, %v2466_v32  ;;  %v2477_v18 = vsub.f32 1.0, %v2466_v32  ;;  %vm1076_vm2 = vcmp.eq.f32.partialorder %v2443_v50, 0.0 }
 0x118   :  { %v1094_v20 = vadd.f32 0.00667009, %v1093_v10  ;;  %1334 = vrsqrt.f32 %v2455_v63  ;;  %v1131_v29 = vadd.f32 0.00667009, %v1130_v7  ;;  %v1077_v8 = vand.u32 2147483648, %v2443_v50 }
 0x119   :  { %v1060_v23 = vadd.f32 -0.017088126, %v1059_v14  ;;  %1336 = vrsqrt.f32 %v2469_v24  ;;  %v1168_v15 = vadd.f32 0.00667009, %v1167_v37  ;;  %vm1110_vm5 = vcmp.eq.f32.partialorder %v2455_v63, inf }
 0x11a   :  { %v1095_v6 = vmul.f32 %v1094_v20, %v2446_v46  ;;  %v1132_v13 = vmul.f32 %v1131_v29, %v2459_v5  ;;  %1338 = vrsqrt.f32 %v2477_v18  ;;  %vm1092_vm6 = vcmp.lt.f32.partialorder %v2439_v56, 0.0 }
 0x11b   :  { %v1061_v26 = vmul.f32 %v1060_v23, %v2437_v38  ;;  %v1169_v25 = vmul.f32 %v1168_v15, %v2466_v32  ;;  %vm1112_vm7 = vcmp.eq.f32.partialorder %v2455_v63, 0.0  ;;  %v1113_v21 = vand.u32 2147483648, %v2455_v63 }
 0x11c   :  { %v1096_v28 = vadd.f32 -0.017088126, %v1095_v6  ;;  %v1133_v41 = vadd.f32 -0.017088126, %v1132_v13  ;;  %vm1119_vm8 = vcmp.gt.f32.partialorder %v2446_v46, 0.9 }
 0x11d   :  { %v1062_v12 = vadd.f32 0.03089188, %v1061_v26  ;;  %v1170_v34 = vadd.f32 -0.017088126, %v1169_v25  ;;  %v1122_v26 = vmul.f32 -4.5883145, %v2439_v56 }
 0x11e   :  { %v1097_v3 = vmul.f32 %v1096_v28, %v2446_v46  ;;  %v1134_v48 = vmul.f32 %v1133_v41, %v2459_v5  ;;  %vm1147_vm9 = vcmp.eq.f32.partialorder %v2469_v24, inf  ;;  %v1123_v29 = vsel %vm1092_vm6, 5.031537, %v1429_v36 }
 0x11f   :  { %v1063_v33 = vmul.f32 %v1062_v12, %v2437_v38  ;;  %v1333_v44 = vpop.eup %1332  ;;  %v1171_v16 = vmul.f32 %v1170_v34, %v2466_v32  ;;  %vm1120_vm10 = vcmp.le.f32.partialorder %v2446_v46, 1.0  ;;  %v1150_v13 = vand.u32 2147483648, %v2469_v24 }
 0x120   :  { %v1098_v40 = vadd.f32 0.03089188, %v1097_v3  ;;  %v1073_v58 = vmul.f32 %v1333_v44, %v2443_v50  ;;  %v1135_v27 = vadd.f32 0.03089188, %v1134_v48  ;;  %vm1149_vm11 = vcmp.eq.f32.partialorder %v2469_v24, 0.0 }
 0x121   :  { %v1064_v35 = vadd.f32 -0.050174303, %v1063_v33  ;;  %v1172_v55 = vadd.f32 0.03089188, %v1171_v16  ;;  %v1124_v15 = vadd.f32 %v1123_v29, %v1122_v26  ;;  %vm1129_vm13 = vcmp.lt.f32.partialorder %v2448_v45, 0.0 }
 0x122   :  { %v1099_v47 = vmul.f32 %v1098_v40, %v2446_v46  ;;  %v1335_v53 = vpop.eup %1334  ;;  %v1136_v39 = vmul.f32 %v1135_v27, %v2459_v5  ;;  %v1075_v9 = vsel %vm1074_vm1, %v2443_v50, %v1073_v58  ;;  %vm1184_vm14 = vcmp.eq.f32.partialorder %v2477_v18, inf }
 0x123   :  { %v1065_v19 = vmul.f32 %v1064_v35, %v2437_v38  ;;  %v1109_v54 = vmul.f32 %v1335_v53, %v2455_v63  ;;  %v1337_v2 = vpop.eup %1336  ;;  %v1078_v49 = vsel %vm1076_vm2, %v1077_v8, %v1075_v9  ;;  %v1173_v10 = vmul.f32 %v1172_v55, %v2466_v32 }
 0x124   :  { %v1100_v17 = vadd.f32 -0.050174303, %v1099_v47  ;;  %v1137_v51 = vadd.f32 -0.050174303, %v1136_v39  ;;  %v1146_v23 = vmul.f32 %v1337_v2, %v2469_v24  ;;  %v1339_v50 = vpop.eup %1338  ;;  %v1159_v58 = vmul.f32 -4.5883145, %v2448_v45 }
 0x125   :  { %v1066_v57 = vadd.f32 0.08897899, %v1065_v19  ;;  %v1111_v59 = vsel %vm1110_vm5, %v2455_v63, %v1109_v54  ;;  %v1174_v7 = vadd.f32 -0.050174303, %v1173_v10  ;;  %v1183_v47 = vmul.f32 %v1339_v50, %v2477_v18 }
 0x126   :  { %v1101_v0 = vmul.f32 %v1100_v17, %v2446_v46  ;;  %v1138_v22 = vmul.f32 %v1137_v51, %v2459_v5  ;;  %v1114_v12 = vsel %vm1112_vm7, %v1113_v21, %v1111_v59  ;;  %v1148_v41 = vsel %vm1147_vm9, %v2469_v24, %v1146_v23 }
 0x127   :  { %v1067_v1 = vmul.f32 %v1066_v57, %v2437_v38  ;;  %v1175_v37 = vmul.f32 %v1174_v7, %v2466_v32  ;;  %v1151_v53 = vsel %vm1149_vm11, %v1150_v13, %v1148_v41  ;;  %vm1186_vm15 = vcmp.eq.f32.partialorder %v2477_v18, 0.0 }
 0x128   :  { %v1102_v42 = vadd.f32 0.08897899, %v1101_v0  ;;  %v1139_v20 = vadd.f32 0.08897899, %v1138_v22  ;;  %v1185_v34 = vsel %vm1184_vm14, %v2477_v18, %v1183_v47  ;;  %v1160_v39 = vsel %vm1129_vm13, 5.031537, %v1429_v36 }
 0x129   :  { %v1068_v62 = vadd.f32 -0.2145988, %v1067_v1  ;;  %v1176_v44 = vadd.f32 0.08897899, %v1175_v37  ;;  %vm1156_vm1 = vcmp.gt.f32.partialorder %v2459_v5, 0.9  ;;  %v1161_v54 = vadd.f32 %v1160_v39, %v1159_v58 }
 0x12a   :  { %v1103_v31 = vmul.f32 %v1102_v42, %v2446_v46  ;;  %v1140_v3 = vmul.f32 %v1139_v20, %v2459_v5  ;;  %vm1157_vm2 = vcmp.le.f32.partialorder %v2459_v5, 1.0  ;;  %vm1166_vm3 = vcmp.lt.f32.partialorder %v2451_v60, 0.0 }
 0x12b   :  { %v1069_v11 = vmul.f32 %v1068_v62, %v2437_v38  ;;  %v1177_v52 = vmul.f32 %v1176_v44, %v2466_v32  ;;  %v1187_v38 = vand.u32 2147483648, %v2477_v18  ;;  %vm1158_vm4 = vmand %vm1156_vm1, %vm1157_vm2  ;;  %v1196_v9 = vmul.f32 -4.5883145, %v2451_v60 }
 0x12c   :  { %v1104_v43 = vadd.f32 -0.2145988, %v1103_v31  ;;  %v1141_v35 = vadd.f32 -0.2145988, %v1140_v3  ;;  %v1197_v2 = vsel %vm1166_vm3, 5.031537, %v1429_v36 }
 0x12d   :  { %v1070_v14 = vadd.f32 1.5707963, %v1069_v11  ;;  %v1178_v0 = vadd.f32 -0.2145988, %v1177_v52  ;;  %vm1193_vm5 = vcmp.gt.f32.partialorder %v2466_v32, 0.9  ;;  %v1198_v31 = vadd.f32 %v1197_v2, %v1196_v9 }
 0x12e   :  { %v1105_v6 = vmul.f32 %v1104_v43, %v2446_v46  ;;  %v1142_v24 = vmul.f32 %v1141_v35, %v2459_v5  ;;  %v1188_v46 = vsel %vm1186_vm15, %v1187_v38, %v1185_v34 }
 0x12f   :  { %v1079_v28 = vmul.f32 %v1078_v49, %v1070_v14  ;;  %v1179_v56 = vmul.f32 %v1178_v0, %v2466_v32 }
 0x130   :  { %v1106_v33 = vadd.f32 1.5707963, %v1105_v6  ;;  %v1143_v57 = vadd.f32 1.5707963, %v1142_v24 }
 0x131   :  { %v1080_v40 = vsub.f32 3.1415927, %v1079_v28  ;;  %v1180_v16 = vadd.f32 1.5707963, %v1179_v56 }
 0x132   :  { %v1115_v63 = vmul.f32 %v1114_v12, %v1106_v33  ;;  %v1152_v4 = vmul.f32 %v1151_v53, %v1143_v57 }
 0x133   :  { %v1081_v19 = vsel %vm1056_vm0, %v1080_v40, %v1079_v28  ;;  %vm1121_vm0 = vmand %vm1119_vm8, %vm1120_vm10  ;;  %v1189_v5 = vmul.f32 %v1188_v46, %v1180_v16 }
 0x134   :  { %v1082_v17 = vmul.f32 2.0, %v1081_v19  ;;  %v1116_v25 = vsub.f32 3.1415927, %v1115_v63  ;;  %v1153_v42 = vsub.f32 3.1415927, %v1152_v4 }
 0x136   :  { %v1089_v27 = vsel %vm2537_vm12, %v1088_v30, %v1082_v17  ;;  %v1117_v61 = vsel %vm1092_vm6, %v1116_v25, %v1115_v63  ;;  %v1154_v62 = vsel %vm1129_vm13, %v1153_v42, %v1152_v4  ;;  %vm1194_vm6 = vcmp.le.f32.partialorder %v2466_v32, 1.0 }
 0x137   :  { %1090 = vst [vmem:[#allocation9] sm:$0xff] %v1089_v27  ;;  %v1118_v1 = vmul.f32 2.0, %v1117_v61  ;;  %v1155_v51 = vmul.f32 2.0, %v1154_v62  ;;  %v1190_v30 = vsub.f32 3.1415927, %v1189_v5  ;;  %vm1195_vm7 = vmand %vm1193_vm5, %vm1194_vm6 }
 0x139   :  { %v1125_v8 = vsel %vm1121_vm0, %v1124_v15, %v1118_v1  ;;  %v1162_v18 = vsel %vm1158_vm4, %v1161_v54, %v1155_v51  ;;  %v1191_v45 = vsel %vm1166_vm3, %v1190_v30, %v1189_v5 }
 0x13a   :  { %1127 = vst [vmem:[#allocation9 + $0x8] sm:$0xff] %v1125_v8  ;;  %1164 = vst [vmem:[#allocation9 + $0x10] sm:$0xff] %v1162_v18  ;;  %v1192_v55 = vmul.f32 2.0, %v1191_v45 }
 0x13c   :  { %v1199_v11 = vsel %vm1195_vm7, %v1198_v31, %v1192_v55 }
 0x13d   :  { %1201 = vst [vmem:[#allocation9 + $0x18] sm:$0xff] %v1199_v11 }
 0x13e   :  { %1405 = shalt.err (!%p1402_p9)
}
 0x13f   :  { %s1406_s9 = scalar_lea.hbm %s2594_s3, 512 }
 0x140   :  { %p1407_p10 = scmp.ne.s32.totalorder %s2594_s3, %s1406_s9  ;;  %p1410_p11 = scmp.lt.u32.totalorder %s1406_s9, %s2594_s3 }
 0x142   :  { %p1412_p12 = pnand %p1410_p11, %p1407_p10 }
 0x144   :  { %1415 = shalt.err (!%p1412_p12)
}
 0x145   :  { %1213 = dma.vmem_to_hbm [thread:$0]  %s1208_s4, 512, %s2594_s3, [#allocation4], %s1426_s0, %s1426_s0, %s1427_s5  }
 0x146   :  { %1422 = dma.done.wait [#allocation4], 512  }
 0x147   :  { %1423 = vsyncadd [#allocation4], 4294966784 }
 0x148   :  { %1217 = vsyncpa [#allocation3], 1 }
 0x149   :  { %1218 = vsyncpa [#allocation8], 1 }
 0x14a   :  { %1219 = vsyncpa [#allocation4], 1 }
 0x14b   :  { %1220 = vsyncpa [#allocation5], 1 }

</bundles_post_ra>
